<compile_context>
chip_gen: v5e
topology: v5e:2x2
jax: 0.10.0
libtpu: 0.0.40
codegen_flags: <defaults>
</compile_context>

<pallas_src>
import jax
import jax.numpy as jnp
from jax.experimental import pallas as pl
from jax.experimental.pallas import tpu as pltpu


# ----------------------------- Pallas kernels ------------------------------

def _conv_gemm_kernel(p_ref, w_ref, b_ref, o_ref):
    # Transposed conv-as-GEMM tile: for each image i in the tile,
    #   out[i] = relu(W (Cout,F) @ P_i (F,S) + b)
    # W/b are grid-resident (constant index_map); S (flattened spatial) lands on lanes.
    w = w_ref[...]                    # (Cout, F)
    b = b_ref[...]                    # (Cout, 1) -> lane broadcast
    for i in range(p_ref.shape[0]):   # static unroll over the images in this tile
        y = jnp.dot(w, p_ref[i], preferred_element_type=jnp.float32)   # (Cout, S) on the MXU
        o_ref[i] = jnp.maximum(y + b, 0.0).astype(o_ref.dtype)


def _head_kernel(x_ref, w_fc_ref, b_fc_ref, w_v_ref, b_v_ref, hid_ref, val_ref):
    # Fused: hidden = relu(x @ W_fc + b_fc); value = hidden @ w_v + b_v
    h = jnp.dot(x_ref[...], w_fc_ref[...], preferred_element_type=jnp.float32)
    h = jnp.maximum(h + b_fc_ref[...], 0.0)
    hid_ref[...] = h.astype(hid_ref.dtype)
    # Critic head: (TB,H)@(H,1) would waste the MXU -> VPU multiply + lane reduce instead.
    v = jnp.sum(h * w_v_ref[...], axis=-1, keepdims=True) + b_v_ref[0, 0]
    val_ref[...] = v.astype(val_ref.dtype)


# ----------------------------- tiling helpers -------------------------------

def _round_up(x, m):
    return ((x + m - 1) // m) * m


def _cdiv(a, b):
    return -(-a // b)


def _batch_tiles(B, per_img_bytes, budget_bytes=3 << 20, max_cap=16):
    """Images-per-grid-step for the conv kernels (leading dim, no (8,128) constraint)."""
    cap = max(1, min(max_cap, budget_bytes // max(1, per_img_bytes)))
    nt = _cdiv(B, cap)
    if B > 1:
        nt = max(nt, 2)      # >= 2 grid steps so v7x's two TensorCores both get work
    tb = _cdiv(B, nt)
    nt = _cdiv(B, tb)
    return tb, nt * tb, nt   # tile, padded batch, num tiles


def _head_tiles(B, cap=256):
    """Row tiles for the FC head (second-last block dim: multiple of 8 or full extent)."""
    nt = _cdiv(B, cap)
    if B >= 16:
        nt = max(nt, 2)
    if nt == 1:
        return B, B, 1
    tb = _round_up(_cdiv(B, nt), 8)
    nt = _cdiv(B, tb)
    return tb, nt * tb, nt


# ----------------------------- wrappers -------------------------------------

def conv_gemm_bias_relu(patches, w, b):
    """relu(W @ P_i + b) per image. patches: (B, F, S) NCHW im2col; w: (Cout, F); b: (Cout,).
    Output (B, Cout, S) -- i.e. NCHW with flattened spatial, ready to chain."""
    B, F, S = patches.shape
    Cout, Fw = w.shape
    assert F == Fw
    tb, Bp, nt = _batch_tiles(B, 4 * F * S)
    p = patches if Bp == B else jnp.pad(patches, ((0, Bp - B), (0, 0), (0, 0)))
    flops = 2 * Bp * Cout * F * S
    bytes_accessed = 4 * (Bp * F * S + Cout * F + Cout + Bp * Cout * S)
    out = pl.pallas_call(
        _conv_gemm_kernel,
        out_shape=jax.ShapeDtypeStruct((Bp, Cout, S), jnp.float32),
        grid=(nt,),
        in_specs=[pl.BlockSpec((tb, F, S), lambda i: (i, 0, 0)),
                  pl.BlockSpec((Cout, F), lambda i: (0, 0)),     # resident weights
                  pl.BlockSpec((Cout, 1), lambda i: (0, 0))],    # resident bias
        out_specs=pl.BlockSpec((tb, Cout, S), lambda i: (i, 0, 0)),
        compiler_params=pltpu.CompilerParams(dimension_semantics=("parallel",)),
        cost_estimate=pl.CostEstimate(flops=flops, transcendentals=0,
                                      bytes_accessed=bytes_accessed),
    )(p, w, b.reshape(Cout, 1))
    return out if Bp == B else out[:B]


def fc_critic_head(x, w_fc, b_fc, w_v, b_v):
    """Fused Linear(K,H)+ReLU and critic Linear(H,1). Grid over batch-row tiles."""
    B, K = x.shape
    Kw, H = w_fc.shape
    assert K == Kw
    tb, Bp, nt = _head_tiles(B)
    xp = x if Bp == B else jnp.pad(x, ((0, Bp - B), (0, 0)))
    flops = 2 * Bp * K * H + 2 * Bp * H
    bytes_accessed = 4 * (Bp * K + K * H + 2 * H + Bp * H + Bp + 1)
    hid, val = pl.pallas_call(
        _head_kernel,
        out_shape=(jax.ShapeDtypeStruct((Bp, H), jnp.float32),
                   jax.ShapeDtypeStruct((Bp, 1), jnp.float32)),
        grid=(nt,),
        in_specs=[pl.BlockSpec((tb, K), lambda i: (i, 0)),
                  pl.BlockSpec((K, H), lambda i: (0, 0)),        # resident W_fc
                  pl.BlockSpec((1, H), lambda i: (0, 0)),
                  pl.BlockSpec((1, H), lambda i: (0, 0)),
                  pl.BlockSpec(memory_space=pltpu.MemorySpace.SMEM)],
        out_specs=(pl.BlockSpec((tb, H), lambda i: (i, 0)),
                   pl.BlockSpec((tb, 1), lambda i: (i, 0))),
        compiler_params=pltpu.CompilerParams(dimension_semantics=("parallel",)),
        cost_estimate=pl.CostEstimate(flops=flops, transcendentals=0,
                                      bytes_accessed=bytes_accessed),
    )(xp, w_fc, b_fc.reshape(1, H), w_v.reshape(1, H), b_v.reshape(1, 1))
    if Bp == B:
        return hid, val
    return hid[:B], val[:B]


def _im2col_nchw(x, ksize, stride):
    """NCHW im2col. x: (B, C, H, W) -> (B, K*K*C, Ho*Wo) with feature order (kh, kw, c).
    No layout transpose of the activation is needed; slices + concat only."""
    B, C, H, W = x.shape
    Ho = (H - ksize) // stride + 1
    Wo = (W - ksize) // stride + 1
    cols = []
    for kh in range(ksize):
        for kw in range(ksize):
            patch = jax.lax.slice(
                x,
                (0, 0, kh, kw),
                (B, C, kh + stride * (Ho - 1) + 1, kw + stride * (Wo - 1) + 1),
                (1, 1, stride, stride))
            cols.append(patch)                       # (B, C, Ho, Wo)
    p = jnp.concatenate(cols, axis=1)                # (B, K*K*C, Ho, Wo)
    return p.reshape(B, ksize * ksize * C, Ho * Wo), Ho, Wo


def pack_params(params):
    """One-time repacking of PyTorch-layout params into transposed-GEMM layout.
    The 1/255 input normalization is folded into w1 (conv is linear -> exact)."""
    def conv_w_to_mat(w):   # (Cout, Cin, K, K) -> (Cout, K*K*Cin), column order (kh, kw, cin)
        Cout, Cin, K, _ = w.shape
        return jnp.transpose(w, (0, 2, 3, 1)).reshape(Cout, K * K * Cin)

    return {
        "w1": conv_w_to_mat(params["conv1_w"]) * (1.0 / 255.0),   # /255 folded in
        "b1": params["conv1_b"],
        "w2": conv_w_to_mat(params["conv2_w"]), "b2": params["conv2_b"],
        "w3": conv_w_to_mat(params["conv3_w"]), "b3": params["conv3_b"],
        # Conv path stays in NCHW, so PyTorch's Flatten order is reproduced exactly and
        # fc_w needs no row permutation.
        "w_fc": params["fc_w"], "b_fc": params["fc_b"],
        "w_v": params["critic_w"], "b_v": params["critic_b"],
    }


@jax.jit
def cnn_base_forward(inputs, rnn_hxs, masks, packed):
    # CNNBase.forward, recurrent=False: return (critic_linear(x), x, rnn_hxs)
    B = inputs.shape[0]
    x = inputs.astype(jnp.float32)                    # NOTE: no /255 here (folded into w1)

    p, Ho, Wo = _im2col_nchw(x, 8, 4)                            # (B, 256, 400)
    y = conv_gemm_bias_relu(p, packed["w1"], packed["b1"])       # (B, 32, 400)  NCHW
    p, Ho, Wo = _im2col_nchw(y.reshape(B, 32, Ho, Wo), 4, 2)     # (B, 512, 81)
    y = conv_gemm_bias_relu(p, packed["w2"], packed["b2"])       # (B, 64, 81)
    p, Ho, Wo = _im2col_nchw(y.reshape(B, 64, Ho, Wo), 3, 1)     # (B, 576, 49)
    y = conv_gemm_bias_relu(p, packed["w3"], packed["b3"])       # (B, 32, 49)
    feat = y.reshape(B, -1)                                      # (B, 1568) PyTorch flatten order

    hidden, value = fc_critic_head(feat, packed["w_fc"], packed["b_fc"],
                                   packed["w_v"], packed["b_v"])
    return value, hidden, rnn_hxs


# ----------------------------- reference & demo -----------------------------

def init_params(key, num_inputs, hidden_size):
    ks = jax.random.split(key, 10)

    def conv(kw, kb, cout, cin, ksz):
        fan_in = cin * ksz * ksz
        w = jax.random.normal(kw, (cout, cin, ksz, ksz), jnp.float32) * jnp.sqrt(2.0 / fan_in)
        b = jax.random.normal(kb, (cout,), jnp.float32) * 0.01
        return w, b

    def lin(kw, kb, fin, fout, gain):
        w = jax.random.normal(kw, (fin, fout), jnp.float32) * (gain / jnp.sqrt(fin))
        b = jax.random.normal(kb, (fout,), jnp.float32) * 0.01
        return w, b

    c1w, c1b = conv(ks[0], ks[1], 32, num_inputs, 8)
    c2w, c2b = conv(ks[2], ks[3], 64, 32, 4)
    c3w, c3b = conv(ks[4], ks[5], 32, 64, 3)
    fcw, fcb = lin(ks[6], ks[7], 32 * 7 * 7, hidden_size, jnp.sqrt(2.0))
    vw, vb = lin(ks[8], ks[9], hidden_size, 1, 1.0)
    return dict(conv1_w=c1w, conv1_b=c1b, conv2_w=c2w, conv2_b=c2b,
                conv3_w=c3w, conv3_b=c3b, fc_w=fcw, fc_b=fcb,
                critic_w=vw, critic_b=vb)


def reference_forward(inputs, rnn_hxs, masks, params):
    x = inputs.astype(jnp.float32) / 255.0

    def conv(x, w, b, stride):
        y = jax.lax.conv_general_dilated(
            x, w, window_strides=(stride, stride), padding="VALID",
            dimension_numbers=("NCHW", "OIHW", "NCHW"),
            precision=jax.lax.Precision.HIGHEST)
        return y + b.reshape(1, -1, 1, 1)

    x = jax.nn.relu(conv(x, params["conv1_w"], params["conv1_b"], 4))
    x = jax.nn.relu(conv(x, params["conv2_w"], params["conv2_b"], 2))
    x = jax.nn.relu(conv(x, params["conv3_w"], params["conv3_b"], 1))
    x = x.reshape(x.shape[0], -1)                      # PyTorch Flatten on NCHW
    x = jax.nn.relu(jnp.dot(x, params["fc_w"], precision=jax.lax.Precision.HIGHEST)
                    + params["fc_b"])
    value = (jnp.dot(x, params["critic_w"], precision=jax.lax.Precision.HIGHEST)
             + params["critic_b"])
    return value, x, rnn_hxs


if __name__ == "__main__":
    key = jax.random.PRNGKey(0)
    k_x, k_p = jax.random.split(key)

    # 84x84 input is what Flatten -> Linear(32*7*7, hidden) implies; 4 stacked frames.
    B, C, H, W = 2, 4, 84, 84
    hidden_size = 512
    inputs = jax.random.uniform(k_x, (B, C, H, W), jnp.float32, 0.0, 255.0)
    rnn_hxs = jnp.zeros((B, 1), jnp.float32)          # non-recurrent: hidden-state size 1
    masks = jnp.ones((B, 1), jnp.float32)

    params = init_params(k_p, C, hidden_size)
    packed = pack_params(params)

    value, hidden, hxs_out = cnn_base_forward(inputs, rnn_hxs, masks, packed)
    value = jax.block_until_ready(value)
    hidden = jax.block_until_ready(hidden)

    ref_value, ref_hidden, _ = reference_forward(inputs, rnn_hxs, masks, params)

    assert value.shape == (B, 1) and hidden.shape == (B, hidden_size)
    assert hxs_out.shape == rnn_hxs.shape
    assert jnp.allclose(hidden, ref_hidden, atol=2e-3, rtol=2e-3), \
        float(jnp.max(jnp.abs(hidden - ref_hidden)))
    assert jnp.allclose(value, ref_value, atol=2e-3, rtol=2e-3), \
        float(jnp.max(jnp.abs(value - ref_value)))

    print("KERNEL_OK")
</pallas_src>

<mosaic_0001>
module attributes {stable_mosaic.version = 11 : i64} {
  func.func @_conv_gemm_kernel(%arg0: i32, %arg1: memref<1x256x400xf32, #tpu.memory_space<vmem>>, %arg2: memref<32x256xf32, #tpu.memory_space<vmem>>, %arg3: memref<32x1xf32, #tpu.memory_space<vmem>>, %arg4: memref<1x32x400xf32, #tpu.memory_space<vmem>>) attributes {dimension_semantics = [#tpu.dimension_semantics<parallel>], iteration_bounds = array<i64: 2>, scalar_prefetch = 0 : i64, scratch_operands = 0 : i64, tpu.core_type = #tpu.core_type<tc>, window_params = [{transform_indices = @transform_0, window_bounds = array<i64: 1, 256, 400>}, {pipeline_mode = #tpu.pipeline_mode<synchronous>, transform_indices = @transform_1, window_bounds = array<i64: 32, 256>}, {pipeline_mode = #tpu.pipeline_mode<synchronous>, transform_indices = @transform_2, window_bounds = array<i64: 32, 1>}, {transform_indices = @transform_3, window_bounds = array<i64: 1, 32, 400>}]} {
    %c0 = arith.constant 0 : index
    %c0_0 = arith.constant 0 : index
    %0 = vector.load %arg2[%c0, %c0_0] : memref<32x256xf32, #tpu.memory_space<vmem>>, vector<32x256xf32>
    %c0_1 = arith.constant 0 : index
    %c0_2 = arith.constant 0 : index
    %1 = vector.load %arg3[%c0_1, %c0_2] : memref<32x1xf32, #tpu.memory_space<vmem>>, vector<32x1xf32>
    %c0_3 = arith.constant 0 : index
    %c0_4 = arith.constant 0 : index
    %c0_5 = arith.constant 0 : index
    %2 = vector.load %arg1[%c0_3, %c0_4, %c0_5] : memref<1x256x400xf32, #tpu.memory_space<vmem>>, vector<1x256x400xf32>
    %3 = vector.shape_cast %2 : vector<1x256x400xf32> to vector<256x400xf32>
    %cst = arith.constant dense<0.000000e+00> : vector<32x400xf32>
    %4 = tpu.matmul %0, %3, %cst {dimension_numbers = #tpu.dot_dimension_numbers<[1], [0], [0], [1], [0, 0, 1, 1], [], []>} : vector<32x256xf32>, vector<256x400xf32>, vector<32x400xf32> -> vector<32x400xf32>
    %5 = vector.broadcast %1 : vector<32x1xf32> to vector<32x400xf32>
    %6 = arith.addf %4, %5 : vector<32x400xf32>
    %cst_6 = arith.constant 0.000000e+00 : f32
    %7 = vector.broadcast %cst_6 : f32 to vector<32x400xf32>
    %8 = arith.maximumf %6, %7 : vector<32x400xf32>
    %c0_7 = arith.constant 0 : index
    %c0_8 = arith.constant 0 : index
    %c0_9 = arith.constant 0 : index
    %9 = vector.load %arg4[%c0_7, %c0_8, %c0_9] : memref<1x32x400xf32, #tpu.memory_space<vmem>>, vector<1x32x400xf32>
    %10 = vector.shape_cast %9 : vector<1x32x400xf32> to vector<32x400xf32>
    %11 = vector.shape_cast %8 : vector<32x400xf32> to vector<1x32x400xf32>
    tpu.vector_store %arg4[%c0_7, %c0_8, %c0_9], %11 {strides = array<i32>} : memref<1x32x400xf32, #tpu.memory_space<vmem>>, vector<1x32x400xf32>,
    return
  }
  func.func @transform_0(%arg0: i32) -> (i32, i32, i32) {
    %c0_i32 = arith.constant 0 : i32
    %c0_i32_0 = arith.constant 0 : i32
    %c0_i32_1 = arith.constant 0 : i32
    return %arg0, %c0_i32, %c0_i32_0 : i32, i32, i32
  }
  func.func @transform_1(%arg0: i32) -> (i32, i32) {
    %c0_i32 = arith.constant 0 : i32
    %c0_i32_0 = arith.constant 0 : i32
    %c0_i32_1 = arith.constant 0 : i32
    return %c0_i32, %c0_i32_0 : i32, i32
  }
  func.func @transform_2(%arg0: i32) -> (i32, i32) {
    %c0_i32 = arith.constant 0 : i32
    %c0_i32_0 = arith.constant 0 : i32
    %c0_i32_1 = arith.constant 0 : i32
    return %c0_i32, %c0_i32_0 : i32, i32
  }
  func.func @transform_3(%arg0: i32) -> (i32, i32, i32) {
    %c0_i32 = arith.constant 0 : i32
    %c0_i32_0 = arith.constant 0 : i32
    %c0_i32_1 = arith.constant 0 : i32
    return %arg0, %c0_i32, %c0_i32_0 : i32, i32, i32
  }
}

module attributes {stable_mosaic.version = 11 : i64} {
  func.func @_conv_gemm_kernel(%arg0: i32, %arg1: memref<1x512x81xf32, #tpu.memory_space<vmem>>, %arg2: memref<64x512xf32, #tpu.memory_space<vmem>>, %arg3: memref<64x1xf32, #tpu.memory_space<vmem>>, %arg4: memref<1x64x81xf32, #tpu.memory_space<vmem>>) attributes {dimension_semantics = [#tpu.dimension_semantics<parallel>], iteration_bounds = array<i64: 2>, scalar_prefetch = 0 : i64, scratch_operands = 0 : i64, tpu.core_type = #tpu.core_type<tc>, window_params = [{transform_indices = @transform_0, window_bounds = array<i64: 1, 512, 81>}, {pipeline_mode = #tpu.pipeline_mode<synchronous>, transform_indices = @transform_1, window_bounds = array<i64: 64, 512>}, {pipeline_mode = #tpu.pipeline_mode<synchronous>, transform_indices = @transform_2, window_bounds = array<i64: 64, 1>}, {transform_indices = @transform_3, window_bounds = array<i64: 1, 64, 81>}]} {
    %c0 = arith.constant 0 : index
    %c0_0 = arith.constant 0 : index
    %0 = vector.load %arg2[%c0, %c0_0] : memref<64x512xf32, #tpu.memory_space<vmem>>, vector<64x512xf32>
    %c0_1 = arith.constant 0 : index
    %c0_2 = arith.constant 0 : index
    %1 = vector.load %arg3[%c0_1, %c0_2] : memref<64x1xf32, #tpu.memory_space<vmem>>, vector<64x1xf32>
    %c0_3 = arith.constant 0 : index
    %c0_4 = arith.constant 0 : index
    %c0_5 = arith.constant 0 : index
    %2 = vector.load %arg1[%c0_3, %c0_4, %c0_5] : memref<1x512x81xf32, #tpu.memory_space<vmem>>, vector<1x512x81xf32>
    %3 = vector.shape_cast %2 : vector<1x512x81xf32> to vector<512x81xf32>
    %cst = arith.constant dense<0.000000e+00> : vector<64x81xf32>
    %4 = tpu.matmul %0, %3, %cst {dimension_numbers = #tpu.dot_dimension_numbers<[1], [0], [0], [1], [0, 0, 1, 1], [], []>} : vector<64x512xf32>, vector<512x81xf32>, vector<64x81xf32> -> vector<64x81xf32>
    %5 = vector.broadcast %1 : vector<64x1xf32> to vector<64x81xf32>
    %6 = arith.addf %4, %5 : vector<64x81xf32>
    %cst_6 = arith.constant 0.000000e+00 : f32
    %7 = vector.broadcast %cst_6 : f32 to vector<64x81xf32>
    %8 = arith.maximumf %6, %7 : vector<64x81xf32>
    %c0_7 = arith.constant 0 : index
    %c0_8 = arith.constant 0 : index
    %c0_9 = arith.constant 0 : index
    %9 = vector.load %arg4[%c0_7, %c0_8, %c0_9] : memref<1x64x81xf32, #tpu.memory_space<vmem>>, vector<1x64x81xf32>
    %10 = vector.shape_cast %9 : vector<1x64x81xf32> to vector<64x81xf32>
    %11 = vector.shape_cast %8 : vector<64x81xf32> to vector<1x64x81xf32>
    tpu.vector_store %arg4[%c0_7, %c0_8, %c0_9], %11 {strides = array<i32>} : memref<1x64x81xf32, #tpu.memory_space<vmem>>, vector<1x64x81xf32>,
    return
  }
  func.func @transform_0(%arg0: i32) -> (i32, i32, i32) {
    %c0_i32 = arith.constant 0 : i32
    %c0_i32_0 = arith.constant 0 : i32
    %c0_i32_1 = arith.constant 0 : i32
    return %arg0, %c0_i32, %c0_i32_0 : i32, i32, i32
  }
  func.func @transform_1(%arg0: i32) -> (i32, i32) {
    %c0_i32 = arith.constant 0 : i32
    %c0_i32_0 = arith.constant 0 : i32
    %c0_i32_1 = arith.constant 0 : i32
    return %c0_i32, %c0_i32_0 : i32, i32
  }
  func.func @transform_2(%arg0: i32) -> (i32, i32) {
    %c0_i32 = arith.constant 0 : i32
    %c0_i32_0 = arith.constant 0 : i32
    %c0_i32_1 = arith.constant 0 : i32
    return %c0_i32, %c0_i32_0 : i32, i32
  }
  func.func @transform_3(%arg0: i32) -> (i32, i32, i32) {
    %c0_i32 = arith.constant 0 : i32
    %c0_i32_0 = arith.constant 0 : i32
    %c0_i32_1 = arith.constant 0 : i32
    return %arg0, %c0_i32, %c0_i32_0 : i32, i32, i32
  }
}

module attributes {stable_mosaic.version = 11 : i64} {
  func.func @_conv_gemm_kernel(%arg0: i32, %arg1: memref<1x576x49xf32, #tpu.memory_space<vmem>>, %arg2: memref<32x576xf32, #tpu.memory_space<vmem>>, %arg3: memref<32x1xf32, #tpu.memory_space<vmem>>, %arg4: memref<1x32x49xf32, #tpu.memory_space<vmem>>) attributes {dimension_semantics = [#tpu.dimension_semantics<parallel>], iteration_bounds = array<i64: 2>, scalar_prefetch = 0 : i64, scratch_operands = 0 : i64, tpu.core_type = #tpu.core_type<tc>, window_params = [{transform_indices = @transform_0, window_bounds = array<i64: 1, 576, 49>}, {pipeline_mode = #tpu.pipeline_mode<synchronous>, transform_indices = @transform_1, window_bounds = array<i64: 32, 576>}, {pipeline_mode = #tpu.pipeline_mode<synchronous>, transform_indices = @transform_2, window_bounds = array<i64: 32, 1>}, {transform_indices = @transform_3, window_bounds = array<i64: 1, 32, 49>}]} {
    %c0 = arith.constant 0 : index
    %c0_0 = arith.constant 0 : index
    %0 = vector.load %arg2[%c0, %c0_0] : memref<32x576xf32, #tpu.memory_space<vmem>>, vector<32x576xf32>
    %c0_1 = arith.constant 0 : index
    %c0_2 = arith.constant 0 : index
    %1 = vector.load %arg3[%c0_1, %c0_2] : memref<32x1xf32, #tpu.memory_space<vmem>>, vector<32x1xf32>
    %c0_3 = arith.constant 0 : index
    %c0_4 = arith.constant 0 : index
    %c0_5 = arith.constant 0 : index
    %2 = vector.load %arg1[%c0_3, %c0_4, %c0_5] : memref<1x576x49xf32, #tpu.memory_space<vmem>>, vector<1x576x49xf32>
    %3 = vector.shape_cast %2 : vector<1x576x49xf32> to vector<576x49xf32>
    %cst = arith.constant dense<0.000000e+00> : vector<32x49xf32>
    %4 = tpu.matmul %0, %3, %cst {dimension_numbers = #tpu.dot_dimension_numbers<[1], [0], [0], [1], [0, 0, 1, 1], [], []>} : vector<32x576xf32>, vector<576x49xf32>, vector<32x49xf32> -> vector<32x49xf32>
    %5 = vector.broadcast %1 : vector<32x1xf32> to vector<32x49xf32>
    %6 = arith.addf %4, %5 : vector<32x49xf32>
    %cst_6 = arith.constant 0.000000e+00 : f32
    %7 = vector.broadcast %cst_6 : f32 to vector<32x49xf32>
    %8 = arith.maximumf %6, %7 : vector<32x49xf32>
    %c0_7 = arith.constant 0 : index
    %c0_8 = arith.constant 0 : index
    %c0_9 = arith.constant 0 : index
    %9 = vector.load %arg4[%c0_7, %c0_8, %c0_9] : memref<1x32x49xf32, #tpu.memory_space<vmem>>, vector<1x32x49xf32>
    %10 = vector.shape_cast %9 : vector<1x32x49xf32> to vector<32x49xf32>
    %11 = vector.shape_cast %8 : vector<32x49xf32> to vector<1x32x49xf32>
    tpu.vector_store %arg4[%c0_7, %c0_8, %c0_9], %11 {strides = array<i32>} : memref<1x32x49xf32, #tpu.memory_space<vmem>>, vector<1x32x49xf32>,
    return
  }
  func.func @transform_0(%arg0: i32) -> (i32, i32, i32) {
    %c0_i32 = arith.constant 0 : i32
    %c0_i32_0 = arith.constant 0 : i32
    %c0_i32_1 = arith.constant 0 : i32
    return %arg0, %c0_i32, %c0_i32_0 : i32, i32, i32
  }
  func.func @transform_1(%arg0: i32) -> (i32, i32) {
    %c0_i32 = arith.constant 0 : i32
    %c0_i32_0 = arith.constant 0 : i32
    %c0_i32_1 = arith.constant 0 : i32
    return %c0_i32, %c0_i32_0 : i32, i32
  }
  func.func @transform_2(%arg0: i32) -> (i32, i32) {
    %c0_i32 = arith.constant 0 : i32
    %c0_i32_0 = arith.constant 0 : i32
    %c0_i32_1 = arith.constant 0 : i32
    return %c0_i32, %c0_i32_0 : i32, i32
  }
  func.func @transform_3(%arg0: i32) -> (i32, i32, i32) {
    %c0_i32 = arith.constant 0 : i32
    %c0_i32_0 = arith.constant 0 : i32
    %c0_i32_1 = arith.constant 0 : i32
    return %arg0, %c0_i32, %c0_i32_0 : i32, i32, i32
  }
}

module attributes {stable_mosaic.version = 11 : i64} {
  func.func @_head_kernel(%arg0: i32, %arg1: memref<2x1568xf32, #tpu.memory_space<vmem>>, %arg2: memref<1568x512xf32, #tpu.memory_space<vmem>>, %arg3: memref<1x512xf32, #tpu.memory_space<vmem>>, %arg4: memref<1x512xf32, #tpu.memory_space<vmem>>, %arg5: memref<1x1xf32, #tpu.memory_space<smem>>, %arg6: memref<2x512xf32, #tpu.memory_space<vmem>>, %arg7: memref<2x1xf32, #tpu.memory_space<vmem>>) attributes {dimension_semantics = [#tpu.dimension_semantics<parallel>], iteration_bounds = array<i64: 1>, scalar_prefetch = 0 : i64, scratch_operands = 0 : i64, tpu.core_type = #tpu.core_type<tc>, window_params = [{transform_indices = @transform_0, window_bounds = array<i64: 2, 1568>}, {pipeline_mode = #tpu.pipeline_mode<synchronous>, transform_indices = @transform_1, window_bounds = array<i64: 1568, 512>}, {pipeline_mode = #tpu.pipeline_mode<synchronous>, transform_indices = @transform_2, window_bounds = array<i64: 1, 512>}, {pipeline_mode = #tpu.pipeline_mode<synchronous>, transform_indices = @transform_3, window_bounds = array<i64: 1, 512>}, {transform_indices = @transform_4, window_bounds = array<i64: 1, 1>}, {transform_indices = @transform_5, window_bounds = array<i64: 2, 512>}, {transform_indices = @transform_6, window_bounds = array<i64: 2, 1>}]} {
    %c0 = arith.constant 0 : index
    %c0_0 = arith.constant 0 : index
    %0 = vector.load %arg1[%c0, %c0_0] : memref<2x1568xf32, #tpu.memory_space<vmem>>, vector<2x1568xf32>
    %c0_1 = arith.constant 0 : index
    %c0_2 = arith.constant 0 : index
    %1 = vector.load %arg2[%c0_1, %c0_2] : memref<1568x512xf32, #tpu.memory_space<vmem>>, vector<1568x512xf32>
    %cst = arith.constant dense<0.000000e+00> : vector<2x512xf32>
    %2 = tpu.matmul %0, %1, %cst {dimension_numbers = #tpu.dot_dimension_numbers<[1], [0], [0], [1], [0, 0, 1, 1], [], []>} : vector<2x1568xf32>, vector<1568x512xf32>, vector<2x512xf32> -> vector<2x512xf32>
    %c0_3 = arith.constant 0 : index
    %c0_4 = arith.constant 0 : index
    %3 = vector.load %arg3[%c0_3, %c0_4] : memref<1x512xf32, #tpu.memory_space<vmem>>, vector<1x512xf32>
    %4 = vector.broadcast %3 : vector<1x512xf32> to vector<2x512xf32>
    %5 = arith.addf %2, %4 : vector<2x512xf32>
    %cst_5 = arith.constant 0.000000e+00 : f32
    %6 = vector.broadcast %cst_5 : f32 to vector<2x512xf32>
    %7 = arith.maximumf %5, %6 : vector<2x512xf32>
    %c0_6 = arith.constant 0 : index
    %c0_7 = arith.constant 0 : index
    %8 = vector.load %arg6[%c0_6, %c0_7] : memref<2x512xf32, #tpu.memory_space<vmem>>, vector<2x512xf32>
    tpu.vector_store %arg6[%c0_6, %c0_7], %7 {strides = array<i32>} : memref<2x512xf32, #tpu.memory_space<vmem>>, vector<2x512xf32>,
    %c0_8 = arith.constant 0 : index
    %c0_9 = arith.constant 0 : index
    %9 = vector.load %arg4[%c0_8, %c0_9] : memref<1x512xf32, #tpu.memory_space<vmem>>, vector<1x512xf32>
    %10 = vector.broadcast %9 : vector<1x512xf32> to vector<2x512xf32>
    %11 = arith.mulf %7, %10 : vector<2x512xf32>
    %cst_10 = arith.constant dense<0.000000e+00> : vector<2xf32>
    %12 = vector.multi_reduction <add>, %11, %cst_10 [1] : vector<2x512xf32> to vector<2xf32>
    %13 = vector.shape_cast %12 : vector<2xf32> to vector<2x1xf32>
    %c0_11 = arith.constant 0 : index
    %c0_12 = arith.constant 0 : index
    %14 = memref.load %arg5[%c0_11, %c0_12] : memref<1x1xf32, #tpu.memory_space<smem>>
    %15 = vector.broadcast %14 : f32 to vector<2x1xf32>
    %16 = arith.addf %13, %15 : vector<2x1xf32>
    %c0_13 = arith.constant 0 : index
    %c0_14 = arith.constant 0 : index
    %17 = vector.load %arg7[%c0_13, %c0_14] : memref<2x1xf32, #tpu.memory_space<vmem>>, vector<2x1xf32>
    tpu.vector_store %arg7[%c0_13, %c0_14], %16 {strides = array<i32>} : memref<2x1xf32, #tpu.memory_space<vmem>>, vector<2x1xf32>,
    return
  }
  func.func @transform_0(%arg0: i32) -> (i32, i32) {
    %c0_i32 = arith.constant 0 : i32
    %c0_i32_0 = arith.constant 0 : i32
    return %arg0, %c0_i32 : i32, i32
  }
  func.func @transform_1(%arg0: i32) -> (i32, i32) {
    %c0_i32 = arith.constant 0 : i32
    %c0_i32_0 = arith.constant 0 : i32
    %c0_i32_1 = arith.constant 0 : i32
    return %c0_i32, %c0_i32_0 : i32, i32
  }
  func.func @transform_2(%arg0: i32) -> (i32, i32) {
    %c0_i32 = arith.constant 0 : i32
    %c0_i32_0 = arith.constant 0 : i32
    %c0_i32_1 = arith.constant 0 : i32
    return %c0_i32, %c0_i32_0 : i32, i32
  }
  func.func @transform_3(%arg0: i32) -> (i32, i32) {
    %c0_i32 = arith.constant 0 : i32
    %c0_i32_0 = arith.constant 0 : i32
    %c0_i32_1 = arith.constant 0 : i32
    return %c0_i32, %c0_i32_0 : i32, i32
  }
  func.func @transform_4(%arg0: i32) -> (i32, i32) {
    %c0_i32 = arith.constant 0 : i32
    %c0_i32_0 = arith.constant 0 : i32
    %c0_i32_1 = arith.constant 0 : i32
    return %c0_i32, %c0_i32_0 : i32, i32
  }
  func.func @transform_5(%arg0: i32) -> (i32, i32) {
    %c0_i32 = arith.constant 0 : i32
    %c0_i32_0 = arith.constant 0 : i32
    return %arg0, %c0_i32 : i32, i32
  }
  func.func @transform_6(%arg0: i32) -> (i32, i32) {
    %c0_i32 = arith.constant 0 : i32
    %c0_i32_0 = arith.constant 0 : i32
    return %arg0, %c0_i32 : i32, i32
  }
}

</mosaic_0001>

<bundles_post_ra>
// kernel: cnn_base_forward.4
= control target key start
LH: loop header
LB: loop body
LE: loop exit
PB: predicated region body
PF: predicated region fallthrough
CT: control target
= control target key end

     0   :  { %s704_s12 = smov 0   ;;  %s957_s0 = inlined_call_operand.vmem [shape: f32[2,256,400], index: 0, kind: input, shape index: {}]   ;;  %s958_s1 = inlined_call_operand.vmem [shape: f32[32,256], index: 1, kind: input, shape index: {}]   ;;  %s959_s2 = inlined_call_operand.vmem [shape: f32[32,1], index: 2, kind: input, shape index: {}]   ;;  %s960_s3 = inlined_call_operand.vmem [shape: f32[2,32,400], index: 3, kind: output, shape index: {}]  }
   0x1 LB: > { %s651_s13 = sadd.s32 4294967295, %s681_s12   ;;  %p655_p0 = scmp.ge.s32.totalorder %s681_s12, 1  ;;  %s681_s12 = sphi %s704_s12, %s13_s12  }
   0x2   : > { %p137_p1 = scmp.lt.s32.totalorder %s681_s12, 3 }
   0x4   : > { %p138_p2 = pnand %p655_p0, %p137_p1 }
   0x5   : > { %p161_p3 = scmp.lt.s32.totalorder (!%p138_p2), %s651_s13, 1 }
   0x6   : > { %141 = sbr.rel (%p138_p2) target bundleno = 252 (0xfc), region = 32 }
   0xb   : > { %s962_s13 = smov (!%p161_p3, %s651_s13), 1  ;;  %v785_v62 = vld [vmem:[%s958_s1] sm:$0xff]  ;;  %vm582_vm0 = vcmask 130048  }
   0xc   : > { %s662_s14 = sshll.u32 %s962_s13, 10 }
   0xd   : > { %s718_s17 = scalar_lea.vmem %s957_s0, %s662_s14 }
   0xe   : > { %v243_v0 = vld [vmem:[%s718_s17 + $0x1e0] sm:$0xff]  ;;  %v244_v1 = vld [vmem:[%s718_s17 + $0x1e8] sm:$0xff]  ;;  %v246_v63 = vld [vmem:[%s718_s17 + $0x1f8] sm:$0xff] }
   0xf   : > { %v239_v2 = vld [vmem:[%s718_s17 + $0x1c0] sm:$0xff]  ;;  %331 = vmatpush.msra.mxu0 %v243_v0  ;;  %389 = vmatpush.msra.mxu2 %v244_v1  ;;  %v240_v4 = vld [vmem:[%s718_s17 + $0x1c8] sm:$0xff] }
  0x10   : > { %v307_v3 = vld [vmem:[%s718_s17 + $0x3e0] sm:$0xff]  ;;  %v308_v5 = vld [vmem:[%s718_s17 + $0x3e8] sm:$0xff] }
  0x11   : > { %360 = vmatpush.msra.mxu1 %v307_v3  ;;  %418 = vmatpush.msra.mxu3 %v308_v5  ;;  %v235_v6 = vld [vmem:[%s718_s17 + $0x1a0] sm:$0xff]  ;;  %v236_v8 = vld [vmem:[%s718_s17 + $0x1a8] sm:$0xff]  ;;  %v310_v5 = vld [vmem:[%s718_s17 + $0x3f8] sm:$0xff] }
  0x12   : > { %v303_v7 = vld [vmem:[%s718_s17 + $0x3c0] sm:$0xff]  ;;  %332 = vmatpush.msra.mxu0 %v239_v2  ;;  %390 = vmatpush.msra.mxu2 %v240_v4  ;;  %v304_v9 = vld [vmem:[%s718_s17 + $0x3c8] sm:$0xff]  ;;  %v245_v2 = vld [vmem:[%s718_s17 + $0x1f0] sm:$0xff] }
  0x13   : > { %v299_v10 = vld [vmem:[%s718_s17 + $0x3a0] sm:$0xff]  ;;  %361 = vmatpush.msra.mxu1 %v303_v7  ;;  %419 = vmatpush.msra.mxu3 %v304_v9  ;;  %v232_v12 = vld [vmem:[%s718_s17 + $0x188] sm:$0xff]  ;;  %v242_v4 = vld [vmem:[%s718_s17 + $0x1d8] sm:$0xff] }
  0x14   : > { %v231_v11 = vld [vmem:[%s718_s17 + $0x180] sm:$0xff]  ;;  %v300_v13 = vld [vmem:[%s718_s17 + $0x3a8] sm:$0xff]  ;;  %333 = vmatpush.msra.mxu0 %v235_v6  ;;  %391 = vmatpush.msra.mxu2 %v236_v8  ;;  %v241_v6 = vld [vmem:[%s718_s17 + $0x1d0] sm:$0xff] }
  0x15   : > { %v295_v14 = vld [vmem:[%s718_s17 + $0x380] sm:$0xff]  ;;  %v296_v15 = vld [vmem:[%s718_s17 + $0x388] sm:$0xff]  ;;  %362 = vmatpush.msra.mxu1 %v299_v10  ;;  %420 = vmatpush.msra.mxu3 %v300_v13  ;;  %v309_v7 = vld [vmem:[%s718_s17 + $0x3f0] sm:$0xff] }
  0x16   : > { %v227_v16 = vld [vmem:[%s718_s17 + $0x160] sm:$0xff]  ;;  %v228_v17 = vld [vmem:[%s718_s17 + $0x168] sm:$0xff]  ;;  %334 = vmatpush.msra.mxu0 %v231_v11  ;;  %392 = vmatpush.msra.mxu2 %v232_v12  ;;  %v238_v8 = vld [vmem:[%s718_s17 + $0x1b8] sm:$0xff] }
  0x17   : > { %v291_v18 = vld [vmem:[%s718_s17 + $0x360] sm:$0xff]  ;;  %v292_v19 = vld [vmem:[%s718_s17 + $0x368] sm:$0xff]  ;;  %363 = vmatpush.msra.mxu1 %v295_v14  ;;  %421 = vmatpush.msra.mxu3 %v296_v15  ;;  %v306_v9 = vld [vmem:[%s718_s17 + $0x3d8] sm:$0xff] }
  0x18   : > { %v223_v20 = vld [vmem:[%s718_s17 + $0x140] sm:$0xff]  ;;  %v224_v21 = vld [vmem:[%s718_s17 + $0x148] sm:$0xff]  ;;  %335 = vmatpush.msra.mxu0 %v227_v16  ;;  %393 = vmatpush.msra.mxu2 %v228_v17  ;;  %v237_v10 = vld [vmem:[%s718_s17 + $0x1b0] sm:$0xff] }
  0x19   : > { %v287_v22 = vld [vmem:[%s718_s17 + $0x340] sm:$0xff]  ;;  %v288_v23 = vld [vmem:[%s718_s17 + $0x348] sm:$0xff]  ;;  %364 = vmatpush.msra.mxu1 %v291_v18  ;;  %422 = vmatpush.msra.mxu3 %v292_v19  ;;  %v305_v11 = vld [vmem:[%s718_s17 + $0x3d0] sm:$0xff] }
  0x1a   : > { %v219_v24 = vld [vmem:[%s718_s17 + $0x120] sm:$0xff]  ;;  %v220_v25 = vld [vmem:[%s718_s17 + $0x128] sm:$0xff]  ;;  %336 = vmatpush.msra.mxu0 %v223_v20  ;;  %394 = vmatpush.msra.mxu2 %v224_v21  ;;  %v234_v12 = vld [vmem:[%s718_s17 + $0x198] sm:$0xff] }
  0x1b   : > { %v283_v26 = vld [vmem:[%s718_s17 + $0x320] sm:$0xff]  ;;  %v284_v27 = vld [vmem:[%s718_s17 + $0x328] sm:$0xff]  ;;  %365 = vmatpush.msra.mxu1 %v287_v22  ;;  %423 = vmatpush.msra.mxu3 %v288_v23  ;;  %v302_v13 = vld [vmem:[%s718_s17 + $0x3b8] sm:$0xff] }
  0x1c   : > { %v215_v28 = vld [vmem:[%s718_s17 + $0x100] sm:$0xff]  ;;  %v216_v29 = vld [vmem:[%s718_s17 + $0x108] sm:$0xff]  ;;  %337 = vmatpush.msra.mxu0 %v219_v24  ;;  %395 = vmatpush.msra.mxu2 %v220_v25  ;;  %v233_v14 = vld [vmem:[%s718_s17 + $0x190] sm:$0xff] }
  0x1d   : > { %v279_v30 = vld [vmem:[%s718_s17 + $0x300] sm:$0xff]  ;;  %v280_v31 = vld [vmem:[%s718_s17 + $0x308] sm:$0xff]  ;;  %366 = vmatpush.msra.mxu1 %v283_v26  ;;  %424 = vmatpush.msra.mxu3 %v284_v27  ;;  %v301_v15 = vld [vmem:[%s718_s17 + $0x3b0] sm:$0xff] }
  0x1e   : > { %v211_v32 = vld [vmem:[%s718_s17 + $0xe0] sm:$0xff]  ;;  %v212_v33 = vld [vmem:[%s718_s17 + $0xe8] sm:$0xff]  ;;  %338 = vmatpush.msra.mxu0 %v215_v28  ;;  %396 = vmatpush.msra.mxu2 %v216_v29  ;;  %v815_v16 = vld [vmem:[%s958_s1 + $0x10] sm:$0xff] }
  0x1f   : > { %v275_v34 = vld [vmem:[%s718_s17 + $0x2e0] sm:$0xff]  ;;  %v276_v35 = vld [vmem:[%s718_s17 + $0x2e8] sm:$0xff]  ;;  %367 = vmatpush.msra.mxu1 %v279_v30  ;;  %425 = vmatpush.msra.mxu3 %v280_v31  ;;  %v230_v17 = vld [vmem:[%s718_s17 + $0x178] sm:$0xff] }
  0x20   : > { %v207_v36 = vld [vmem:[%s718_s17 + $0xc0] sm:$0xff]  ;;  %v208_v37 = vld [vmem:[%s718_s17 + $0xc8] sm:$0xff]  ;;  %339 = vmatpush.msra.mxu0 %v211_v32  ;;  %397 = vmatpush.msra.mxu2 %v212_v33  ;;  %v298_v18 = vld [vmem:[%s718_s17 + $0x398] sm:$0xff] }
  0x21   : > { %v271_v38 = vld [vmem:[%s718_s17 + $0x2c0] sm:$0xff]  ;;  %v272_v39 = vld [vmem:[%s718_s17 + $0x2c8] sm:$0xff]  ;;  %368 = vmatpush.msra.mxu1 %v275_v34  ;;  %426 = vmatpush.msra.mxu3 %v276_v35  ;;  %v229_v19 = vld [vmem:[%s718_s17 + $0x170] sm:$0xff] }
  0x22   : > { %v203_v40 = vld [vmem:[%s718_s17 + $0xa0] sm:$0xff]  ;;  %v204_v41 = vld [vmem:[%s718_s17 + $0xa8] sm:$0xff]  ;;  %340 = vmatpush.msra.mxu0 %v207_v36  ;;  %398 = vmatpush.msra.mxu2 %v208_v37  ;;  %v297_v20 = vld [vmem:[%s718_s17 + $0x390] sm:$0xff] }
  0x23   : > { %v267_v42 = vld [vmem:[%s718_s17 + $0x2a0] sm:$0xff]  ;;  %v268_v43 = vld [vmem:[%s718_s17 + $0x2a8] sm:$0xff]  ;;  %369 = vmatpush.msra.mxu1 %v271_v38  ;;  %427 = vmatpush.msra.mxu3 %v272_v39  ;;  %v826_v21 = vld [vmem:[%s958_s1 + $0x18] sm:$0xff]  ;;  %v683_v38 = vmov 0  }
  0x24   : > { %v199_v44 = vld [vmem:[%s718_s17 + $0x80] sm:$0xff]  ;;  %v200_v45 = vld [vmem:[%s718_s17 + $0x88] sm:$0xff]  ;;  %341 = vmatpush.msra.mxu0 %v203_v40  ;;  %399 = vmatpush.msra.mxu2 %v204_v41  ;;  %v226_v22 = vld [vmem:[%s718_s17 + $0x158] sm:$0xff] }
  0x25   : > { %v263_v46 = vld [vmem:[%s718_s17 + $0x280] sm:$0xff]  ;;  %v264_v47 = vld [vmem:[%s718_s17 + $0x288] sm:$0xff]  ;;  %370 = vmatpush.msra.mxu1 %v267_v42  ;;  %428 = vmatpush.msra.mxu3 %v268_v43  ;;  %v294_v23 = vld [vmem:[%s718_s17 + $0x378] sm:$0xff] }
  0x26   : > { %v195_v48 = vld [vmem:[%s718_s17 + $0x60] sm:$0xff]  ;;  %v196_v49 = vld [vmem:[%s718_s17 + $0x68] sm:$0xff]  ;;  %342 = vmatpush.msra.mxu0 %v199_v44  ;;  %400 = vmatpush.msra.mxu2 %v200_v45  ;;  %v225_v24 = vld [vmem:[%s718_s17 + $0x150] sm:$0xff] }
  0x27   : > { %v259_v50 = vld [vmem:[%s718_s17 + $0x260] sm:$0xff]  ;;  %v260_v51 = vld [vmem:[%s718_s17 + $0x268] sm:$0xff]  ;;  %371 = vmatpush.msra.mxu1 %v263_v46  ;;  %429 = vmatpush.msra.mxu3 %v264_v47  ;;  %v293_v25 = vld [vmem:[%s718_s17 + $0x370] sm:$0xff] }
  0x28   : > { %v191_v52 = vld [vmem:[%s718_s17 + $0x40] sm:$0xff]  ;;  %v192_v53 = vld [vmem:[%s718_s17 + $0x48] sm:$0xff]  ;;  %343 = vmatpush.msra.mxu0 %v195_v48  ;;  %401 = vmatpush.msra.mxu2 %v196_v49  ;;  %v222_v26 = vld [vmem:[%s718_s17 + $0x138] sm:$0xff] }
  0x29   : > { %v255_v54 = vld [vmem:[%s718_s17 + $0x240] sm:$0xff]  ;;  %v256_v55 = vld [vmem:[%s718_s17 + $0x248] sm:$0xff]  ;;  %372 = vmatpush.msra.mxu1 %v259_v50  ;;  %430 = vmatpush.msra.mxu3 %v260_v51  ;;  %v290_v27 = vld [vmem:[%s718_s17 + $0x358] sm:$0xff] }
  0x2a   : > { %v187_v56 = vld [vmem:[%s718_s17 + $0x20] sm:$0xff]  ;;  %v188_v57 = vld [vmem:[%s718_s17 + $0x28] sm:$0xff]  ;;  %344 = vmatpush.msra.mxu0 %v191_v52  ;;  %402 = vmatpush.msra.mxu2 %v192_v53  ;;  %v221_v28 = vld [vmem:[%s718_s17 + $0x130] sm:$0xff] }
  0x2b   : > { %v251_v58 = vld [vmem:[%s718_s17 + $0x220] sm:$0xff]  ;;  %v252_v59 = vld [vmem:[%s718_s17 + $0x228] sm:$0xff]  ;;  %373 = vmatpush.msra.mxu1 %v255_v54  ;;  %431 = vmatpush.msra.mxu3 %v256_v55  ;;  %v289_v29 = vld [vmem:[%s718_s17 + $0x350] sm:$0xff] }
  0x2c   : > { %v183_v60 = vld [vmem:[%s718_s17] sm:$0xff]  ;;  %v184_v61 = vld [vmem:[%s718_s17 + $0x8] sm:$0xff]  ;;  %345 = vmatpush.msra.mxu0 %v187_v56  ;;  %403 = vmatpush.msra.mxu2 %v188_v57  ;;  %v218_v30 = vld [vmem:[%s718_s17 + $0x118] sm:$0xff] }
  0x2d   : > { %374 = vmatpush.msra.mxu1 %v251_v58  ;;  %432 = vmatpush.msra.mxu3 %v252_v59  ;;  %v247_v0 = vld [vmem:[%s718_s17 + $0x200] sm:$0xff]  ;;  %v248_v1 = vld [vmem:[%s718_s17 + $0x208] sm:$0xff]  ;;  %v286_v31 = vld [vmem:[%s718_s17 + $0x338] sm:$0xff] }
  0x2e   : > { %346 = vmatpush.msra.mxu0 %v183_v60  ;;  %404 = vmatpush.msra.mxu2 %v184_v61  ;;  %v796_v3 = vld [vmem:[%s958_s1 + $0x8] sm:$0xff]  ;;  %v217_v32 = vld [vmem:[%s718_s17 + $0x110] sm:$0xff]  ;;  %v845_v34 = vld [vmem:[%s958_s1 + $0x20] sm:$0xff] }
  0x2f   : > { %347 = vmatmul.f32.vlgmr.msra.gmra.mxu0 %v785_v62  ;;  %405 = vmatmul.f32.vlgmr.msra.gmra.mxu2 %v785_v62  ;;  %v285_v33 = vld [vmem:[%s718_s17 + $0x330] sm:$0xff]  ;;  %v282_v35 = vld [vmem:[%s718_s17 + $0x318] sm:$0xff]  ;;  %v179_v37 = vld [vmem:[%s959_s2] sm:$0xff] }
  0x30   : > { %505 = vmatpush.msrb.mxu2 %v246_v63  ;;  %375 = vmatpush.msra.mxu1 %v247_v0  ;;  %v214_v36 = vld [vmem:[%s718_s17 + $0xf8] sm:$0xff]  ;;  %v213_v39 = vld [vmem:[%s718_s17 + $0xf0] sm:$0xff]  ;;  %v860_v41 = vld [vmem:[%s958_s1 + $0x28] sm:$0xff] }
  0x31   : > { %433 = vmatpush.msra.mxu3 %v248_v1  ;;  %447 = vmatpush.msrb.mxu0 %v245_v2  ;;  %v281_v40 = vld [vmem:[%s718_s17 + $0x310] sm:$0xff]  ;;  %v210_v42 = vld [vmem:[%s718_s17 + $0xd8] sm:$0xff]  ;;  %v180_v57 = vld [vmem:[%s959_s2 + $0x8] sm:$0xff] }
  0x32   : > { %376 = vmatmul.f32.vlgmr.msra.gmra.mxu1 %v796_v3  ;;  %434 = vmatmul.f32.vlgmr.msra.gmra.mxu3 %v796_v3  ;;  %v278_v43 = vld [vmem:[%s718_s17 + $0x2f8] sm:$0xff]  ;;  %v209_v44 = vld [vmem:[%s718_s17 + $0xd0] sm:$0xff] }
  0x33   : > { %506 = vmatpush.msrb.mxu2 %v242_v4  ;;  %534 = vmatpush.msrb.mxu3 %v310_v5  ;;  %v277_v45 = vld [vmem:[%s718_s17 + $0x2f0] sm:$0xff]  ;;  %v206_v46 = vld [vmem:[%s718_s17 + $0xb8] sm:$0xff] }
  0x34   : > { %448 = vmatpush.msrb.mxu0 %v241_v6  ;;  %476 = vmatpush.msrb.mxu1 %v309_v7  ;;  %v274_v47 = vld [vmem:[%s718_s17 + $0x2d8] sm:$0xff]  ;;  %v205_v48 = vld [vmem:[%s718_s17 + $0xb0] sm:$0xff] }
  0x35   : > { %507 = vmatpush.msrb.mxu2 %v238_v8  ;;  %535 = vmatpush.msrb.mxu3 %v306_v9  ;;  %v273_v49 = vld [vmem:[%s718_s17 + $0x2d0] sm:$0xff]  ;;  %v202_v50 = vld [vmem:[%s718_s17 + $0x98] sm:$0xff] }
  0x36   : > { %449 = vmatpush.msrb.mxu0 %v237_v10  ;;  %477 = vmatpush.msrb.mxu1 %v305_v11  ;;  %v270_v51 = vld [vmem:[%s718_s17 + $0x2b8] sm:$0xff]  ;;  %v201_v52 = vld [vmem:[%s718_s17 + $0x90] sm:$0xff] }
  0x37   : > { %508 = vmatpush.msrb.mxu2 %v234_v12  ;;  %536 = vmatpush.msrb.mxu3 %v302_v13  ;;  %v269_v53 = vld [vmem:[%s718_s17 + $0x2b0] sm:$0xff]  ;;  %v198_v55 = vld [vmem:[%s718_s17 + $0x78] sm:$0xff] }
  0x38   : > { %450 = vmatpush.msrb.mxu0 %v233_v14  ;;  %478 = vmatpush.msrb.mxu1 %v301_v15  ;;  %v879_v54 = vld [vmem:[%s958_s1 + $0x30] sm:$0xff]  ;;  %v266_v56 = vld [vmem:[%s718_s17 + $0x298] sm:$0xff] }
  0x39   : > { %350 = vmatmul.f32.gmra.mxu0 %v815_v16  ;;  %408 = vmatmul.f32.gmra.mxu2 %v815_v16  ;;  %v197_v58 = vld [vmem:[%s718_s17 + $0x70] sm:$0xff]  ;;  %v178_v60 = vld [vmem:[%s958_s1 + $0x38] sm:$0xff] }
  0x3a   : > { %509 = vmatpush.msrb.mxu2 %v230_v17  ;;  %537 = vmatpush.msrb.mxu3 %v298_v18  ;;  %v265_v59 = vld [vmem:[%s718_s17 + $0x290] sm:$0xff]  ;;  %v194_v61 = vld [vmem:[%s718_s17 + $0x58] sm:$0xff] }
  0x3b   : > { %451 = vmatpush.msrb.mxu0 %v229_v19  ;;  %479 = vmatpush.msrb.mxu1 %v297_v20  ;;  %v262_v63 = vld [vmem:[%s718_s17 + $0x278] sm:$0xff]  ;;  %v193_v0 = vld [vmem:[%s718_s17 + $0x50] sm:$0xff] }
  0x3c   : > { %379 = vmatmul.f32.gmra.mxu1 %v826_v21  ;;  %437 = vmatmul.f32.gmra.mxu3 %v826_v21  ;;  %v261_v1 = vld [vmem:[%s718_s17 + $0x270] sm:$0xff]  ;;  %v190_v2 = vld [vmem:[%s718_s17 + $0x38] sm:$0xff] }
  0x3d   : > { %510 = vmatpush.msrb.mxu2 %v226_v22  ;;  %538 = vmatpush.msrb.mxu3 %v294_v23  ;;  %v258_v4 = vld [vmem:[%s718_s17 + $0x258] sm:$0xff]  ;;  %v189_v5 = vld [vmem:[%s718_s17 + $0x30] sm:$0xff] }
  0x3e   : > { %452 = vmatpush.msrb.mxu0 %v225_v24  ;;  %480 = vmatpush.msrb.mxu1 %v293_v25  ;;  %v257_v6 = vld [vmem:[%s718_s17 + $0x250] sm:$0xff]  ;;  %v186_v7 = vld [vmem:[%s718_s17 + $0x18] sm:$0xff] }
  0x3f   : > { %511 = vmatpush.msrb.mxu2 %v222_v26  ;;  %539 = vmatpush.msrb.mxu3 %v290_v27  ;;  %v254_v8 = vld [vmem:[%s718_s17 + $0x238] sm:$0xff]  ;;  %v185_v9 = vld [vmem:[%s718_s17 + $0x10] sm:$0xff] }
  0x40   : > { %453 = vmatpush.msrb.mxu0 %v221_v28  ;;  %481 = vmatpush.msrb.mxu1 %v289_v29  ;;  %v253_v10 = vld [vmem:[%s718_s17 + $0x230] sm:$0xff]  ;;  %v250_v11 = vld [vmem:[%s718_s17 + $0x218] sm:$0xff] }
  0x41   : > { %512 = vmatpush.msrb.mxu2 %v218_v30  ;;  %540 = vmatpush.msrb.mxu3 %v286_v31  ;;  %v181_v12 = vld [vmem:[%s959_s2 + $0x10] sm:$0xff]  ;;  %v182_v14 = vld [vmem:[%s959_s2 + $0x18] sm:$0xff] }
  0x42   : > { %454 = vmatpush.msrb.mxu0 %v217_v32  ;;  %482 = vmatpush.msrb.mxu1 %v285_v33  ;;  %v249_v13 = vld [vmem:[%s718_s17 + $0x210] sm:$0xff]  ;;  %s663_s17 = sshll.u32 %s962_s13, 7 }
  0x43   : > { %673 = vset.pattern.permute.xlu0 %v683_v38  ;;  %353 = vmatmul.f32.gmra.mxu0 %v845_v34  ;;  %s932_s20 = scalar_lea.vmem %s960_s3, %s663_s17 }
  0x44   : > { %411 = vmatmul.f32.gmra.mxu2 %v845_v34  ;;  %541 = vmatpush.msrb.mxu3 %v282_v35 }
  0x45   : > { %513 = vmatpush.msrb.mxu2 %v214_v36  ;;  %313 = vperm.xlu0 %673, %v179_v37  }
  0x46   : > { %455 = vmatpush.msrb.mxu0 %v213_v39  ;;  %483 = vmatpush.msrb.mxu1 %v281_v40 }
  0x47   : > { %382 = vmatmul.f32.gmra.mxu1 %v860_v41  ;;  %440 = vmatmul.f32.gmra.mxu3 %v860_v41 }
  0x48   : > { %514 = vmatpush.msrb.mxu2 %v210_v42  ;;  %542 = vmatpush.msrb.mxu3 %v278_v43 }
  0x49   : > { %456 = vmatpush.msrb.mxu0 %v209_v44  ;;  %484 = vmatpush.msrb.mxu1 %v277_v45 }
  0x4a   : > { %515 = vmatpush.msrb.mxu2 %v206_v46  ;;  %543 = vmatpush.msrb.mxu3 %v274_v47 }
  0x4b   : > { %457 = vmatpush.msrb.mxu0 %v205_v48  ;;  %485 = vmatpush.msrb.mxu1 %v273_v49 }
  0x4c   : > { %516 = vmatpush.msrb.mxu2 %v202_v50  ;;  %544 = vmatpush.msrb.mxu3 %v270_v51 }
  0x4d   : > { %458 = vmatpush.msrb.mxu0 %v201_v52  ;;  %486 = vmatpush.msrb.mxu1 %v269_v53 }
  0x4e   : > { %356 = vmatmul.f32.gmra.mxu0 %v879_v54  ;;  %414 = vmatmul.f32.gmra.mxu2 %v879_v54 }
  0x4f   : > { %517 = vmatpush.msrb.mxu2 %v198_v55  ;;  %545 = vmatpush.msrb.mxu3 %v266_v56 }
  0x50   : > { %318 = vperm.xlu0 %673, %v180_v57   ;;  %459 = vmatpush.msrb.mxu0 %v197_v58 }
  0x51   : > { %487 = vmatpush.msrb.mxu1 %v265_v59  ;;  %443 = vmatmul.f32.gmra.mxu3 %v178_v60 }
  0x52   : > { %385 = vmatmul.f32.gmra.mxu1 %v178_v60  ;;  %518 = vmatpush.msrb.mxu2 %v194_v61 }
  0x53   : > { %546 = vmatpush.msrb.mxu3 %v262_v63  ;;  %460 = vmatpush.msrb.mxu0 %v193_v0 }
  0x54   : > { %488 = vmatpush.msrb.mxu1 %v261_v1  ;;  %519 = vmatpush.msrb.mxu2 %v190_v2 }
  0x55   : > { %547 = vmatpush.msrb.mxu3 %v258_v4  ;;  %461 = vmatpush.msrb.mxu0 %v189_v5 }
  0x56   : > { %489 = vmatpush.msrb.mxu1 %v257_v6  ;;  %520 = vmatpush.msrb.mxu2 %v186_v7 }
  0x57   : > { %548 = vmatpush.msrb.mxu3 %v254_v8  ;;  %462 = vmatpush.msrb.mxu0 %v185_v9 }
  0x58   : > { %490 = vmatpush.msrb.mxu1 %v253_v10  ;;  %674 = vset.pattern.permute.xlu1 %v683_v38 }
  0x59   : > { %463 = vmatmul.f32.vlgmr.msrb.gmra.mxu0 %v785_v62  ;;  %521 = vmatmul.f32.vlgmr.msrb.gmra.mxu2 %v785_v62 }
  0x5a   : > { %549 = vmatpush.msrb.mxu3 %v250_v11  ;;  %323 = vperm.xlu1 %674, %v181_v12  }
  0x5b   : > { %491 = vmatpush.msrb.mxu1 %v249_v13  ;;  %550 = vmatmul.f32.vlgmr.msrb.gmra.mxu3 %v796_v3 }
  0x5c   : > { %492 = vmatmul.f32.vlgmr.msrb.gmra.mxu1 %v796_v3 }
  0x61   : > { %466 = vmatmul.f32.gmra.mxu0 %v815_v16  ;;  %524 = vmatmul.f32.gmra.mxu2 %v815_v16 }
  0x62   : > { %328 = vperm.xlu1 %674, %v182_v14  }
  0x63   : > { %553 = vmatmul.f32.gmra.mxu3 %v826_v21 }
  0x64   : > { %495 = vmatmul.f32.gmra.mxu1 %v826_v21 }
  0x69   : > { %469 = vmatmul.f32.gmra.mxu0 %v845_v34  ;;  %527 = vmatmul.f32.gmra.mxu2 %v845_v34 }
  0x6b   : > { %556 = vmatmul.f32.gmra.mxu3 %v860_v41 }
  0x6c   : > { %498 = vmatmul.f32.gmra.mxu1 %v860_v41 }
  0x71   : > { %472 = vmatmul.f32.gmra.mxu0 %v879_v54  ;;  %530 = vmatmul.f32.gmra.mxu2 %v879_v54 }
  0x73   : > { %559 = vmatmul.f32.gmra.mxu3 %v178_v60 }
  0x74   : > { %501 = vmatmul.f32.gmra.mxu1 %v178_v60 }
  0xac   : > { %v348_v62 = vpop.f32.mrf.mxu0 }
  0xaf   : > { %v377_v3 = vpop.f32.mrf.mxu1 }
  0xb2   : > { %v406_v15 = vpop.f32.mrf.mxu2 }
  0xb5   : > { %v435_v16 = vpop.f32.mrf.mxu3 }
  0xb6   : > { %v351_v20 = vpop.f32.mrf.mxu0 }
  0xb7   : > { %v314_v17 = vpop.permute.xlu0 %313 }
  0xb8   : > { %v349_v18 = vadd.f32 %v348_v62, %v314_v17  ;;  %v407_v19 = vadd.f32 %v406_v15, %v314_v17 }
  0xb9   : > { %v380_v23 = vpop.f32.mrf.mxu1 }
  0xba   : > { %v378_v21 = vadd.f32 %v377_v3, %v349_v18  ;;  %v436_v22 = vadd.f32 %v435_v16, %v407_v19 }
  0xbc   : > { %v563_v24 = vmax.f32 %v378_v21, 0.0  ;;  %v564_v25 = vmax.f32 %v436_v22, 0.0  ;;  %v409_v26 = vpop.f32.mrf.mxu2 }
  0xbe   : > { %579 = vst [vmem:[%s932_s20] sm:$0xff] %v563_v24 }
  0xbf   : > { %580 = vst [vmem:[%s932_s20 + $0x8] sm:$0xff] %v564_v25  ;;  %v438_v27 = vpop.f32.mrf.mxu3 }
  0xc0   : > { %v354_v29 = vpop.f32.mrf.mxu0 }
  0xc2   : > { %v319_v28 = vpop.permute.xlu0 %318 }
  0xc3   : > { %v352_v30 = vadd.f32 %v351_v20, %v319_v28  ;;  %v410_v31 = vadd.f32 %v409_v26, %v319_v28 }
  0xc4   : > { %v383_v34 = vpop.f32.mrf.mxu1 }
  0xc5   : > { %v381_v32 = vadd.f32 %v380_v23, %v352_v30  ;;  %v439_v33 = vadd.f32 %v438_v27, %v410_v31 }
  0xc7   : > { %v567_v35 = vmax.f32 %v381_v32, 0.0  ;;  %v568_v36 = vmax.f32 %v439_v33, 0.0  ;;  %v412_v37 = vpop.f32.mrf.mxu2 }
  0xc9   : > { %584 = vst [vmem:[%s932_s20 + $0x20] sm:$0xff] %v567_v35 }
  0xca   : > { %585 = vst [vmem:[%s932_s20 + $0x28] sm:$0xff] %v568_v36  ;;  %v441_v38 = vpop.f32.mrf.mxu3 }
  0xcb   : > { %v357_v40 = vpop.f32.mrf.mxu0 }
  0xcc   : > { %v324_v39 = vpop.permute.xlu1 %323 }
  0xcd   : > { %v355_v41 = vadd.f32 %v354_v29, %v324_v39  ;;  %v413_v42 = vadd.f32 %v412_v37, %v324_v39 }
  0xcf   : > { %v384_v43 = vadd.f32 %v383_v34, %v355_v41  ;;  %v442_v44 = vadd.f32 %v441_v38, %v413_v42  ;;  %v386_v45 = vpop.f32.mrf.mxu1 }
  0xd1   : > { %v571_v46 = vmax.f32 %v384_v43, 0.0  ;;  %v572_v47 = vmax.f32 %v442_v44, 0.0  ;;  %v415_v48 = vpop.f32.mrf.mxu2 }
  0xd3   : > { %588 = vst [vmem:[%s932_s20 + $0x40] sm:$0xff] %v571_v46 }
  0xd4   : > { %589 = vst [vmem:[%s932_s20 + $0x48] sm:$0xff] %v572_v47  ;;  %v329_v49 = vpop.permute.xlu1 %328  ;;  %v444_v50 = vpop.f32.mrf.mxu3 }
  0xd5   : > { %v358_v51 = vadd.f32 %v357_v40, %v329_v49  ;;  %v416_v52 = vadd.f32 %v415_v48, %v329_v49 }
  0xd6   : > { %v464_v53 = vpop.f32.mrf.mxu0 }
  0xd7   : > { %v387_v54 = vadd.f32 %v386_v45, %v358_v51  ;;  %v445_v55 = vadd.f32 %v444_v50, %v416_v52  ;;  %v465_v56 = vadd.f32 %v464_v53, %v314_v17 }
  0xd9   : > { %v575_v57 = vmax.f32 %v387_v54, 0.0  ;;  %v576_v58 = vmax.f32 %v445_v55, 0.0  ;;  %v493_v59 = vpop.f32.mrf.mxu1 }
  0xda   : > { %v494_v60 = vadd.f32 %v493_v59, %v465_v56 }
  0xdb   : > { %592 = vst [vmem:[%s932_s20 + $0x60] sm:$0xff] %v575_v57 }
  0xdc   : > { %593 = vst [vmem:[%s932_s20 + $0x68] sm:$0xff] %v576_v58  ;;  %v565_v61 = vmax.f32 %v494_v60, 0.0  ;;  %v522_v63 = vpop.f32.mrf.mxu2 }
  0xdd   : > { %v523_v0 = vadd.f32 %v522_v63, %v314_v17 }
  0xde   : > { %581 = vst [vmem:[%s932_s20 + $0x10] sm:$0xff] %v565_v61  ;;  %v467_v1 = vpop.f32.mrf.mxu0  ;;  %v551_v2 = vpop.f32.mrf.mxu3 }
  0xdf   : > { %v468_v4 = vadd.f32 %v467_v1, %v319_v28  ;;  %v552_v5 = vadd.f32 %v551_v2, %v523_v0 }
  0xe1   : > { %v566_v6 = vmax.f32 %v552_v5, 0.0  ;;  %v496_v7 = vpop.f32.mrf.mxu1 }
  0xe2   : > { %v497_v8 = vadd.f32 %v496_v7, %v468_v4 }
  0xe3   : > { %583 = vst.msk [vmem:[%s932_s20 + $0x18] sm:$0xff] %vm582_vm0, %v566_v6 }
  0xe4   : > { %v569_v9 = vmax.f32 %v497_v8, 0.0  ;;  %v525_v10 = vpop.f32.mrf.mxu2 }
  0xe5   : > { %v526_v11 = vadd.f32 %v525_v10, %v319_v28 }
  0xe6   : > { %586 = vst [vmem:[%s932_s20 + $0x30] sm:$0xff] %v569_v9  ;;  %v470_v12 = vpop.f32.mrf.mxu0  ;;  %v554_v13 = vpop.f32.mrf.mxu3 }
  0xe7   : > { %v471_v14 = vadd.f32 %v470_v12, %v324_v39  ;;  %v555_v62 = vadd.f32 %v554_v13, %v526_v11 }
  0xe9   : > { %v570_v3 = vmax.f32 %v555_v62, 0.0  ;;  %v499_v15 = vpop.f32.mrf.mxu1 }
  0xea   : > { %v500_v16 = vadd.f32 %v499_v15, %v471_v14 }
  0xeb   : > { %587 = vst.msk [vmem:[%s932_s20 + $0x38] sm:$0xff] %vm582_vm0, %v570_v3 }
  0xec   : > { %v573_v17 = vmax.f32 %v500_v16, 0.0  ;;  %v528_v18 = vpop.f32.mrf.mxu2 }
  0xed   : > { %v529_v19 = vadd.f32 %v528_v18, %v324_v39 }
  0xee   : > { %590 = vst [vmem:[%s932_s20 + $0x50] sm:$0xff] %v573_v17  ;;  %v473_v20 = vpop.f32.mrf.mxu0  ;;  %v557_v21 = vpop.f32.mrf.mxu3 }
  0xef   : > { %v474_v22 = vadd.f32 %v473_v20, %v329_v49  ;;  %v558_v23 = vadd.f32 %v557_v21, %v529_v19 }
  0xf1   : > { %v574_v24 = vmax.f32 %v558_v23, 0.0  ;;  %v502_v25 = vpop.f32.mrf.mxu1 }
  0xf2   : > { %v503_v26 = vadd.f32 %v502_v25, %v474_v22 }
  0xf3   : > { %591 = vst.msk [vmem:[%s932_s20 + $0x58] sm:$0xff] %vm582_vm0, %v574_v24 }
  0xf4   : > { %v577_v27 = vmax.f32 %v503_v26, 0.0  ;;  %v531_v28 = vpop.f32.mrf.mxu2 }
  0xf5   : > { %v532_v29 = vadd.f32 %v531_v28, %v329_v49 }
  0xf6   : > { %594 = vst [vmem:[%s932_s20 + $0x70] sm:$0xff] %v577_v27  ;;  %v560_v30 = vpop.f32.mrf.mxu3 }
  0xf7   : > { %v561_v31 = vadd.f32 %v560_v30, %v532_v29 }
  0xf9   : > { %v578_v32 = vmax.f32 %v561_v31, 0.0 }
  0xfb   : > { %595 = vst.msk [vmem:[%s932_s20 + $0x78] sm:$0xff] %vm582_vm0, %v578_v32 }
  0xfc PF: > { %s13_s12 = sadd.s32 1, %s681_s12  }
  0xfd   : > { %p10_p4 = scmp.ge.s32.totalorder %s13_s12, 4  }
  0xff   :  { %12 = sbr.rel (!%p10_p4) target bundleno = 1 (0x1), region = 62 }

// kernel: cnn_base_forward.5
= control target key start
LH: loop header
LB: loop body
LE: loop exit
PB: predicated region body
PF: predicated region fallthrough
CT: control target
= control target key end

     0   :  { %s605_s12 = smov 0   ;;  %s830_s0 = inlined_call_operand.vmem [shape: f32[2,512,81], index: 0, kind: input, shape index: {}]   ;;  %s831_s1 = inlined_call_operand.vmem [shape: f32[64,512], index: 1, kind: input, shape index: {}]   ;;  %s832_s2 = inlined_call_operand.vmem [shape: f32[64,1], index: 2, kind: input, shape index: {}]   ;;  %s833_s3 = inlined_call_operand.vmem [shape: f32[2,64,81], index: 3, kind: output, shape index: {}]  }
   0x1 LB: > { %s551_s13 = sadd.s32 4294967295, %s582_s12   ;;  %p555_p0 = scmp.ge.s32.totalorder %s582_s12, 1  ;;  %s582_s12 = sphi %s605_s12, %s13_s12  }
   0x2   : > { %p137_p1 = scmp.lt.s32.totalorder %s582_s12, 3 }
   0x4   : > { %p138_p2 = pnand %p555_p0, %p137_p1 }
   0x5   : > { %p161_p3 = scmp.lt.s32.totalorder (!%p138_p2), %s551_s13, 1 }
   0x6   : > { %141 = sbr.rel (%p138_p2) target bundleno = 242 (0xf2), region = 32 }
   0xb   : > { %s835_s13 = smov (!%p161_p3, %s551_s13), 1  ;;  %v171_v62 = vld [vmem:[%s831_s1] sm:$0xff]  ;;  %v173_v63 = vld [vmem:[%s831_s1 + $0x10] sm:$0xff]  ;;  %vm487_vm0 = vcmask 662528  }
   0xc   : > { %s562_s14 = sshll.u32 %s835_s13, 9  ;;  %s563_s23 = sshll.u32 %s835_s13, 6 }
   0xd   : > { %s619_s17 = scalar_lea.vmem %s830_s0, %s562_s14  ;;  %s809_s26 = scalar_lea.vmem %s833_s3, %s563_s23 }
   0xe   : > { %v226_v0 = vld [vmem:[%s619_s17 + $0x78] sm:$0xff]  ;;  %v225_v2 = vld [vmem:[%s619_s17 + $0x70] sm:$0xff]  ;;  %v224_v6 = vld [vmem:[%s619_s17 + $0x68] sm:$0xff] }
   0xf   : > { %v258_v1 = vld [vmem:[%s619_s17 + $0x178] sm:$0xff]  ;;  %315 = vmatpush.msra.mxu0 %v226_v0  ;;  %v257_v4 = vld [vmem:[%s619_s17 + $0x170] sm:$0xff]  ;;  %v256_v8 = vld [vmem:[%s619_s17 + $0x168] sm:$0xff] }
  0x10   : > { %397 = vmatpush.msra.mxu2 %v258_v1  ;;  %v242_v3 = vld [vmem:[%s619_s17 + $0xf8] sm:$0xff]  ;;  %v241_v7 = vld [vmem:[%s619_s17 + $0xf0] sm:$0xff]  ;;  %v240_v10 = vld [vmem:[%s619_s17 + $0xe8] sm:$0xff] }
  0x11   : > { %v274_v5 = vld [vmem:[%s619_s17 + $0x1f8] sm:$0xff]  ;;  %356 = vmatpush.msra.mxu1 %v242_v3  ;;  %316 = vmatpush.msra.mxu0 %v225_v2  ;;  %v273_v9 = vld [vmem:[%s619_s17 + $0x1f0] sm:$0xff]  ;;  %v223_v11 = vld [vmem:[%s619_s17 + $0x60] sm:$0xff] }
  0x12   : > { %438 = vmatpush.msra.mxu3 %v274_v5  ;;  %398 = vmatpush.msra.mxu2 %v257_v4  ;;  %v255_v12 = vld [vmem:[%s619_s17 + $0x160] sm:$0xff]  ;;  %v272_v13 = vld [vmem:[%s619_s17 + $0x1e8] sm:$0xff]  ;;  %v222_v16 = vld [vmem:[%s619_s17 + $0x58] sm:$0xff] }
  0x13   : > { %357 = vmatpush.msra.mxu1 %v241_v7  ;;  %317 = vmatpush.msra.mxu0 %v224_v6  ;;  %v239_v14 = vld [vmem:[%s619_s17 + $0xe0] sm:$0xff]  ;;  %v254_v17 = vld [vmem:[%s619_s17 + $0x158] sm:$0xff]  ;;  %v221_v20 = vld [vmem:[%s619_s17 + $0x50] sm:$0xff]  ;;  %v584_v6 = vmov 0  }
  0x14   : > { %439 = vmatpush.msra.mxu3 %v273_v9  ;;  %399 = vmatpush.msra.mxu2 %v256_v8  ;;  %v271_v15 = vld [vmem:[%s619_s17 + $0x1e0] sm:$0xff]  ;;  %v238_v18 = vld [vmem:[%s619_s17 + $0xd8] sm:$0xff]  ;;  %v253_v21 = vld [vmem:[%s619_s17 + $0x150] sm:$0xff] }
  0x15   : > { %358 = vmatpush.msra.mxu1 %v240_v10  ;;  %318 = vmatpush.msra.mxu0 %v223_v11  ;;  %v270_v19 = vld [vmem:[%s619_s17 + $0x1d8] sm:$0xff]  ;;  %v237_v22 = vld [vmem:[%s619_s17 + $0xd0] sm:$0xff]  ;;  %v220_v24 = vld [vmem:[%s619_s17 + $0x48] sm:$0xff] }
  0x16   : > { %440 = vmatpush.msra.mxu3 %v272_v13  ;;  %400 = vmatpush.msra.mxu2 %v255_v12  ;;  %v269_v23 = vld [vmem:[%s619_s17 + $0x1d0] sm:$0xff]  ;;  %v252_v25 = vld [vmem:[%s619_s17 + $0x148] sm:$0xff]  ;;  %v219_v28 = vld [vmem:[%s619_s17 + $0x40] sm:$0xff] }
  0x17   : > { %359 = vmatpush.msra.mxu1 %v239_v14  ;;  %319 = vmatpush.msra.mxu0 %v222_v16  ;;  %v236_v26 = vld [vmem:[%s619_s17 + $0xc8] sm:$0xff]  ;;  %v251_v29 = vld [vmem:[%s619_s17 + $0x140] sm:$0xff]  ;;  %v218_v32 = vld [vmem:[%s619_s17 + $0x38] sm:$0xff] }
  0x18   : > { %441 = vmatpush.msra.mxu3 %v271_v15  ;;  %401 = vmatpush.msra.mxu2 %v254_v17  ;;  %v268_v27 = vld [vmem:[%s619_s17 + $0x1c8] sm:$0xff]  ;;  %v235_v30 = vld [vmem:[%s619_s17 + $0xc0] sm:$0xff]  ;;  %v250_v33 = vld [vmem:[%s619_s17 + $0x138] sm:$0xff] }
  0x19   : > { %360 = vmatpush.msra.mxu1 %v238_v18  ;;  %320 = vmatpush.msra.mxu0 %v221_v20  ;;  %v267_v31 = vld [vmem:[%s619_s17 + $0x1c0] sm:$0xff]  ;;  %v234_v34 = vld [vmem:[%s619_s17 + $0xb8] sm:$0xff]  ;;  %v217_v36 = vld [vmem:[%s619_s17 + $0x30] sm:$0xff] }
  0x1a   : > { %442 = vmatpush.msra.mxu3 %v270_v19  ;;  %402 = vmatpush.msra.mxu2 %v253_v21  ;;  %v266_v35 = vld [vmem:[%s619_s17 + $0x1b8] sm:$0xff]  ;;  %v249_v37 = vld [vmem:[%s619_s17 + $0x130] sm:$0xff]  ;;  %v216_v40 = vld [vmem:[%s619_s17 + $0x28] sm:$0xff] }
  0x1b   : > { %361 = vmatpush.msra.mxu1 %v237_v22  ;;  %321 = vmatpush.msra.mxu0 %v220_v24  ;;  %v233_v38 = vld [vmem:[%s619_s17 + $0xb0] sm:$0xff]  ;;  %v248_v41 = vld [vmem:[%s619_s17 + $0x128] sm:$0xff]  ;;  %v215_v44 = vld [vmem:[%s619_s17 + $0x20] sm:$0xff] }
  0x1c   : > { %443 = vmatpush.msra.mxu3 %v269_v23  ;;  %403 = vmatpush.msra.mxu2 %v252_v25  ;;  %v265_v39 = vld [vmem:[%s619_s17 + $0x1b0] sm:$0xff]  ;;  %v232_v42 = vld [vmem:[%s619_s17 + $0xa8] sm:$0xff]  ;;  %v247_v45 = vld [vmem:[%s619_s17 + $0x120] sm:$0xff] }
  0x1d   : > { %362 = vmatpush.msra.mxu1 %v236_v26  ;;  %322 = vmatpush.msra.mxu0 %v219_v28  ;;  %v264_v43 = vld [vmem:[%s619_s17 + $0x1a8] sm:$0xff]  ;;  %v231_v46 = vld [vmem:[%s619_s17 + $0xa0] sm:$0xff]  ;;  %v214_v48 = vld [vmem:[%s619_s17 + $0x18] sm:$0xff] }
  0x1e   : > { %444 = vmatpush.msra.mxu3 %v268_v27  ;;  %404 = vmatpush.msra.mxu2 %v251_v29  ;;  %v263_v47 = vld [vmem:[%s619_s17 + $0x1a0] sm:$0xff]  ;;  %v246_v49 = vld [vmem:[%s619_s17 + $0x118] sm:$0xff]  ;;  %v213_v52 = vld [vmem:[%s619_s17 + $0x10] sm:$0xff] }
  0x1f   : > { %363 = vmatpush.msra.mxu1 %v235_v30  ;;  %323 = vmatpush.msra.mxu0 %v218_v32  ;;  %v230_v50 = vld [vmem:[%s619_s17 + $0x98] sm:$0xff]  ;;  %v245_v53 = vld [vmem:[%s619_s17 + $0x110] sm:$0xff]  ;;  %v212_v56 = vld [vmem:[%s619_s17 + $0x8] sm:$0xff] }
  0x20   : > { %445 = vmatpush.msra.mxu3 %v267_v31  ;;  %405 = vmatpush.msra.mxu2 %v250_v33  ;;  %v262_v51 = vld [vmem:[%s619_s17 + $0x198] sm:$0xff]  ;;  %v229_v54 = vld [vmem:[%s619_s17 + $0x90] sm:$0xff]  ;;  %v244_v57 = vld [vmem:[%s619_s17 + $0x108] sm:$0xff] }
  0x21   : > { %364 = vmatpush.msra.mxu1 %v234_v34  ;;  %324 = vmatpush.msra.mxu0 %v217_v36  ;;  %v261_v55 = vld [vmem:[%s619_s17 + $0x190] sm:$0xff]  ;;  %v228_v58 = vld [vmem:[%s619_s17 + $0x88] sm:$0xff]  ;;  %v211_v60 = vld [vmem:[%s619_s17] sm:$0xff] }
  0x22   : > { %446 = vmatpush.msra.mxu3 %v266_v35  ;;  %406 = vmatpush.msra.mxu2 %v249_v37  ;;  %v260_v59 = vld [vmem:[%s619_s17 + $0x188] sm:$0xff]  ;;  %v243_v61 = vld [vmem:[%s619_s17 + $0x100] sm:$0xff]  ;;  %v174_v3 = vld [vmem:[%s831_s1 + $0x18] sm:$0xff] }
  0x23   : > { %365 = vmatpush.msra.mxu1 %v233_v38  ;;  %325 = vmatpush.msra.mxu0 %v216_v40  ;;  %v227_v0 = vld [vmem:[%s619_s17 + $0x80] sm:$0xff]  ;;  %v172_v2 = vld [vmem:[%s831_s1 + $0x8] sm:$0xff]  ;;  %v205_v5 = vld [vmem:[%s832_s2 + $0x10] sm:$0xff] }
  0x24   : > { %447 = vmatpush.msra.mxu3 %v265_v39  ;;  %407 = vmatpush.msra.mxu2 %v248_v41  ;;  %v259_v1 = vld [vmem:[%s619_s17 + $0x180] sm:$0xff]  ;;  %v177_v8 = vld [vmem:[%s831_s1 + $0x30] sm:$0xff]  ;;  %v176_v9 = vld [vmem:[%s831_s1 + $0x28] sm:$0xff] }
  0x25   : > { %366 = vmatpush.msra.mxu1 %v232_v42  ;;  %326 = vmatpush.msra.mxu0 %v215_v44  ;;  %v203_v4 = vld [vmem:[%s832_s2] sm:$0xff]  ;;  %v178_v10 = vld [vmem:[%s831_s1 + $0x38] sm:$0xff]  ;;  %v204_v11 = vld [vmem:[%s832_s2 + $0x8] sm:$0xff] }
  0x26   : > { %448 = vmatpush.msra.mxu3 %v264_v43  ;;  %408 = vmatpush.msra.mxu2 %v247_v45  ;;  %v175_v7 = vld [vmem:[%s831_s1 + $0x20] sm:$0xff]  ;;  %v206_v12 = vld [vmem:[%s832_s2 + $0x18] sm:$0xff]  ;;  %v181_v14 = vld [vmem:[%s831_s1 + $0x50] sm:$0xff] }
  0x27   : > { %367 = vmatpush.msra.mxu1 %v231_v46  ;;  %327 = vmatpush.msra.mxu0 %v214_v48  ;;  %v179_v13 = vld [vmem:[%s831_s1 + $0x40] sm:$0xff]  ;;  %v180_v15 = vld [vmem:[%s831_s1 + $0x48] sm:$0xff]  ;;  %v182_v16 = vld [vmem:[%s831_s1 + $0x58] sm:$0xff] }
  0x28   : > { %449 = vmatpush.msra.mxu3 %v263_v47  ;;  %409 = vmatpush.msra.mxu2 %v246_v49  ;;  %v210_v17 = vld [vmem:[%s832_s2 + $0x38] sm:$0xff]  ;;  %v209_v18 = vld [vmem:[%s832_s2 + $0x30] sm:$0xff]  ;;  %v183_v19 = vld [vmem:[%s831_s1 + $0x60] sm:$0xff] }
  0x29   : > { %368 = vmatpush.msra.mxu1 %v230_v50  ;;  %328 = vmatpush.msra.mxu0 %v213_v52  ;;  %v185_v20 = vld [vmem:[%s831_s1 + $0x70] sm:$0xff]  ;;  %v184_v21 = vld [vmem:[%s831_s1 + $0x68] sm:$0xff]  ;;  %v186_v22 = vld [vmem:[%s831_s1 + $0x78] sm:$0xff] }
  0x2a   : > { %450 = vmatpush.msra.mxu3 %v262_v51  ;;  %410 = vmatpush.msra.mxu2 %v245_v53  ;;  %v207_v23 = vld [vmem:[%s832_s2 + $0x20] sm:$0xff]  ;;  %v189_v25 = vld [vmem:[%s831_s1 + $0x90] sm:$0xff]  ;;  %v188_v26 = vld [vmem:[%s831_s1 + $0x88] sm:$0xff] }
  0x2b   : > { %369 = vmatpush.msra.mxu1 %v229_v54  ;;  %329 = vmatpush.msra.mxu0 %v212_v56  ;;  %v187_v24 = vld [vmem:[%s831_s1 + $0x80] sm:$0xff]  ;;  %v190_v27 = vld [vmem:[%s831_s1 + $0x98] sm:$0xff]  ;;  %v208_v28 = vld [vmem:[%s832_s2 + $0x28] sm:$0xff] }
  0x2c   : > { %451 = vmatpush.msra.mxu3 %v261_v55  ;;  %411 = vmatpush.msra.mxu2 %v244_v57  ;;  %v191_v29 = vld [vmem:[%s831_s1 + $0xa0] sm:$0xff]  ;;  %v193_v30 = vld [vmem:[%s831_s1 + $0xb0] sm:$0xff]  ;;  %v192_v31 = vld [vmem:[%s831_s1 + $0xa8] sm:$0xff] }
  0x2d   : > { %370 = vmatpush.msra.mxu1 %v228_v58  ;;  %330 = vmatpush.msra.mxu0 %v211_v60  ;;  %v194_v32 = vld [vmem:[%s831_s1 + $0xb8] sm:$0xff]  ;;  %v195_v33 = vld [vmem:[%s831_s1 + $0xc0] sm:$0xff]  ;;  %v197_v34 = vld [vmem:[%s831_s1 + $0xd0] sm:$0xff] }
  0x2e   : > { %452 = vmatpush.msra.mxu3 %v260_v59  ;;  %412 = vmatpush.msra.mxu2 %v243_v61  ;;  %v196_v35 = vld [vmem:[%s831_s1 + $0xc8] sm:$0xff]  ;;  %v198_v36 = vld [vmem:[%s831_s1 + $0xd8] sm:$0xff]  ;;  %v199_v37 = vld [vmem:[%s831_s1 + $0xe0] sm:$0xff] }
  0x2f   : > { %331 = vmatmul.f32.vlgmr.msra.gmra.mxu0 %v171_v62  ;;  %413 = vmatmul.f32.vlgmr.msra.gmra.mxu2 %v173_v63  ;;  %v201_v38 = vld [vmem:[%s831_s1 + $0xf0] sm:$0xff]  ;;  %v200_v39 = vld [vmem:[%s831_s1 + $0xe8] sm:$0xff]  ;;  %v202_v40 = vld [vmem:[%s831_s1 + $0xf8] sm:$0xff] }
  0x30   : > { %371 = vmatpush.msra.mxu1 %v227_v0  ;;  %453 = vmatpush.msra.mxu3 %v259_v1 }
  0x31   : > { %372 = vmatmul.f32.vlgmr.msra.gmra.mxu1 %v172_v2  ;;  %454 = vmatmul.f32.vlgmr.msra.gmra.mxu3 %v174_v3 }
  0x32   : > { %573 = vset.pattern.permute.xlu0 %v584_v6  ;;  %574 = vset.pattern.permute.xlu1 %v584_v6 }
  0x33   : > { %277 = vperm.xlu0 %573, %v203_v4   ;;  %287 = vperm.xlu1 %574, %v205_v5  }
  0x34   : > { %575 = vset.pattern.permute.xlu2 %v584_v6 }
  0x35   : > { %297 = vperm.xlu2 %575, %v207_v23  }
  0x37   : > { %334 = vmatmul.f32.gmra.mxu0 %v175_v7  ;;  %416 = vmatmul.f32.gmra.mxu2 %v177_v8 }
  0x39   : > { %375 = vmatmul.f32.gmra.mxu1 %v176_v9  ;;  %457 = vmatmul.f32.gmra.mxu3 %v178_v10 }
  0x3b   : > { %282 = vperm.xlu0 %573, %v204_v11   ;;  %292 = vperm.xlu1 %574, %v206_v12  }
  0x3d   : > { %302 = vperm.xlu2 %575, %v208_v28  }
  0x3f   : > { %337 = vmatmul.f32.gmra.mxu0 %v179_v13  ;;  %419 = vmatmul.f32.gmra.mxu2 %v181_v14 }
  0x41   : > { %378 = vmatmul.f32.gmra.mxu1 %v180_v15  ;;  %460 = vmatmul.f32.gmra.mxu3 %v182_v16 }
  0x43   : > { %312 = vperm.xlu1 %574, %v210_v17   ;;  %307 = vperm.xlu0 %573, %v209_v18  }
  0x47   : > { %340 = vmatmul.f32.gmra.mxu0 %v183_v19  ;;  %422 = vmatmul.f32.gmra.mxu2 %v185_v20 }
  0x49   : > { %381 = vmatmul.f32.gmra.mxu1 %v184_v21  ;;  %463 = vmatmul.f32.gmra.mxu3 %v186_v22 }
  0x4f   : > { %343 = vmatmul.f32.gmra.mxu0 %v187_v24  ;;  %425 = vmatmul.f32.gmra.mxu2 %v189_v25 }
  0x51   : > { %384 = vmatmul.f32.gmra.mxu1 %v188_v26  ;;  %466 = vmatmul.f32.gmra.mxu3 %v190_v27 }
  0x57   : > { %346 = vmatmul.f32.gmra.mxu0 %v191_v29  ;;  %428 = vmatmul.f32.gmra.mxu2 %v193_v30 }
  0x59   : > { %387 = vmatmul.f32.gmra.mxu1 %v192_v31  ;;  %469 = vmatmul.f32.gmra.mxu3 %v194_v32 }
  0x5f   : > { %349 = vmatmul.f32.gmra.mxu0 %v195_v33  ;;  %431 = vmatmul.f32.gmra.mxu2 %v197_v34 }
  0x61   : > { %390 = vmatmul.f32.gmra.mxu1 %v196_v35  ;;  %472 = vmatmul.f32.gmra.mxu3 %v198_v36 }
  0x67   : > { %352 = vmatmul.f32.gmra.mxu0 %v199_v37  ;;  %434 = vmatmul.f32.gmra.mxu2 %v201_v38 }
  0x69   : > { %393 = vmatmul.f32.gmra.mxu1 %v200_v39  ;;  %475 = vmatmul.f32.gmra.mxu3 %v202_v40 }
  0x8f   : > { %v298_v12 = vpop.permute.xlu2 %297 }
  0x97   : > { %v303_v23 = vpop.permute.xlu2 %302 }
  0xa5   : > { %v278_v41 = vpop.permute.xlu0 %277  ;;  %v288_v56 = vpop.permute.xlu1 %287 }
  0xac   : > { %v332_v42 = vpop.f32.mrf.mxu0 }
  0xad   : > { %v333_v43 = vadd.f32 %v332_v42, %v278_v41  ;;  %v283_v47 = vpop.permute.xlu0 %282  ;;  %v293_v3 = vpop.permute.xlu1 %292 }
  0xae   : > { %v373_v44 = vpop.f32.mrf.mxu1 }
  0xaf   : > { %v374_v45 = vadd.f32 %v373_v44, %v333_v43 }
  0xb2   : > { %v414_v46 = vpop.f32.mrf.mxu2 }
  0xb3   : > { %v415_v48 = vadd.f32 %v414_v46, %v374_v45 }
  0xb4   : > { %v335_v49 = vpop.f32.mrf.mxu0  ;;  %v455_v50 = vpop.f32.mrf.mxu3 }
  0xb5   : > { %v456_v51 = vadd.f32 %v455_v50, %v415_v48  ;;  %v336_v52 = vadd.f32 %v335_v49, %v283_v47  ;;  %v308_v33 = vpop.permute.xlu0 %307  ;;  %v313_v43 = vpop.permute.xlu1 %312 }
  0xb6   : > { %v376_v53 = vpop.f32.mrf.mxu1 }
  0xb7   : > { %v479_v54 = vmax.f32 %v456_v51, 0.0  ;;  %v377_v55 = vadd.f32 %v376_v53, %v336_v52 }
  0xb9   : > { %488 = vst.msk [vmem:[%s809_s26] sm:$0xff] %vm487_vm0, %v479_v54 }
  0xba   : > { %v417_v57 = vpop.f32.mrf.mxu2 }
  0xbb   : > { %v418_v58 = vadd.f32 %v417_v57, %v377_v55 }
  0xbc   : > { %v338_v59 = vpop.f32.mrf.mxu0  ;;  %v458_v60 = vpop.f32.mrf.mxu3 }
  0xbd   : > { %v459_v61 = vadd.f32 %v458_v60, %v418_v58  ;;  %v339_v62 = vadd.f32 %v338_v59, %v288_v56 }
  0xbe   : > { %v379_v63 = vpop.f32.mrf.mxu1 }
  0xbf   : > { %v480_v0 = vmax.f32 %v459_v61, 0.0  ;;  %v380_v1 = vadd.f32 %v379_v63, %v339_v62 }
  0xc1   : > { %489 = vst.msk [vmem:[%s809_s26 + $0x8] sm:$0xff] %vm487_vm0, %v480_v0 }
  0xc2   : > { %v420_v2 = vpop.f32.mrf.mxu2 }
  0xc3   : > { %v421_v4 = vadd.f32 %v420_v2, %v380_v1 }
  0xc4   : > { %v341_v5 = vpop.f32.mrf.mxu0  ;;  %v461_v6 = vpop.f32.mrf.mxu3 }
  0xc5   : > { %v462_v7 = vadd.f32 %v461_v6, %v421_v4  ;;  %v342_v8 = vadd.f32 %v341_v5, %v293_v3 }
  0xc6   : > { %v382_v9 = vpop.f32.mrf.mxu1 }
  0xc7   : > { %v481_v10 = vmax.f32 %v462_v7, 0.0  ;;  %v383_v11 = vadd.f32 %v382_v9, %v342_v8 }
  0xc9   : > { %490 = vst.msk [vmem:[%s809_s26 + $0x10] sm:$0xff] %vm487_vm0, %v481_v10 }
  0xca   : > { %v423_v13 = vpop.f32.mrf.mxu2 }
  0xcb   : > { %v424_v14 = vadd.f32 %v423_v13, %v383_v11 }
  0xcc   : > { %v344_v15 = vpop.f32.mrf.mxu0  ;;  %v464_v16 = vpop.f32.mrf.mxu3 }
  0xcd   : > { %v465_v17 = vadd.f32 %v464_v16, %v424_v14  ;;  %v345_v18 = vadd.f32 %v344_v15, %v298_v12 }
  0xce   : > { %v385_v19 = vpop.f32.mrf.mxu1 }
  0xcf   : > { %v482_v20 = vmax.f32 %v465_v17, 0.0  ;;  %v386_v21 = vadd.f32 %v385_v19, %v345_v18 }
  0xd1   : > { %491 = vst.msk [vmem:[%s809_s26 + $0x18] sm:$0xff] %vm487_vm0, %v482_v20 }
  0xd2   : > { %v426_v22 = vpop.f32.mrf.mxu2 }
  0xd3   : > { %v427_v24 = vadd.f32 %v426_v22, %v386_v21 }
  0xd4   : > { %v347_v25 = vpop.f32.mrf.mxu0  ;;  %v467_v26 = vpop.f32.mrf.mxu3 }
  0xd5   : > { %v468_v27 = vadd.f32 %v467_v26, %v427_v24  ;;  %v348_v28 = vadd.f32 %v347_v25, %v303_v23 }
  0xd6   : > { %v388_v29 = vpop.f32.mrf.mxu1 }
  0xd7   : > { %v483_v30 = vmax.f32 %v468_v27, 0.0  ;;  %v389_v31 = vadd.f32 %v388_v29, %v348_v28 }
  0xd9   : > { %492 = vst.msk [vmem:[%s809_s26 + $0x20] sm:$0xff] %vm487_vm0, %v483_v30 }
  0xda   : > { %v429_v32 = vpop.f32.mrf.mxu2 }
  0xdb   : > { %v430_v34 = vadd.f32 %v429_v32, %v389_v31 }
  0xdc   : > { %v350_v35 = vpop.f32.mrf.mxu0  ;;  %v470_v36 = vpop.f32.mrf.mxu3 }
  0xdd   : > { %v351_v37 = vadd.f32 %v350_v35, %v308_v33  ;;  %v471_v38 = vadd.f32 %v470_v36, %v430_v34 }
  0xde   : > { %v391_v39 = vpop.f32.mrf.mxu1 }
  0xdf   : > { %v484_v40 = vmax.f32 %v471_v38, 0.0  ;;  %v392_v41 = vadd.f32 %v391_v39, %v351_v37 }
  0xe1   : > { %493 = vst.msk [vmem:[%s809_s26 + $0x28] sm:$0xff] %vm487_vm0, %v484_v40 }
  0xe2   : > { %v432_v42 = vpop.f32.mrf.mxu2 }
  0xe3   : > { %v433_v44 = vadd.f32 %v432_v42, %v392_v41 }
  0xe4   : > { %v353_v45 = vpop.f32.mrf.mxu0  ;;  %v473_v46 = vpop.f32.mrf.mxu3 }
  0xe5   : > { %v354_v47 = vadd.f32 %v353_v45, %v313_v43  ;;  %v474_v48 = vadd.f32 %v473_v46, %v433_v44 }
  0xe6   : > { %v394_v49 = vpop.f32.mrf.mxu1 }
  0xe7   : > { %v485_v50 = vmax.f32 %v474_v48, 0.0  ;;  %v395_v51 = vadd.f32 %v394_v49, %v354_v47 }
  0xe9   : > { %494 = vst.msk [vmem:[%s809_s26 + $0x30] sm:$0xff] %vm487_vm0, %v485_v50 }
  0xea   : > { %v435_v52 = vpop.f32.mrf.mxu2 }
  0xeb   : > { %v436_v53 = vadd.f32 %v435_v52, %v395_v51 }
  0xec   : > { %v476_v54 = vpop.f32.mrf.mxu3 }
  0xed   : > { %v477_v55 = vadd.f32 %v476_v54, %v436_v53 }
  0xef   : > { %v486_v56 = vmax.f32 %v477_v55, 0.0 }
  0xf1   : > { %495 = vst.msk [vmem:[%s809_s26 + $0x38] sm:$0xff] %vm487_vm0, %v486_v56 }
  0xf2 PF: > { %s13_s12 = sadd.s32 1, %s582_s12  }
  0xf3   : > { %p10_p4 = scmp.ge.s32.totalorder %s13_s12, 4  }
  0xf5   :  { %12 = sbr.rel (!%p10_p4) target bundleno = 1 (0x1), region = 62 }

// kernel: cnn_base_forward.6
= control target key start
LH: loop header
LB: loop body
LE: loop exit
PB: predicated region body
PF: predicated region fallthrough
CT: control target
= control target key end

     0   :  { %s589_s12 = smov 0   ;;  %s756_s0 = inlined_call_operand.vmem [shape: f32[2,576,49], index: 0, kind: input, shape index: {}]   ;;  %s757_s1 = inlined_call_operand.vmem [shape: f32[32,576], index: 1, kind: input, shape index: {}]   ;;  %s758_s2 = inlined_call_operand.vmem [shape: f32[32,1], index: 2, kind: input, shape index: {}]   ;;  %s759_s3 = inlined_call_operand.vmem [shape: f32[2,32,49], index: 3, kind: output, shape index: {}]  }
   0x1 LB: > { %s509_s13 = sadd.s32 4294967295, %s566_s12   ;;  %p513_p0 = scmp.ge.s32.totalorder %s566_s12, 1  ;;  %s566_s12 = sphi %s589_s12, %s13_s12  }
   0x2   : > { %p137_p1 = scmp.lt.s32.totalorder %s566_s12, 3 }
   0x4   : > { %p138_p2 = pnand %p513_p0, %p137_p1 }
   0x5   : > { %p161_p3 = scmp.lt.s32.totalorder (!%p138_p2), %s509_s13, 1 }
   0x6   : > { %141 = sbr.rel (%p138_p2) target bundleno = 220 (0xdc), region = 32 }
   0xb   : > { %s761_s13 = smov (!%p161_p3, %s509_s13), 1  ;;  %vm287_vm0 = vcmask 523264   ;;  %vm449_vm1 = vcmask 400384  }
   0xc   : > { %s548_s14 = smul.u32 576, %s761_s13  ;;  %s523_s16 = sshll.u32 %s761_s13, 5 }
   0xd   : > { %s170_s20 = scalar_lea.vmem %s759_s3, %s523_s16 }
   0xe   : > { %s603_s17 = scalar_lea.vmem %s756_s0, %s548_s14 }
   0xf   : > { %v210_v0 = vld [vmem:[%s603_s17 + $0x78] sm:$0xff]  ;;  %v209_v4 = vld [vmem:[%s603_s17 + $0x70] sm:$0xff]  ;;  %v208_v8 = vld [vmem:[%s603_s17 + $0x68] sm:$0xff] }
  0x10   : > { %v226_v1 = vld [vmem:[%s603_s17 + $0xf8] sm:$0xff]  ;;  %300 = vmatpush.msra.mxu0 %v210_v0  ;;  %v225_v5 = vld [vmem:[%s603_s17 + $0xf0] sm:$0xff]  ;;  %v224_v9 = vld [vmem:[%s603_s17 + $0xe8] sm:$0xff] }
  0x11   : > { %v242_v2 = vld [vmem:[%s603_s17 + $0x178] sm:$0xff]  ;;  %329 = vmatpush.msra.mxu1 %v226_v1  ;;  %v241_v6 = vld [vmem:[%s603_s17 + $0x170] sm:$0xff]  ;;  %v240_v10 = vld [vmem:[%s603_s17 + $0x168] sm:$0xff] }
  0x12   : > { %v258_v3 = vld [vmem:[%s603_s17 + $0x1f8] sm:$0xff]  ;;  %358 = vmatpush.msra.mxu2 %v242_v2  ;;  %v257_v7 = vld [vmem:[%s603_s17 + $0x1f0] sm:$0xff]  ;;  %301 = vmatpush.msra.mxu0 %v209_v4  ;;  %v256_v11 = vld [vmem:[%s603_s17 + $0x1e8] sm:$0xff] }
  0x13   : > { %387 = vmatpush.msra.mxu3 %v258_v3  ;;  %330 = vmatpush.msra.mxu1 %v225_v5  ;;  %v207_v12 = vld [vmem:[%s603_s17 + $0x60] sm:$0xff]  ;;  %v206_v16 = vld [vmem:[%s603_s17 + $0x58] sm:$0xff]  ;;  %v205_v20 = vld [vmem:[%s603_s17 + $0x50] sm:$0xff] }
  0x14   : > { %359 = vmatpush.msra.mxu2 %v241_v6  ;;  %v223_v13 = vld [vmem:[%s603_s17 + $0xe0] sm:$0xff]  ;;  %302 = vmatpush.msra.mxu0 %v208_v8  ;;  %v222_v17 = vld [vmem:[%s603_s17 + $0xd8] sm:$0xff]  ;;  %v221_v21 = vld [vmem:[%s603_s17 + $0xd0] sm:$0xff] }
  0x15   : > { %388 = vmatpush.msra.mxu3 %v257_v7  ;;  %331 = vmatpush.msra.mxu1 %v224_v9  ;;  %v239_v14 = vld [vmem:[%s603_s17 + $0x160] sm:$0xff]  ;;  %v238_v18 = vld [vmem:[%s603_s17 + $0x158] sm:$0xff]  ;;  %v237_v22 = vld [vmem:[%s603_s17 + $0x150] sm:$0xff] }
  0x16   : > { %v255_v15 = vld [vmem:[%s603_s17 + $0x1e0] sm:$0xff]  ;;  %360 = vmatpush.msra.mxu2 %v240_v10  ;;  %303 = vmatpush.msra.mxu0 %v207_v12  ;;  %v254_v19 = vld [vmem:[%s603_s17 + $0x1d8] sm:$0xff]  ;;  %v253_v23 = vld [vmem:[%s603_s17 + $0x1d0] sm:$0xff] }
  0x17   : > { %389 = vmatpush.msra.mxu3 %v256_v11  ;;  %332 = vmatpush.msra.mxu1 %v223_v13  ;;  %v204_v24 = vld [vmem:[%s603_s17 + $0x48] sm:$0xff]  ;;  %v203_v28 = vld [vmem:[%s603_s17 + $0x40] sm:$0xff]  ;;  %v202_v32 = vld [vmem:[%s603_s17 + $0x38] sm:$0xff]  ;;  %v568_v11 = vmov 0  }
  0x18   : > { %361 = vmatpush.msra.mxu2 %v239_v14  ;;  %304 = vmatpush.msra.mxu0 %v206_v16  ;;  %v220_v25 = vld [vmem:[%s603_s17 + $0xc8] sm:$0xff]  ;;  %v219_v29 = vld [vmem:[%s603_s17 + $0xc0] sm:$0xff]  ;;  %v218_v33 = vld [vmem:[%s603_s17 + $0xb8] sm:$0xff] }
  0x19   : > { %390 = vmatpush.msra.mxu3 %v255_v15  ;;  %333 = vmatpush.msra.mxu1 %v222_v17  ;;  %v236_v26 = vld [vmem:[%s603_s17 + $0x148] sm:$0xff]  ;;  %v235_v30 = vld [vmem:[%s603_s17 + $0x140] sm:$0xff]  ;;  %v234_v34 = vld [vmem:[%s603_s17 + $0x138] sm:$0xff] }
  0x1a   : > { %362 = vmatpush.msra.mxu2 %v238_v18  ;;  %305 = vmatpush.msra.mxu0 %v205_v20  ;;  %v252_v27 = vld [vmem:[%s603_s17 + $0x1c8] sm:$0xff]  ;;  %v251_v31 = vld [vmem:[%s603_s17 + $0x1c0] sm:$0xff]  ;;  %v250_v35 = vld [vmem:[%s603_s17 + $0x1b8] sm:$0xff] }
  0x1b   : > { %391 = vmatpush.msra.mxu3 %v254_v19  ;;  %334 = vmatpush.msra.mxu1 %v221_v21  ;;  %v201_v36 = vld [vmem:[%s603_s17 + $0x30] sm:$0xff]  ;;  %v200_v40 = vld [vmem:[%s603_s17 + $0x28] sm:$0xff]  ;;  %v199_v44 = vld [vmem:[%s603_s17 + $0x20] sm:$0xff] }
  0x1c   : > { %363 = vmatpush.msra.mxu2 %v237_v22  ;;  %306 = vmatpush.msra.mxu0 %v204_v24  ;;  %v217_v37 = vld [vmem:[%s603_s17 + $0xb0] sm:$0xff]  ;;  %v216_v41 = vld [vmem:[%s603_s17 + $0xa8] sm:$0xff]  ;;  %v215_v45 = vld [vmem:[%s603_s17 + $0xa0] sm:$0xff] }
  0x1d   : > { %392 = vmatpush.msra.mxu3 %v253_v23  ;;  %335 = vmatpush.msra.mxu1 %v220_v25  ;;  %v233_v38 = vld [vmem:[%s603_s17 + $0x130] sm:$0xff]  ;;  %v232_v42 = vld [vmem:[%s603_s17 + $0x128] sm:$0xff]  ;;  %v231_v46 = vld [vmem:[%s603_s17 + $0x120] sm:$0xff] }
  0x1e   : > { %364 = vmatpush.msra.mxu2 %v236_v26  ;;  %307 = vmatpush.msra.mxu0 %v203_v28  ;;  %v249_v39 = vld [vmem:[%s603_s17 + $0x1b0] sm:$0xff]  ;;  %v248_v43 = vld [vmem:[%s603_s17 + $0x1a8] sm:$0xff]  ;;  %v247_v47 = vld [vmem:[%s603_s17 + $0x1a0] sm:$0xff] }
  0x1f   : > { %393 = vmatpush.msra.mxu3 %v252_v27  ;;  %336 = vmatpush.msra.mxu1 %v219_v29  ;;  %v198_v48 = vld [vmem:[%s603_s17 + $0x18] sm:$0xff]  ;;  %v197_v52 = vld [vmem:[%s603_s17 + $0x10] sm:$0xff]  ;;  %v196_v56 = vld [vmem:[%s603_s17 + $0x8] sm:$0xff] }
  0x20   : > { %365 = vmatpush.msra.mxu2 %v235_v30  ;;  %308 = vmatpush.msra.mxu0 %v202_v32  ;;  %v214_v49 = vld [vmem:[%s603_s17 + $0x98] sm:$0xff]  ;;  %v213_v53 = vld [vmem:[%s603_s17 + $0x90] sm:$0xff]  ;;  %v212_v57 = vld [vmem:[%s603_s17 + $0x88] sm:$0xff] }
  0x21   : > { %394 = vmatpush.msra.mxu3 %v251_v31  ;;  %337 = vmatpush.msra.mxu1 %v218_v33  ;;  %v230_v50 = vld [vmem:[%s603_s17 + $0x118] sm:$0xff]  ;;  %v229_v54 = vld [vmem:[%s603_s17 + $0x110] sm:$0xff]  ;;  %v228_v58 = vld [vmem:[%s603_s17 + $0x108] sm:$0xff] }
  0x22   : > { %366 = vmatpush.msra.mxu2 %v234_v34  ;;  %309 = vmatpush.msra.mxu0 %v201_v36  ;;  %v246_v51 = vld [vmem:[%s603_s17 + $0x198] sm:$0xff]  ;;  %v245_v55 = vld [vmem:[%s603_s17 + $0x190] sm:$0xff]  ;;  %v244_v59 = vld [vmem:[%s603_s17 + $0x188] sm:$0xff] }
  0x23   : > { %395 = vmatpush.msra.mxu3 %v250_v35  ;;  %338 = vmatpush.msra.mxu1 %v217_v37  ;;  %v195_v60 = vld [vmem:[%s603_s17] sm:$0xff]  ;;  %v172_v1 = vld [vmem:[%s757_s1 + $0x8] sm:$0xff]  ;;  %v173_v2 = vld [vmem:[%s757_s1 + $0x10] sm:$0xff] }
  0x24   : > { %367 = vmatpush.msra.mxu2 %v233_v38  ;;  %310 = vmatpush.msra.mxu0 %v200_v40  ;;  %v211_v61 = vld [vmem:[%s603_s17 + $0x80] sm:$0xff]  ;;  %v174_v3 = vld [vmem:[%s757_s1 + $0x18] sm:$0xff]  ;;  %v265_v5 = vld [vmem:[%s603_s17 + $0x230] sm:$0xff] }
  0x25   : > { %396 = vmatpush.msra.mxu3 %v249_v39  ;;  %339 = vmatpush.msra.mxu1 %v216_v41  ;;  %v227_v62 = vld [vmem:[%s603_s17 + $0x100] sm:$0xff]  ;;  %v266_v4 = vld [vmem:[%s603_s17 + $0x238] sm:$0xff]  ;;  %v264_v6 = vld [vmem:[%s603_s17 + $0x228] sm:$0xff] }
  0x26   : > { %368 = vmatpush.msra.mxu2 %v232_v42  ;;  %311 = vmatpush.msra.mxu0 %v199_v44  ;;  %v243_v63 = vld [vmem:[%s603_s17 + $0x180] sm:$0xff]  ;;  %v176_v7 = vld [vmem:[%s757_s1 + $0x28] sm:$0xff]  ;;  %v177_v8 = vld [vmem:[%s757_s1 + $0x30] sm:$0xff] }
  0x27   : > { %397 = vmatpush.msra.mxu3 %v248_v43  ;;  %340 = vmatpush.msra.mxu1 %v215_v45  ;;  %v171_v0 = vld [vmem:[%s757_s1] sm:$0xff]  ;;  %v178_v9 = vld [vmem:[%s757_s1 + $0x38] sm:$0xff]  ;;  %v261_v15 = vld [vmem:[%s603_s17 + $0x210] sm:$0xff] }
  0x28   : > { %369 = vmatpush.msra.mxu2 %v231_v46  ;;  %312 = vmatpush.msra.mxu0 %v198_v48  ;;  %v179_v10 = vld [vmem:[%s757_s1 + $0x40] sm:$0xff]  ;;  %v262_v14 = vld [vmem:[%s603_s17 + $0x218] sm:$0xff]  ;;  %v181_v16 = vld [vmem:[%s757_s1 + $0x50] sm:$0xff] }
  0x29   : > { %398 = vmatpush.msra.mxu3 %v247_v47  ;;  %341 = vmatpush.msra.mxu1 %v214_v49  ;;  %v263_v12 = vld [vmem:[%s603_s17 + $0x220] sm:$0xff]  ;;  %v182_v17 = vld [vmem:[%s757_s1 + $0x58] sm:$0xff]  ;;  %v184_v19 = vld [vmem:[%s757_s1 + $0x68] sm:$0xff] }
  0x2a   : > { %370 = vmatpush.msra.mxu2 %v230_v50  ;;  %313 = vmatpush.msra.mxu0 %v197_v52  ;;  %v191_v13 = vld [vmem:[%s758_s2] sm:$0xff]  ;;  %v260_v20 = vld [vmem:[%s603_s17 + $0x208] sm:$0xff]  ;;  %v193_v22 = vld [vmem:[%s758_s2 + $0x10] sm:$0xff] }
  0x2b   : > { %399 = vmatpush.msra.mxu3 %v246_v51  ;;  %342 = vmatpush.msra.mxu1 %v213_v53  ;;  %v183_v18 = vld [vmem:[%s757_s1 + $0x60] sm:$0xff]  ;;  %v192_v21 = vld [vmem:[%s758_s2 + $0x8] sm:$0xff]  ;;  %v186_v24 = vld [vmem:[%s757_s1 + $0x78] sm:$0xff] }
  0x2c   : > { %371 = vmatpush.msra.mxu2 %v229_v54  ;;  %314 = vmatpush.msra.mxu0 %v196_v56  ;;  %v259_v23 = vld [vmem:[%s603_s17 + $0x200] sm:$0xff]  ;;  %v188_v26 = vld [vmem:[%s757_s1 + $0x88] sm:$0xff]  ;;  %v189_v27 = vld [vmem:[%s757_s1 + $0x90] sm:$0xff] }
  0x2d   : > { %400 = vmatpush.msra.mxu3 %v245_v55  ;;  %343 = vmatpush.msra.mxu1 %v212_v57  ;;  %v187_v25 = vld [vmem:[%s757_s1 + $0x80] sm:$0xff]  ;;  %v194_v28 = vld [vmem:[%s758_s2 + $0x18] sm:$0xff]  ;;  %v180_v30 = vld [vmem:[%s757_s1 + $0x48] sm:$0xff] }
  0x2e   : > { %372 = vmatpush.msra.mxu2 %v228_v58  ;;  %315 = vmatpush.msra.mxu0 %v195_v60  ;;  %v175_v29 = vld [vmem:[%s757_s1 + $0x20] sm:$0xff]  ;;  %v185_v31 = vld [vmem:[%s757_s1 + $0x70] sm:$0xff]  ;;  %v190_v32 = vld [vmem:[%s757_s1 + $0x98] sm:$0xff] }
  0x2f   : > { %401 = vmatpush.msra.mxu3 %v244_v59  ;;  %344 = vmatpush.msra.mxu1 %v211_v61 }
  0x30   : > { %373 = vmatpush.msra.mxu2 %v227_v62  ;;  %316 = vmatmul.f32.vlgmr.msra.gmra.mxu0 %v171_v0 }
  0x31   : > { %402 = vmatpush.msra.mxu3 %v243_v63  ;;  %345 = vmatmul.f32.vlgmr.msra.gmra.mxu1 %v172_v1 }
  0x32   : > { %374 = vmatmul.f32.vlgmr.msra.gmra.mxu2 %v173_v2  ;;  %403 = vmatmul.f32.vlgmr.msra.gmra.mxu3 %v174_v3 }
  0x33   : > { %525 = vmatpush.msrb.mxu2 %v266_v4  ;;  %526 = vmatpush.msrb.mxu3 %v266_v4 }
  0x34   : > { %424 = vmatpush.msrb.mxu0 %v266_v4  ;;  %524 = vmatpush.msrb.mxu1 %v266_v4 }
  0x35   : > { %528 = vmatpush.msrb.mxu2 %v265_v5  ;;  %529 = vmatpush.msrb.mxu3 %v265_v5 }
  0x36   : > { %425 = vmatpush.msrb.mxu0 %v265_v5  ;;  %527 = vmatpush.msrb.mxu1 %v265_v5 }
  0x37   : > { %531 = vmatpush.msrb.mxu2 %v264_v6  ;;  %532 = vmatpush.msrb.mxu3 %v264_v6 }
  0x38   : > { %558 = vset.pattern.permute.xlu0 %v568_v11  ;;  %426 = vmatpush.msrb.mxu0 %v264_v6 }
  0x39   : > { %319 = vmatmul.f32.gmra.mxu0 %v176_v7  ;;  %348 = vmatmul.f32.gmra.mxu1 %v177_v8 }
  0x3a   : > { %377 = vmatmul.f32.gmra.mxu2 %v178_v9  ;;  %406 = vmatmul.f32.gmra.mxu3 %v179_v10 }
  0x3b   : > { %534 = vmatpush.msrb.mxu2 %v263_v12  ;;  %535 = vmatpush.msrb.mxu3 %v263_v12 }
  0x3c   : > { %269 = vperm.xlu0 %558, %v191_v13   ;;  %530 = vmatpush.msrb.mxu1 %v264_v6 }
  0x3d   : > { %537 = vmatpush.msrb.mxu2 %v262_v14  ;;  %538 = vmatpush.msrb.mxu3 %v262_v14 }
  0x3e   : > { %427 = vmatpush.msrb.mxu0 %v263_v12  ;;  %533 = vmatpush.msrb.mxu1 %v263_v12 }
  0x3f   : > { %540 = vmatpush.msrb.mxu2 %v261_v15  ;;  %541 = vmatpush.msrb.mxu3 %v261_v15 }
  0x40   : > { %428 = vmatpush.msrb.mxu0 %v262_v14  ;;  %536 = vmatpush.msrb.mxu1 %v262_v14 }
  0x41   : > { %322 = vmatmul.f32.gmra.mxu0 %v181_v16  ;;  %351 = vmatmul.f32.gmra.mxu1 %v182_v17 }
  0x42   : > { %380 = vmatmul.f32.gmra.mxu2 %v183_v18  ;;  %409 = vmatmul.f32.gmra.mxu3 %v184_v19 }
  0x43   : > { %559 = vset.pattern.permute.xlu1 %v568_v11  ;;  %543 = vmatpush.msrb.mxu2 %v260_v20 }
  0x44   : > { %274 = vperm.xlu0 %558, %v192_v21   ;;  %544 = vmatpush.msrb.mxu3 %v260_v20 }
  0x45   : > { %279 = vperm.xlu1 %559, %v193_v22   ;;  %429 = vmatpush.msrb.mxu0 %v261_v15 }
  0x46   : > { %539 = vmatpush.msrb.mxu1 %v261_v15  ;;  %546 = vmatpush.msrb.mxu2 %v259_v23 }
  0x47   : > { %547 = vmatpush.msrb.mxu3 %v259_v23  ;;  %430 = vmatpush.msrb.mxu0 %v260_v20 }
  0x48   : > { %542 = vmatpush.msrb.mxu1 %v260_v20 }
  0x49   : > { %325 = vmatmul.f32.gmra.mxu0 %v186_v24  ;;  %354 = vmatmul.f32.gmra.mxu1 %v187_v25 }
  0x4a   : > { %383 = vmatmul.f32.gmra.mxu2 %v188_v26  ;;  %412 = vmatmul.f32.gmra.mxu3 %v189_v27 }
  0x4b   : > { %431 = vmatpush.msrb.mxu0 %v259_v23  ;;  %545 = vmatpush.msrb.mxu1 %v259_v23 }
  0x4d   : > { %284 = vperm.xlu1 %559, %v194_v28  }
  0x51   : > { %517 = vmatmul.msk.f32.vlgmr.msrb.gmra.mxu0 %vm287_vm0, %v175_v29  ;;  %518 = vmatmul.msk.f32.vlgmr.msrb.gmra.mxu1 %vm287_vm0, %v180_v30 }
  0x52   : > { %519 = vmatmul.msk.f32.vlgmr.msrb.gmra.mxu2 %vm287_vm0, %v185_v31  ;;  %520 = vmatmul.msk.f32.vlgmr.msrb.gmra.mxu3 %vm287_vm0, %v190_v32 }
  0xad   : > { %v317_v33 = vpop.f32.mrf.mxu0 }
  0xae   : > { %v346_v34 = vpop.f32.mrf.mxu1  ;;  %v270_v35 = vpop.permute.xlu0 %269 }
  0xaf   : > { %v318_v46 = vadd.f32 %v317_v33, %v270_v35 }
  0xb1   : > { %v347_v48 = vadd.f32 %v346_v34, %v318_v46 }
  0xb5   : > { %v375_v36 = vpop.f32.mrf.mxu2  ;;  %v404_v37 = vpop.f32.mrf.mxu3 }
  0xb6   : > { %v320_v38 = vpop.f32.mrf.mxu0  ;;  %v349_v39 = vpop.f32.mrf.mxu1  ;;  %v376_v55 = vadd.f32 %v375_v36, %v347_v48 }
  0xb7   : > { %v275_v40 = vpop.permute.xlu0 %274  ;;  %v280_v45 = vpop.permute.xlu1 %279 }
  0xb8   : > { %v321_v47 = vadd.f32 %v320_v38, %v275_v40  ;;  %v405_v60 = vadd.f32 %v404_v37, %v376_v55 }
  0xba   : > { %v350_v49 = vadd.f32 %v349_v39, %v321_v47 }
  0xbd   : > { %v378_v41 = vpop.f32.mrf.mxu2  ;;  %v407_v42 = vpop.f32.mrf.mxu3 }
  0xbe   : > { %v323_v43 = vpop.f32.mrf.mxu0  ;;  %v352_v44 = vpop.f32.mrf.mxu1  ;;  %v379_v56 = vadd.f32 %v378_v41, %v350_v49 }
  0xbf   : > { %v324_v54 = vadd.f32 %v323_v43, %v280_v45  ;;  %v285_v57 = vpop.permute.xlu1 %284 }
  0xc0   : > { %v408_v61 = vadd.f32 %v407_v42, %v379_v56 }
  0xc1   : > { %v353_v59 = vadd.f32 %v352_v44, %v324_v54 }
  0xc5   : > { %v381_v50 = vpop.f32.mrf.mxu2  ;;  %v410_v51 = vpop.f32.mrf.mxu3 }
  0xc6   : > { %v326_v52 = vpop.f32.mrf.mxu0  ;;  %v355_v53 = vpop.f32.mrf.mxu1  ;;  %v382_v5 = vadd.f32 %v381_v50, %v353_v59 }
  0xc7   : > { %v327_v58 = vadd.f32 %v326_v52, %v285_v57 }
  0xc8   : > { %v411_v9 = vadd.f32 %v410_v51, %v382_v5 }
  0xc9   : > { %v356_v0 = vadd.f32 %v355_v53, %v327_v58 }
  0xcd   : > { %v384_v62 = vpop.f32.mrf.mxu2  ;;  %v413_v63 = vpop.f32.mrf.mxu3 }
  0xce   : > { %v433_v1 = vpop.f32.mrf.mxu0  ;;  %v436_v2 = vpop.f32.mrf.mxu1  ;;  %v385_v6 = vadd.f32 %v384_v62, %v356_v0 }
  0xcf   : > { %v434_v3 = vadd.f32 %v433_v1, %v405_v60  ;;  %v437_v4 = vadd.f32 %v436_v2, %v408_v61 }
  0xd0   : > { %v414_v10 = vadd.f32 %v413_v63, %v385_v6 }
  0xd1   : > { %v445_v7 = vmax.f32 %v434_v3, 0.0  ;;  %v446_v8 = vmax.f32 %v437_v4, 0.0 }
  0xd3   : > { %450 = vst.msk [vmem:[%s170_s20] sm:$0xff] %vm449_vm1, %v445_v7 }
  0xd4   : > { %451 = vst.msk [vmem:[%s170_s20 + $0x8] sm:$0xff] %vm449_vm1, %v446_v8 }
  0xd5   : > { %v439_v11 = vpop.f32.mrf.mxu2  ;;  %v442_v12 = vpop.f32.mrf.mxu3 }
  0xd6   : > { %v440_v13 = vadd.f32 %v439_v11, %v411_v9  ;;  %v443_v14 = vadd.f32 %v442_v12, %v414_v10 }
  0xd8   : > { %v447_v15 = vmax.f32 %v440_v13, 0.0  ;;  %v448_v16 = vmax.f32 %v443_v14, 0.0 }
  0xda   : > { %452 = vst.msk [vmem:[%s170_s20 + $0x10] sm:$0xff] %vm449_vm1, %v447_v15 }
  0xdb   : > { %453 = vst.msk [vmem:[%s170_s20 + $0x18] sm:$0xff] %vm449_vm1, %v448_v16 }
  0xdc PF: > { %s13_s12 = sadd.s32 1, %s566_s12  }
  0xdd   : > { %p10_p4 = scmp.ge.s32.totalorder %s13_s12, 4  }
  0xdf   :  { %12 = sbr.rel (!%p10_p4) target bundleno = 1 (0x1), region = 62 }

// kernel: cnn_base_forward.7
= control target key start
LH: loop header
LB: loop body
LE: loop exit
PB: predicated region body
PF: predicated region fallthrough
CT: control target
= control target key end

     0   :  { %s4524_s0 = inlined_call_operand.vmem [shape: f32[2,1568], index: 0, kind: input, shape index: {}]   ;;  %s4525_s1 = inlined_call_operand.vmem [shape: f32[1568,512], index: 1, kind: input, shape index: {}]   ;;  %s4526_s2 = inlined_call_operand.vmem [shape: f32[1,512], index: 2, kind: input, shape index: {}]   ;;  %s4527_s3 = inlined_call_operand.vmem [shape: f32[1,512], index: 3, kind: input, shape index: {}]   ;;  %s4528_s4 = inlined_call_operand.<no memory space> [shape: f32[1,1], index: 4, kind: input, shape index: {}]   ;;  %s4529_s5 = inlined_call_operand.hbm [shape: f32[2,512], index: 5, kind: output, shape index: {0}]   ;;  %s4530_s6 = inlined_call_operand.vmem [shape: f32[2,1], index: 6, kind: output, shape index: {1}]  }
   0x1   :  { %v88_v0 = vld [vmem:[%s4525_s1 + $0x1e0] sm:$0xff] }
   0x2   :  { %v152_v1 = vld [vmem:[%s4525_s1 + $0x3e0] sm:$0xff]  ;;  %859 = vmatpush.msra.mxu0 %v88_v0 }
   0x3   :  { %v216_v2 = vld [vmem:[%s4525_s1 + $0x5e0] sm:$0xff]  ;;  %879 = vmatpush.msra.mxu1 %v152_v1 }
   0x4   :  { %v280_v3 = vld [vmem:[%s4525_s1 + $0x7e0] sm:$0xff]  ;;  %899 = vmatpush.msra.mxu2 %v216_v2 }
   0x5   :  { %v84_v4 = vld [vmem:[%s4525_s1 + $0x1c0] sm:$0xff]  ;;  %919 = vmatpush.msra.mxu3 %v280_v3 }
   0x6   :  { %v148_v5 = vld [vmem:[%s4525_s1 + $0x3c0] sm:$0xff]  ;;  %860 = vmatpush.msra.mxu0 %v84_v4 }
   0x7   :  { %v212_v6 = vld [vmem:[%s4525_s1 + $0x5c0] sm:$0xff]  ;;  %880 = vmatpush.msra.mxu1 %v148_v5 }
   0x8   :  { %v276_v7 = vld [vmem:[%s4525_s1 + $0x7c0] sm:$0xff]  ;;  %900 = vmatpush.msra.mxu2 %v212_v6 }
   0x9   :  { %v80_v8 = vld [vmem:[%s4525_s1 + $0x1a0] sm:$0xff]  ;;  %920 = vmatpush.msra.mxu3 %v276_v7 }
   0xa   :  { %v144_v9 = vld [vmem:[%s4525_s1 + $0x3a0] sm:$0xff]  ;;  %861 = vmatpush.msra.mxu0 %v80_v8 }
   0xb   :  { %v208_v10 = vld [vmem:[%s4525_s1 + $0x5a0] sm:$0xff]  ;;  %881 = vmatpush.msra.mxu1 %v144_v9 }
   0xc   :  { %v272_v11 = vld [vmem:[%s4525_s1 + $0x7a0] sm:$0xff]  ;;  %901 = vmatpush.msra.mxu2 %v208_v10 }
   0xd   :  { %v76_v12 = vld [vmem:[%s4525_s1 + $0x180] sm:$0xff]  ;;  %921 = vmatpush.msra.mxu3 %v272_v11 }
   0xe   :  { %v140_v13 = vld [vmem:[%s4525_s1 + $0x380] sm:$0xff]  ;;  %862 = vmatpush.msra.mxu0 %v76_v12 }
   0xf   :  { %v204_v14 = vld [vmem:[%s4525_s1 + $0x580] sm:$0xff]  ;;  %882 = vmatpush.msra.mxu1 %v140_v13 }
  0x10   :  { %v268_v15 = vld [vmem:[%s4525_s1 + $0x780] sm:$0xff]  ;;  %902 = vmatpush.msra.mxu2 %v204_v14 }
  0x11   :  { %v72_v16 = vld [vmem:[%s4525_s1 + $0x160] sm:$0xff]  ;;  %922 = vmatpush.msra.mxu3 %v268_v15 }
  0x12   :  { %v136_v17 = vld [vmem:[%s4525_s1 + $0x360] sm:$0xff]  ;;  %863 = vmatpush.msra.mxu0 %v72_v16 }
  0x13   :  { %v200_v18 = vld [vmem:[%s4525_s1 + $0x560] sm:$0xff]  ;;  %883 = vmatpush.msra.mxu1 %v136_v17 }
  0x14   :  { %v264_v19 = vld [vmem:[%s4525_s1 + $0x760] sm:$0xff]  ;;  %903 = vmatpush.msra.mxu2 %v200_v18 }
  0x15   :  { %v68_v20 = vld [vmem:[%s4525_s1 + $0x140] sm:$0xff]  ;;  %923 = vmatpush.msra.mxu3 %v264_v19 }
  0x16   :  { %v132_v21 = vld [vmem:[%s4525_s1 + $0x340] sm:$0xff]  ;;  %864 = vmatpush.msra.mxu0 %v68_v20 }
  0x17   :  { %v196_v22 = vld [vmem:[%s4525_s1 + $0x540] sm:$0xff]  ;;  %884 = vmatpush.msra.mxu1 %v132_v21 }
  0x18   :  { %v260_v23 = vld [vmem:[%s4525_s1 + $0x740] sm:$0xff]  ;;  %904 = vmatpush.msra.mxu2 %v196_v22 }
  0x19   :  { %v64_v24 = vld [vmem:[%s4525_s1 + $0x120] sm:$0xff]  ;;  %924 = vmatpush.msra.mxu3 %v260_v23 }
  0x1a   :  { %v128_v25 = vld [vmem:[%s4525_s1 + $0x320] sm:$0xff]  ;;  %865 = vmatpush.msra.mxu0 %v64_v24 }
  0x1b   :  { %v192_v26 = vld [vmem:[%s4525_s1 + $0x520] sm:$0xff]  ;;  %885 = vmatpush.msra.mxu1 %v128_v25 }
  0x1c   :  { %v256_v27 = vld [vmem:[%s4525_s1 + $0x720] sm:$0xff]  ;;  %905 = vmatpush.msra.mxu2 %v192_v26 }
  0x1d   :  { %v60_v28 = vld [vmem:[%s4525_s1 + $0x100] sm:$0xff]  ;;  %925 = vmatpush.msra.mxu3 %v256_v27 }
  0x1e   :  { %v124_v29 = vld [vmem:[%s4525_s1 + $0x300] sm:$0xff]  ;;  %866 = vmatpush.msra.mxu0 %v60_v28 }
  0x1f   :  { %v188_v30 = vld [vmem:[%s4525_s1 + $0x500] sm:$0xff]  ;;  %886 = vmatpush.msra.mxu1 %v124_v29 }
  0x20   :  { %v252_v31 = vld [vmem:[%s4525_s1 + $0x700] sm:$0xff]  ;;  %906 = vmatpush.msra.mxu2 %v188_v30 }
  0x21   :  { %v56_v32 = vld [vmem:[%s4525_s1 + $0xe0] sm:$0xff]  ;;  %926 = vmatpush.msra.mxu3 %v252_v31 }
  0x22   :  { %v120_v33 = vld [vmem:[%s4525_s1 + $0x2e0] sm:$0xff]  ;;  %867 = vmatpush.msra.mxu0 %v56_v32 }
  0x23   :  { %v184_v34 = vld [vmem:[%s4525_s1 + $0x4e0] sm:$0xff]  ;;  %887 = vmatpush.msra.mxu1 %v120_v33 }
  0x24   :  { %v248_v35 = vld [vmem:[%s4525_s1 + $0x6e0] sm:$0xff]  ;;  %907 = vmatpush.msra.mxu2 %v184_v34 }
  0x25   :  { %v52_v36 = vld [vmem:[%s4525_s1 + $0xc0] sm:$0xff]  ;;  %927 = vmatpush.msra.mxu3 %v248_v35 }
  0x26   :  { %v116_v37 = vld [vmem:[%s4525_s1 + $0x2c0] sm:$0xff]  ;;  %868 = vmatpush.msra.mxu0 %v52_v36 }
  0x27   :  { %v180_v38 = vld [vmem:[%s4525_s1 + $0x4c0] sm:$0xff]  ;;  %888 = vmatpush.msra.mxu1 %v116_v37 }
  0x28   :  { %v244_v39 = vld [vmem:[%s4525_s1 + $0x6c0] sm:$0xff]  ;;  %908 = vmatpush.msra.mxu2 %v180_v38 }
  0x29   :  { %v48_v40 = vld [vmem:[%s4525_s1 + $0xa0] sm:$0xff]  ;;  %928 = vmatpush.msra.mxu3 %v244_v39 }
  0x2a   :  { %v112_v41 = vld [vmem:[%s4525_s1 + $0x2a0] sm:$0xff]  ;;  %869 = vmatpush.msra.mxu0 %v48_v40 }
  0x2b   :  { %v176_v42 = vld [vmem:[%s4525_s1 + $0x4a0] sm:$0xff]  ;;  %889 = vmatpush.msra.mxu1 %v112_v41 }
  0x2c   :  { %v240_v43 = vld [vmem:[%s4525_s1 + $0x6a0] sm:$0xff]  ;;  %909 = vmatpush.msra.mxu2 %v176_v42 }
  0x2d   :  { %v44_v44 = vld [vmem:[%s4525_s1 + $0x80] sm:$0xff]  ;;  %929 = vmatpush.msra.mxu3 %v240_v43  ;;  %v26_v43 = vld [vmem:[%s4524_s0 + $0x10] sm:$0xff] }
  0x2e   :  { %v108_v45 = vld [vmem:[%s4525_s1 + $0x280] sm:$0xff]  ;;  %870 = vmatpush.msra.mxu0 %v44_v44  ;;  %v25_v44 = vld [vmem:[%s4524_s0 + $0x8] sm:$0xff] }
  0x2f   :  { %v172_v46 = vld [vmem:[%s4525_s1 + $0x480] sm:$0xff]  ;;  %890 = vmatpush.msra.mxu1 %v108_v45  ;;  %828 = vst [vmem:[#allocation1 + $0x20] ss:$4 sm:$0xff] %v25_v44 }
  0x30   :  { %v236_v47 = vld [vmem:[%s4525_s1 + $0x680] sm:$0xff]  ;;  %910 = vmatpush.msra.mxu2 %v172_v46 }
  0x31   :  { %v40_v48 = vld [vmem:[%s4525_s1 + $0x60] sm:$0xff]  ;;  %930 = vmatpush.msra.mxu3 %v236_v47 }
  0x32   :  { %v104_v49 = vld [vmem:[%s4525_s1 + $0x260] sm:$0xff]  ;;  %871 = vmatpush.msra.mxu0 %v40_v48 }
  0x33   :  { %v168_v50 = vld [vmem:[%s4525_s1 + $0x460] sm:$0xff]  ;;  %891 = vmatpush.msra.mxu1 %v104_v49 }
  0x34   :  { %v232_v51 = vld [vmem:[%s4525_s1 + $0x660] sm:$0xff]  ;;  %911 = vmatpush.msra.mxu2 %v168_v50 }
  0x35   :  { %v36_v52 = vld [vmem:[%s4525_s1 + $0x40] sm:$0xff]  ;;  %931 = vmatpush.msra.mxu3 %v232_v51 }
  0x36   :  { %v100_v53 = vld [vmem:[%s4525_s1 + $0x240] sm:$0xff]  ;;  %872 = vmatpush.msra.mxu0 %v36_v52 }
  0x37   :  { %v164_v54 = vld [vmem:[%s4525_s1 + $0x440] sm:$0xff]  ;;  %892 = vmatpush.msra.mxu1 %v100_v53 }
  0x38   :  { %v228_v55 = vld [vmem:[%s4525_s1 + $0x640] sm:$0xff]  ;;  %912 = vmatpush.msra.mxu2 %v164_v54 }
  0x39   :  { %v32_v56 = vld [vmem:[%s4525_s1 + $0x20] sm:$0xff]  ;;  %932 = vmatpush.msra.mxu3 %v228_v55 }
  0x3a   :  { %v96_v57 = vld [vmem:[%s4525_s1 + $0x220] sm:$0xff]  ;;  %873 = vmatpush.msra.mxu0 %v32_v56 }
  0x3b   :  { %v160_v58 = vld [vmem:[%s4525_s1 + $0x420] sm:$0xff]  ;;  %893 = vmatpush.msra.mxu1 %v96_v57 }
  0x3c   :  { %v224_v59 = vld [vmem:[%s4525_s1 + $0x620] sm:$0xff]  ;;  %913 = vmatpush.msra.mxu2 %v160_v58 }
  0x3d   :  { %v28_v60 = vld [vmem:[%s4525_s1] sm:$0xff]  ;;  %933 = vmatpush.msra.mxu3 %v224_v59 }
  0x3e   :  { %v92_v61 = vld [vmem:[%s4525_s1 + $0x200] sm:$0xff]  ;;  %874 = vmatpush.msra.mxu0 %v28_v60 }
  0x3f   :  { %v156_v62 = vld [vmem:[%s4525_s1 + $0x400] sm:$0xff]  ;;  %894 = vmatpush.msra.mxu1 %v92_v61 }
  0x40   :  { %v220_v63 = vld [vmem:[%s4525_s1 + $0x600] sm:$0xff]  ;;  %914 = vmatpush.msra.mxu2 %v156_v62 }
  0x41   :  { %v344_v0 = vld [vmem:[%s4525_s1 + $0x9e0] sm:$0xff]  ;;  %934 = vmatpush.msra.mxu3 %v220_v63 }
  0x42   :  { %v408_v1 = vld [vmem:[%s4525_s1 + $0xbe0] sm:$0xff]  ;;  %939 = vmatpush.msrb.mxu0 %v344_v0 }
  0x43   :  { %v472_v2 = vld [vmem:[%s4525_s1 + $0xde0] sm:$0xff]  ;;  %959 = vmatpush.msrb.mxu1 %v408_v1 }
  0x44   :  { %v536_v3 = vld [vmem:[%s4525_s1 + $0xfe0] sm:$0xff]  ;;  %979 = vmatpush.msrb.mxu2 %v472_v2 }
  0x45   :  { %v340_v4 = vld [vmem:[%s4525_s1 + $0x9c0] sm:$0xff]  ;;  %999 = vmatpush.msrb.mxu3 %v536_v3 }
  0x46   :  { %v404_v5 = vld [vmem:[%s4525_s1 + $0xbc0] sm:$0xff]  ;;  %940 = vmatpush.msrb.mxu0 %v340_v4  ;;  %v27_v4 = vld [vmem:[%s4524_s0 + $0x18] sm:$0x3] }
  0x47   :  { %v468_v6 = vld [vmem:[%s4525_s1 + $0xdc0] sm:$0xff]  ;;  %960 = vmatpush.msrb.mxu1 %v404_v5  ;;  %v2434_v5 = vld.sshfl [vmem:[#allocation1 + $0x30] sm:$0xff pattern:$0x73625140] }
  0x48   :  { %v532_v7 = vld [vmem:[%s4525_s1 + $0xfc0] sm:$0xff]  ;;  %980 = vmatpush.msrb.mxu2 %v468_v6 }
  0x49   :  { %v336_v8 = vld [vmem:[%s4525_s1 + $0x9a0] sm:$0xff]  ;;  %1000 = vmatpush.msrb.mxu3 %v532_v7  ;;  %v2438_v7 = vld.sshfl [vmem:[#allocation1 + $0x38] sm:$0xff pattern:$0x73625140] }
  0x4a   :  { %v400_v9 = vld [vmem:[%s4525_s1 + $0xba0] sm:$0xff]  ;;  %941 = vmatpush.msrb.mxu0 %v336_v8  ;;  %v2440_v8 = vld.sshfl [vmem:[#allocation1 + $0x28] sm:$0xff pattern:$0x73625140] }
  0x4b   :  { %v464_v10 = vld [vmem:[%s4525_s1 + $0xda0] sm:$0xff]  ;;  %961 = vmatpush.msrb.mxu1 %v400_v9 }
  0x4c   :  { %v528_v11 = vld [vmem:[%s4525_s1 + $0xfa0] sm:$0xff]  ;;  %981 = vmatpush.msrb.mxu2 %v464_v10 }
  0x4d   :  { %v332_v12 = vld [vmem:[%s4525_s1 + $0x980] sm:$0xff]  ;;  %1001 = vmatpush.msrb.mxu3 %v528_v11 }
  0x4e   :  { %v396_v13 = vld [vmem:[%s4525_s1 + $0xb80] sm:$0xff]  ;;  %942 = vmatpush.msrb.mxu0 %v332_v12 }
  0x4f   :  { %v460_v14 = vld [vmem:[%s4525_s1 + $0xd80] sm:$0xff]  ;;  %962 = vmatpush.msrb.mxu1 %v396_v13 }
  0x50   :  { %v524_v15 = vld [vmem:[%s4525_s1 + $0xf80] sm:$0xff]  ;;  %982 = vmatpush.msrb.mxu2 %v460_v14 }
  0x51   :  { %v328_v16 = vld [vmem:[%s4525_s1 + $0x960] sm:$0xff]  ;;  %1002 = vmatpush.msrb.mxu3 %v524_v15 }
  0x52   :  { %v392_v17 = vld [vmem:[%s4525_s1 + $0xb60] sm:$0xff]  ;;  %943 = vmatpush.msrb.mxu0 %v328_v16 }
  0x53   :  { %v456_v18 = vld [vmem:[%s4525_s1 + $0xd60] sm:$0xff]  ;;  %963 = vmatpush.msrb.mxu1 %v392_v17 }
  0x54   :  { %v520_v19 = vld [vmem:[%s4525_s1 + $0xf60] sm:$0xff]  ;;  %983 = vmatpush.msrb.mxu2 %v456_v18 }
  0x55   :  { %v324_v20 = vld [vmem:[%s4525_s1 + $0x940] sm:$0xff]  ;;  %1003 = vmatpush.msrb.mxu3 %v520_v19 }
  0x56   :  { %v388_v21 = vld [vmem:[%s4525_s1 + $0xb40] sm:$0xff]  ;;  %944 = vmatpush.msrb.mxu0 %v324_v20 }
  0x57   :  { %v452_v22 = vld [vmem:[%s4525_s1 + $0xd40] sm:$0xff]  ;;  %964 = vmatpush.msrb.mxu1 %v388_v21 }
  0x58   :  { %v516_v23 = vld [vmem:[%s4525_s1 + $0xf40] sm:$0xff]  ;;  %984 = vmatpush.msrb.mxu2 %v452_v22 }
  0x59   :  { %v24_v24 = vld [vmem:[%s4524_s0] sm:$0xff]  ;;  %1004 = vmatpush.msrb.mxu3 %v516_v23 }
  0x5a   :  { %v320_v25 = vld [vmem:[%s4525_s1 + $0x920] sm:$0xff]  ;;  %826 = vst [vmem:[#allocation1] ss:$4 sm:$0xff] %v24_v24 }
  0x5b   :  { %v384_v26 = vld [vmem:[%s4525_s1 + $0xb20] sm:$0xff]  ;;  %945 = vmatpush.msrb.mxu0 %v320_v25 }
  0x5c   :  { %v448_v27 = vld [vmem:[%s4525_s1 + $0xd20] sm:$0xff]  ;;  %965 = vmatpush.msrb.mxu1 %v384_v26 }
  0x5d   :  { %v512_v28 = vld [vmem:[%s4525_s1 + $0xf20] sm:$0xff]  ;;  %985 = vmatpush.msrb.mxu2 %v448_v27 }
  0x5e   :  { %v316_v29 = vld [vmem:[%s4525_s1 + $0x900] sm:$0xff]  ;;  %1005 = vmatpush.msrb.mxu3 %v512_v28 }
  0x5f   :  { %v380_v30 = vld [vmem:[%s4525_s1 + $0xb00] sm:$0xff]  ;;  %946 = vmatpush.msrb.mxu0 %v316_v29 }
  0x60   :  { %v444_v31 = vld [vmem:[%s4525_s1 + $0xd00] sm:$0xff]  ;;  %966 = vmatpush.msrb.mxu1 %v380_v30 }
  0x61   :  { %v508_v32 = vld [vmem:[%s4525_s1 + $0xf00] sm:$0xff]  ;;  %986 = vmatpush.msrb.mxu2 %v444_v31  ;;  %v2366_v45 = vld.sshfl [vmem:[#allocation1 + $0x10] sm:$0xff pattern:$0x73625140] }
  0x62   :  { %v312_v33 = vld [vmem:[%s4525_s1 + $0x8e0] sm:$0xff]  ;;  %1006 = vmatpush.msrb.mxu3 %v508_v32  ;;  %v2370_v47 = vld.sshfl [vmem:[#allocation1 + $0x8] sm:$0xff pattern:$0x73625140]  ;;  %915 = vmatmul.f32.vlgmr.msra.gmra.mxu2 %v2366_v45 }
  0x63   :  { %v376_v34 = vld [vmem:[%s4525_s1 + $0xae0] sm:$0xff]  ;;  %947 = vmatpush.msrb.mxu0 %v312_v33  ;;  %v2372_v48 = vld.sshfl [vmem:[#allocation1 + $0x18] sm:$0xff pattern:$0x73625140]  ;;  %895 = vmatmul.f32.vlgmr.msra.gmra.mxu1 %v2370_v47 }
  0x64   :  { %v440_v35 = vld [vmem:[%s4525_s1 + $0xce0] sm:$0xff]  ;;  %967 = vmatpush.msrb.mxu1 %v376_v34  ;;  %935 = vmatmul.f32.vlgmr.msra.gmra.mxu3 %v2372_v48 }
  0x65   :  { %v504_v36 = vld [vmem:[%s4525_s1 + $0xee0] sm:$0xff]  ;;  %987 = vmatpush.msrb.mxu2 %v440_v35 }
  0x66   :  { %v308_v37 = vld [vmem:[%s4525_s1 + $0x8c0] sm:$0xff]  ;;  %1007 = vmatpush.msrb.mxu3 %v504_v36 }
  0x67   :  { %v372_v38 = vld [vmem:[%s4525_s1 + $0xac0] sm:$0xff]  ;;  %948 = vmatpush.msrb.mxu0 %v308_v37 }
  0x68   :  { %v436_v39 = vld [vmem:[%s4525_s1 + $0xcc0] sm:$0xff]  ;;  %968 = vmatpush.msrb.mxu1 %v372_v38 }
  0x69   :  { %v500_v40 = vld [vmem:[%s4525_s1 + $0xec0] sm:$0xff]  ;;  %988 = vmatpush.msrb.mxu2 %v436_v39 }
  0x6a   :  { %v304_v41 = vld [vmem:[%s4525_s1 + $0x8a0] sm:$0xff]  ;;  %1008 = vmatpush.msrb.mxu3 %v500_v40 }
  0x6b   :  { %v368_v42 = vld [vmem:[%s4525_s1 + $0xaa0] sm:$0xff]  ;;  %949 = vmatpush.msrb.mxu0 %v304_v41 }
  0x6c   :  { %v2368_v46 = vld.sshfl [vmem:[#allocation1] sm:$0xff pattern:$0x73625140]  ;;  %969 = vmatpush.msrb.mxu1 %v368_v42 }
  0x6d   :  { %v432_v49 = vld [vmem:[%s4525_s1 + $0xca0] sm:$0xff]  ;;  %837 = vst [vmem:[#allocation1] ss:$4 sm:$0xff] %v26_v43  ;;  %875 = vmatmul.f32.vlgmr.msra.gmra.mxu0 %v2368_v46 }
  0x6e   :  { %v496_v50 = vld [vmem:[%s4525_s1 + $0xea0] sm:$0xff]  ;;  %989 = vmatpush.msrb.mxu2 %v432_v49 }
  0x6f   :  { %v300_v51 = vld [vmem:[%s4525_s1 + $0x880] sm:$0xff]  ;;  %1009 = vmatpush.msrb.mxu3 %v496_v50 }
  0x70   :  { %v364_v52 = vld [vmem:[%s4525_s1 + $0xa80] sm:$0xff]  ;;  %950 = vmatpush.msrb.mxu0 %v300_v51 }
  0x71   :  { %v428_v53 = vld [vmem:[%s4525_s1 + $0xc80] sm:$0xff]  ;;  %970 = vmatpush.msrb.mxu1 %v364_v52 }
  0x72   :  { %v492_v54 = vld [vmem:[%s4525_s1 + $0xe80] sm:$0xff]  ;;  %990 = vmatpush.msrb.mxu2 %v428_v53 }
  0x73   :  { %v296_v55 = vld [vmem:[%s4525_s1 + $0x860] sm:$0xff]  ;;  %1010 = vmatpush.msrb.mxu3 %v492_v54 }
  0x74   :  { %v360_v56 = vld [vmem:[%s4525_s1 + $0xa60] sm:$0xff]  ;;  %951 = vmatpush.msrb.mxu0 %v296_v55 }
  0x75   :  { %v424_v57 = vld [vmem:[%s4525_s1 + $0xc60] sm:$0xff]  ;;  %971 = vmatpush.msrb.mxu1 %v360_v56 }
  0x76   :  { %v488_v58 = vld [vmem:[%s4525_s1 + $0xe60] sm:$0xff]  ;;  %991 = vmatpush.msrb.mxu2 %v424_v57 }
  0x77   :  { %v292_v59 = vld [vmem:[%s4525_s1 + $0x840] sm:$0xff]  ;;  %1011 = vmatpush.msrb.mxu3 %v488_v58 }
  0x78   :  { %v356_v60 = vld [vmem:[%s4525_s1 + $0xa40] sm:$0xff]  ;;  %952 = vmatpush.msrb.mxu0 %v292_v59 }
  0x79   :  { %v420_v61 = vld [vmem:[%s4525_s1 + $0xc40] sm:$0xff]  ;;  %972 = vmatpush.msrb.mxu1 %v356_v60 }
  0x7a   :  { %v484_v62 = vld [vmem:[%s4525_s1 + $0xe40] sm:$0xff]  ;;  %992 = vmatpush.msrb.mxu2 %v420_v61 }
  0x7b   :  { %v288_v63 = vld [vmem:[%s4525_s1 + $0x820] sm:$0xff]  ;;  %1012 = vmatpush.msrb.mxu3 %v484_v62 }
  0x7c   :  { %v352_v0 = vld [vmem:[%s4525_s1 + $0xa20] sm:$0xff]  ;;  %953 = vmatpush.msrb.mxu0 %v288_v63 }
  0x7d   :  { %v416_v1 = vld [vmem:[%s4525_s1 + $0xc20] sm:$0xff]  ;;  %973 = vmatpush.msrb.mxu1 %v352_v0 }
  0x7e   :  { %v480_v2 = vld [vmem:[%s4525_s1 + $0xe20] sm:$0xff]  ;;  %993 = vmatpush.msrb.mxu2 %v416_v1 }
  0x7f   :  { %v284_v3 = vld [vmem:[%s4525_s1 + $0x800] sm:$0xff]  ;;  %1013 = vmatpush.msrb.mxu3 %v480_v2 }
  0x80   :  { %v2436_v6 = vld.sshfl [vmem:[#allocation1 + $0x20] sm:$0xff pattern:$0x73625140]  ;;  %954 = vmatpush.msrb.mxu0 %v284_v3 }
  0x81   :  { %v348_v9 = vld [vmem:[%s4525_s1 + $0xa00] sm:$0xff]  ;;  %838 = vst [vmem:[#allocation1 + $0x20] ss:$4 sm:$0xff] %v27_v4 }
  0x82   :  { %v412_v10 = vld [vmem:[%s4525_s1 + $0xc00] sm:$0xff]  ;;  %974 = vmatpush.msrb.mxu1 %v348_v9 }
  0x83   :  { %v476_v11 = vld [vmem:[%s4525_s1 + $0xe00] sm:$0xff]  ;;  %994 = vmatpush.msrb.mxu2 %v412_v10 }
  0x84   :  { %v600_v12 = vld [vmem:[%s4525_s1 + $0x11e0] sm:$0xff]  ;;  %1014 = vmatpush.msrb.mxu3 %v476_v11 }
  0x85   :  { %v664_v13 = vld [vmem:[%s4525_s1 + $0x13e0] sm:$0xff]  ;;  %1019 = vmatpush.msra.mxu0 %v600_v12 }
  0x86   :  { %v728_v14 = vld [vmem:[%s4525_s1 + $0x15e0] sm:$0xff]  ;;  %1039 = vmatpush.msra.mxu1 %v664_v13 }
  0x87   :  { %v792_v15 = vld [vmem:[%s4525_s1 + $0x17e0] sm:$0xff]  ;;  %1059 = vmatpush.msra.mxu2 %v728_v14 }
  0x88   :  { %v596_v16 = vld [vmem:[%s4525_s1 + $0x11c0] sm:$0xff]  ;;  %1079 = vmatpush.msra.mxu3 %v792_v15 }
  0x89   :  { %v660_v17 = vld [vmem:[%s4525_s1 + $0x13c0] sm:$0xff]  ;;  %1020 = vmatpush.msra.mxu0 %v596_v16 }
  0x8a   :  { %v724_v18 = vld [vmem:[%s4525_s1 + $0x15c0] sm:$0xff]  ;;  %1040 = vmatpush.msra.mxu1 %v660_v17 }
  0x8b   :  { %v788_v19 = vld [vmem:[%s4525_s1 + $0x17c0] sm:$0xff]  ;;  %1060 = vmatpush.msra.mxu2 %v724_v18 }
  0x8c   :  { %v592_v20 = vld [vmem:[%s4525_s1 + $0x11a0] sm:$0xff]  ;;  %1080 = vmatpush.msra.mxu3 %v788_v19 }
  0x8d   :  { %v656_v21 = vld [vmem:[%s4525_s1 + $0x13a0] sm:$0xff]  ;;  %1021 = vmatpush.msra.mxu0 %v592_v20 }
  0x8e   :  { %v720_v22 = vld [vmem:[%s4525_s1 + $0x15a0] sm:$0xff]  ;;  %1041 = vmatpush.msra.mxu1 %v656_v21 }
  0x8f   :  { %v784_v23 = vld [vmem:[%s4525_s1 + $0x17a0] sm:$0xff] }
  0x90   :  { %v588_v24 = vld [vmem:[%s4525_s1 + $0x1180] sm:$0xff] }
  0x91   :  { %v652_v25 = vld [vmem:[%s4525_s1 + $0x1380] sm:$0xff] }
  0x92   :  { %v716_v26 = vld [vmem:[%s4525_s1 + $0x1580] sm:$0xff] }
  0x93   :  { %v780_v27 = vld [vmem:[%s4525_s1 + $0x1780] sm:$0xff] }
  0x94   :  { %13 = vsyncpa [#allocation4], 0  ;;  %1061 = vmatpush.msra.mxu2 %v720_v22  ;;  %1081 = vmatpush.msra.mxu3 %v784_v23  ;;  %v584_v28 = vld [vmem:[%s4525_s1 + $0x1160] sm:$0xff]  ;;  %v2653_v21 = vld.sshfl [vmem:[#allocation1 + $0x10] sm:$0xff pattern:$0x73625140] }
  0x95   :  { %1022 = vmatpush.msra.mxu0 %v588_v24  ;;  %1042 = vmatpush.msra.mxu1 %v652_v25  ;;  %v648_v29 = vld [vmem:[%s4525_s1 + $0x1360] sm:$0xff]  ;;  %v89_v22 = vld [vmem:[%s4525_s1 + $0x1e8] sm:$0xff]  ;;  %vm856_vm0 = vcmask 261120   ;;  %vm1910_vm1 = vcmask 1041408   ;;  %vm1912_vm2 = vcmask 1045508   ;;  %s1953_s15 = sshll.u32 %s4529_s5, 4  ;;  %s1954_s15 = int_to_ptr.hbm [resolvable:$true] %s1953_s15 }
  0x96   :  { %v712_v30 = vld [vmem:[%s4525_s1 + $0x1560] sm:$0xff]  ;;  %1062 = vmatpush.msra.mxu2 %v716_v26  ;;  %1082 = vmatpush.msra.mxu3 %v780_v27  ;;  %v153_v23 = vld [vmem:[%s4525_s1 + $0x3e8] sm:$0xff]  ;;  %v2671_v27 = vld.sshfl [vmem:[#allocation1 + $0x18] sm:$0xff pattern:$0x73625140]  ;;  %vm1914_vm3 = vcmask 1043456  }
  0x97   :  { %v776_v31 = vld [vmem:[%s4525_s1 + $0x1760] sm:$0xff]  ;;  %995 = vmatmul.f32.vlgmr.msrb.gmra.mxu2 %v2434_v5  ;;  %1023 = vmatpush.msra.mxu0 %v584_v28  ;;  %v217_v24 = vld [vmem:[%s4525_s1 + $0x5e8] sm:$0xff]  ;;  %vm1944_vm4 = vcmask 1024  }
  0x98   :  { %v580_v32 = vld [vmem:[%s4525_s1 + $0x1140] sm:$0xff]  ;;  %1043 = vmatpush.msra.mxu1 %v648_v29  ;;  %1063 = vmatpush.msra.mxu2 %v712_v30  ;;  %v2669_v26 = vld.sshfl [vmem:[#allocation1 + $0x8] sm:$0xff pattern:$0x73625140] }
  0x99   :  { %v644_v33 = vld [vmem:[%s4525_s1 + $0x1340] sm:$0xff]  ;;  %1083 = vmatpush.msra.mxu3 %v776_v31  ;;  %955 = vmatmul.f32.vlgmr.msrb.gmra.mxu0 %v2436_v6  ;;  %v85_v28 = vld [vmem:[%s4525_s1 + $0x1c8] sm:$0xff] }
  0x9a   :  { %v708_v34 = vld [vmem:[%s4525_s1 + $0x1540] sm:$0xff]  ;;  %1015 = vmatmul.f32.vlgmr.msrb.gmra.mxu3 %v2438_v7  ;;  %1024 = vmatpush.msra.mxu0 %v580_v32  ;;  %v149_v29 = vld [vmem:[%s4525_s1 + $0x3c8] sm:$0xff] }
  0x9b   :  { %v772_v35 = vld [vmem:[%s4525_s1 + $0x1740] sm:$0xff]  ;;  %1044 = vmatpush.msra.mxu1 %v644_v33  ;;  %1064 = vmatpush.msra.mxu2 %v708_v34  ;;  %v213_v30 = vld [vmem:[%s4525_s1 + $0x5c8] sm:$0xff] }
  0x9c   :  { %v576_v36 = vld [vmem:[%s4525_s1 + $0x1120] sm:$0xff]  ;;  %1084 = vmatpush.msra.mxu3 %v772_v35  ;;  %975 = vmatmul.f32.vlgmr.msrb.gmra.mxu1 %v2440_v8  ;;  %v81_v32 = vld [vmem:[%s4525_s1 + $0x1a8] sm:$0xff] }
  0x9d   :  { %v640_v37 = vld [vmem:[%s4525_s1 + $0x1320] sm:$0xff]  ;;  %1025 = vmatpush.msra.mxu0 %v576_v36  ;;  %v145_v33 = vld [vmem:[%s4525_s1 + $0x3a8] sm:$0xff] }
  0x9e   :  { %v704_v38 = vld [vmem:[%s4525_s1 + $0x1520] sm:$0xff]  ;;  %1045 = vmatpush.msra.mxu1 %v640_v37  ;;  %v209_v34 = vld [vmem:[%s4525_s1 + $0x5a8] sm:$0xff] }
  0x9f   :  { %v768_v39 = vld [vmem:[%s4525_s1 + $0x1720] sm:$0xff]  ;;  %1065 = vmatpush.msra.mxu2 %v704_v38  ;;  %v77_v36 = vld [vmem:[%s4525_s1 + $0x188] sm:$0xff] }
  0xa0   :  { %v572_v40 = vld [vmem:[%s4525_s1 + $0x1100] sm:$0xff]  ;;  %1085 = vmatpush.msra.mxu3 %v768_v39  ;;  %v141_v37 = vld [vmem:[%s4525_s1 + $0x388] sm:$0xff] }
  0xa1   :  { %v636_v41 = vld [vmem:[%s4525_s1 + $0x1300] sm:$0xff]  ;;  %1026 = vmatpush.msra.mxu0 %v572_v40  ;;  %v205_v38 = vld [vmem:[%s4525_s1 + $0x588] sm:$0xff] }
  0xa2   :  { %v700_v42 = vld [vmem:[%s4525_s1 + $0x1500] sm:$0xff]  ;;  %1046 = vmatpush.msra.mxu1 %v636_v41  ;;  %v73_v40 = vld [vmem:[%s4525_s1 + $0x168] sm:$0xff] }
  0xa3   :  { %v764_v43 = vld [vmem:[%s4525_s1 + $0x1700] sm:$0xff]  ;;  %1066 = vmatpush.msra.mxu2 %v700_v42  ;;  %v137_v41 = vld [vmem:[%s4525_s1 + $0x368] sm:$0xff] }
  0xa4   :  { %v568_v44 = vld [vmem:[%s4525_s1 + $0x10e0] sm:$0xff]  ;;  %1086 = vmatpush.msra.mxu3 %v764_v43  ;;  %v201_v42 = vld [vmem:[%s4525_s1 + $0x568] sm:$0xff] }
  0xa5   :  { %v632_v49 = vld [vmem:[%s4525_s1 + $0x12e0] sm:$0xff]  ;;  %1027 = vmatpush.msra.mxu0 %v568_v44  ;;  %v281_v43 = vld [vmem:[%s4525_s1 + $0x7e8] sm:$0xff] }
  0xa6   :  { %v696_v50 = vld [vmem:[%s4525_s1 + $0x14e0] sm:$0xff]  ;;  %1047 = vmatpush.msra.mxu1 %v632_v49  ;;  %v69_v49 = vld [vmem:[%s4525_s1 + $0x148] sm:$0xff] }
  0xa7   :  { %v760_v51 = vld [vmem:[%s4525_s1 + $0x16e0] sm:$0xff]  ;;  %1067 = vmatpush.msra.mxu2 %v696_v50  ;;  %v133_v50 = vld [vmem:[%s4525_s1 + $0x348] sm:$0xff] }
  0xa8   :  { %v564_v52 = vld [vmem:[%s4525_s1 + $0x10c0] sm:$0xff]  ;;  %1087 = vmatpush.msra.mxu3 %v760_v51  ;;  %v197_v51 = vld [vmem:[%s4525_s1 + $0x548] sm:$0xff] }
  0xa9   :  { %v628_v53 = vld [vmem:[%s4525_s1 + $0x12c0] sm:$0xff]  ;;  %1028 = vmatpush.msra.mxu0 %v564_v52  ;;  %v277_v52 = vld [vmem:[%s4525_s1 + $0x7c8] sm:$0xff] }
  0xaa   :  { %v692_v54 = vld [vmem:[%s4525_s1 + $0x14c0] sm:$0xff]  ;;  %1048 = vmatpush.msra.mxu1 %v628_v53  ;;  %v65_v53 = vld [vmem:[%s4525_s1 + $0x128] sm:$0xff] }
  0xab   :  { %v756_v55 = vld [vmem:[%s4525_s1 + $0x16c0] sm:$0xff]  ;;  %1068 = vmatpush.msra.mxu2 %v692_v54  ;;  %v129_v54 = vld [vmem:[%s4525_s1 + $0x328] sm:$0xff] }
  0xac   :  { %v560_v56 = vld [vmem:[%s4525_s1 + $0x10a0] sm:$0xff]  ;;  %1088 = vmatpush.msra.mxu3 %v756_v55  ;;  %v193_v55 = vld [vmem:[%s4525_s1 + $0x528] sm:$0xff] }
  0xad   :  { %v624_v57 = vld [vmem:[%s4525_s1 + $0x12a0] sm:$0xff]  ;;  %1029 = vmatpush.msra.mxu0 %v560_v56  ;;  %v273_v56 = vld [vmem:[%s4525_s1 + $0x7a8] sm:$0xff] }
  0xae   :  { %v688_v58 = vld [vmem:[%s4525_s1 + $0x14a0] sm:$0xff]  ;;  %1049 = vmatpush.msra.mxu1 %v624_v57  ;;  %v61_v57 = vld [vmem:[%s4525_s1 + $0x108] sm:$0xff] }
  0xaf   :  { %v752_v59 = vld [vmem:[%s4525_s1 + $0x16a0] sm:$0xff]  ;;  %1069 = vmatpush.msra.mxu2 %v688_v58  ;;  %v125_v58 = vld [vmem:[%s4525_s1 + $0x308] sm:$0xff] }
  0xb0   :  { %v556_v60 = vld [vmem:[%s4525_s1 + $0x1080] sm:$0xff]  ;;  %1089 = vmatpush.msra.mxu3 %v752_v59  ;;  %v189_v59 = vld [vmem:[%s4525_s1 + $0x508] sm:$0xff] }
  0xb1   :  { %v620_v61 = vld [vmem:[%s4525_s1 + $0x1280] sm:$0xff]  ;;  %1030 = vmatpush.msra.mxu0 %v556_v60  ;;  %v269_v60 = vld [vmem:[%s4525_s1 + $0x788] sm:$0xff] }
  0xb2   :  { %v684_v62 = vld [vmem:[%s4525_s1 + $0x1480] sm:$0xff]  ;;  %1050 = vmatpush.msra.mxu1 %v620_v61  ;;  %v57_v61 = vld [vmem:[%s4525_s1 + $0xe8] sm:$0xff] }
  0xb3   :  { %v748_v63 = vld [vmem:[%s4525_s1 + $0x1680] sm:$0xff]  ;;  %1070 = vmatpush.msra.mxu2 %v684_v62  ;;  %v121_v62 = vld [vmem:[%s4525_s1 + $0x2e8] sm:$0xff] }
  0xb4   :  { %v552_v0 = vld [vmem:[%s4525_s1 + $0x1060] sm:$0xff]  ;;  %1090 = vmatpush.msra.mxu3 %v748_v63  ;;  %v185_v63 = vld [vmem:[%s4525_s1 + $0x4e8] sm:$0xff] }
  0xb5   :  { %v616_v1 = vld [vmem:[%s4525_s1 + $0x1260] sm:$0xff]  ;;  %1031 = vmatpush.msra.mxu0 %v552_v0  ;;  %v265_v0 = vld [vmem:[%s4525_s1 + $0x768] sm:$0xff] }
  0xb6   :  { %v680_v2 = vld [vmem:[%s4525_s1 + $0x1460] sm:$0xff]  ;;  %1051 = vmatpush.msra.mxu1 %v616_v1  ;;  %v53_v1 = vld [vmem:[%s4525_s1 + $0xc8] sm:$0xff] }
  0xb7   :  { %v744_v3 = vld [vmem:[%s4525_s1 + $0x1660] sm:$0xff]  ;;  %1071 = vmatpush.msra.mxu2 %v680_v2  ;;  %v117_v2 = vld [vmem:[%s4525_s1 + $0x2c8] sm:$0xff] }
  0xb8   :  { %v548_v4 = vld [vmem:[%s4525_s1 + $0x1040] sm:$0xff]  ;;  %1091 = vmatpush.msra.mxu3 %v744_v3  ;;  %v181_v3 = vld [vmem:[%s4525_s1 + $0x4c8] sm:$0xff] }
  0xb9   :  { %v612_v9 = vld [vmem:[%s4525_s1 + $0x1240] sm:$0xff]  ;;  %1032 = vmatpush.msra.mxu0 %v548_v4  ;;  %v261_v4 = vld [vmem:[%s4525_s1 + $0x748] sm:$0xff] }
  0xba   :  { %v676_v10 = vld [vmem:[%s4525_s1 + $0x1440] sm:$0xff]  ;;  %1052 = vmatpush.msra.mxu1 %v612_v9  ;;  %v49_v9 = vld [vmem:[%s4525_s1 + $0xa8] sm:$0xff] }
  0xbb   :  { %v740_v11 = vld [vmem:[%s4525_s1 + $0x1640] sm:$0xff]  ;;  %1072 = vmatpush.msra.mxu2 %v676_v10  ;;  %v113_v10 = vld [vmem:[%s4525_s1 + $0x2a8] sm:$0xff] }
  0xbc   :  { %v544_v12 = vld [vmem:[%s4525_s1 + $0x1020] sm:$0xff]  ;;  %1092 = vmatpush.msra.mxu3 %v740_v11  ;;  %v177_v11 = vld [vmem:[%s4525_s1 + $0x4a8] sm:$0xff] }
  0xbd   :  { %v608_v13 = vld [vmem:[%s4525_s1 + $0x1220] sm:$0xff]  ;;  %1033 = vmatpush.msra.mxu0 %v544_v12  ;;  %v257_v12 = vld [vmem:[%s4525_s1 + $0x728] sm:$0xff] }
  0xbe   :  { %v672_v14 = vld [vmem:[%s4525_s1 + $0x1420] sm:$0xff]  ;;  %1053 = vmatpush.msra.mxu1 %v608_v13  ;;  %v45_v13 = vld [vmem:[%s4525_s1 + $0x88] sm:$0xff] }
  0xbf   :  { %v736_v15 = vld [vmem:[%s4525_s1 + $0x1620] sm:$0xff]  ;;  %1073 = vmatpush.msra.mxu2 %v672_v14  ;;  %v109_v14 = vld [vmem:[%s4525_s1 + $0x288] sm:$0xff] }
  0xc0   :  { %v540_v16 = vld [vmem:[%s4525_s1 + $0x1000] sm:$0xff]  ;;  %1093 = vmatpush.msra.mxu3 %v736_v15  ;;  %v173_v15 = vld [vmem:[%s4525_s1 + $0x488] sm:$0xff] }
  0xc1   :  { %v604_v17 = vld [vmem:[%s4525_s1 + $0x1200] sm:$0xff]  ;;  %1034 = vmatpush.msra.mxu0 %v540_v16  ;;  %v253_v16 = vld [vmem:[%s4525_s1 + $0x708] sm:$0xff] }
  0xc2   :  { %v668_v18 = vld [vmem:[%s4525_s1 + $0x1400] sm:$0xff]  ;;  %1054 = vmatpush.msra.mxu1 %v604_v17  ;;  %v41_v17 = vld [vmem:[%s4525_s1 + $0x68] sm:$0xff] }
  0xc3   :  { %v732_v19 = vld [vmem:[%s4525_s1 + $0x1600] sm:$0xff]  ;;  %1074 = vmatpush.msra.mxu2 %v668_v18  ;;  %1055 = vmatmul.f32.vlgmr.msra.gmra.mxu1 %v2669_v26  ;;  %v105_v18 = vld [vmem:[%s4525_s1 + $0x268] sm:$0xff] }
  0xc4   :  { %v2651_v20 = vld.sshfl [vmem:[#allocation1] sm:$0xff pattern:$0x73625140]  ;;  %1094 = vmatpush.msra.mxu3 %v732_v19  ;;  %1075 = vmatmul.f32.vlgmr.msra.gmra.mxu2 %v2653_v21  ;;  %v169_v19 = vld [vmem:[%s4525_s1 + $0x468] sm:$0xff] }
  0xc5   :  { %v808_v25 = vld [vmem:[%s4525_s1 + $0x1860] sm:$0xff]  ;;  %1035 = vmatmul.f32.vlgmr.msra.gmra.mxu0 %v2651_v20  ;;  %1119 = vmatpush.msrb.mxu1 %v89_v22  ;;  %v249_v22 = vld [vmem:[%s4525_s1 + $0x6e8] sm:$0xff] }
  0xc6   :  { %1139 = vmatpush.msrb.mxu2 %v153_v23  ;;  %1159 = vmatpush.msrb.mxu3 %v217_v24  ;;  %v804_v31 = vld [vmem:[%s4525_s1 + $0x1840] sm:$0xff]  ;;  %v37_v23 = vld [vmem:[%s4525_s1 + $0x48] sm:$0xff] }
  0xc7   :  { %1111 = vmatpush.msrb.mxu0 %v808_v25  ;;  %1095 = vmatmul.f32.vlgmr.msra.gmra.mxu3 %v2671_v27  ;;  %v800_v35 = vld [vmem:[%s4525_s1 + $0x1820] sm:$0xff]  ;;  %v101_v24 = vld [vmem:[%s4525_s1 + $0x248] sm:$0xff] }
  0xc8   :  { %1120 = vmatpush.msrb.mxu1 %v85_v28  ;;  %1140 = vmatpush.msrb.mxu2 %v149_v29  ;;  %v796_v39 = vld [vmem:[%s4525_s1 + $0x1800] sm:$0xff]  ;;  %v165_v25 = vld [vmem:[%s4525_s1 + $0x448] sm:$0xff] }
  0xc9   :  { %1160 = vmatpush.msrb.mxu3 %v213_v30  ;;  %1112 = vmatpush.msrb.mxu0 %v804_v31  ;;  %v2723_v44 = vld.sshfl [vmem:[#allocation1 + $0x20] sm:$0xff pattern:$0x73625140]  ;;  %v245_v28 = vld [vmem:[%s4525_s1 + $0x6c8] sm:$0xff] }
  0xca   :  { %1121 = vmatpush.msrb.mxu1 %v81_v32  ;;  %1141 = vmatpush.msrb.mxu2 %v145_v33  ;;  %v33_v29 = vld [vmem:[%s4525_s1 + $0x28] sm:$0xff] }
  0xcb   :  { %1161 = vmatpush.msrb.mxu3 %v209_v34  ;;  %1113 = vmatpush.msrb.mxu0 %v800_v35  ;;  %v97_v30 = vld [vmem:[%s4525_s1 + $0x228] sm:$0xff] }
  0xcc   :  { %1122 = vmatpush.msrb.mxu1 %v77_v36  ;;  %1142 = vmatpush.msrb.mxu2 %v141_v37  ;;  %v161_v31 = vld [vmem:[%s4525_s1 + $0x428] sm:$0xff] }
  0xcd   :  { %1162 = vmatpush.msrb.mxu3 %v205_v38  ;;  %1114 = vmatpush.msrb.mxu0 %v796_v39  ;;  %v241_v32 = vld [vmem:[%s4525_s1 + $0x6a8] sm:$0xff] }
  0xce   :  { %1123 = vmatpush.msrb.mxu1 %v73_v40  ;;  %1143 = vmatpush.msrb.mxu2 %v137_v41  ;;  %v29_v33 = vld [vmem:[%s4525_s1 + $0x8] sm:$0xff] }
  0xcf   :  { %1163 = vmatpush.msrb.mxu3 %v201_v42  ;;  %1179 = vmatpush.msra.mxu0 %v281_v43  ;;  %v93_v34 = vld [vmem:[%s4525_s1 + $0x208] sm:$0xff] }
  0xd0   :  { %1966 = vmatmul.msk.f32.vlgmr.msrb.gmra.mxu0 %vm856_vm0, %v2723_v44  ;;  %1124 = vmatpush.msrb.mxu1 %v69_v49  ;;  %v157_v35 = vld [vmem:[%s4525_s1 + $0x408] sm:$0xff] }
  0xd1   :  { %1144 = vmatpush.msrb.mxu2 %v133_v50  ;;  %1164 = vmatpush.msrb.mxu3 %v197_v51  ;;  %v237_v36 = vld [vmem:[%s4525_s1 + $0x688] sm:$0xff] }
  0xd2   :  { %1180 = vmatpush.msra.mxu0 %v277_v52  ;;  %1125 = vmatpush.msrb.mxu1 %v65_v53  ;;  %v345_v37 = vld [vmem:[%s4525_s1 + $0x9e8] sm:$0xff] }
  0xd3   :  { %1145 = vmatpush.msrb.mxu2 %v129_v54  ;;  %1165 = vmatpush.msrb.mxu3 %v193_v55  ;;  %v409_v38 = vld [vmem:[%s4525_s1 + $0xbe8] sm:$0xff] }
  0xd4   :  { %1181 = vmatpush.msra.mxu0 %v273_v56  ;;  %1126 = vmatpush.msrb.mxu1 %v61_v57  ;;  %v473_v39 = vld [vmem:[%s4525_s1 + $0xde8] sm:$0xff] }
  0xd5   :  { %1146 = vmatpush.msrb.mxu2 %v125_v58  ;;  %1166 = vmatpush.msrb.mxu3 %v189_v59  ;;  %v233_v40 = vld [vmem:[%s4525_s1 + $0x668] sm:$0xff] }
  0xd6   :  { %1182 = vmatpush.msra.mxu0 %v269_v60  ;;  %1127 = vmatpush.msrb.mxu1 %v57_v61  ;;  %v341_v41 = vld [vmem:[%s4525_s1 + $0x9c8] sm:$0xff] }
  0xd7   :  { %1147 = vmatpush.msrb.mxu2 %v121_v62  ;;  %1167 = vmatpush.msrb.mxu3 %v185_v63  ;;  %v405_v42 = vld [vmem:[%s4525_s1 + $0xbc8] sm:$0xff] }
  0xd8   :  { %1183 = vmatpush.msra.mxu0 %v265_v0  ;;  %1128 = vmatpush.msrb.mxu1 %v53_v1  ;;  %v469_v43 = vld [vmem:[%s4525_s1 + $0xdc8] sm:$0xff] }
  0xd9   :  { %1148 = vmatpush.msrb.mxu2 %v117_v2  ;;  %1168 = vmatpush.msrb.mxu3 %v181_v3  ;;  %v229_v49 = vld [vmem:[%s4525_s1 + $0x648] sm:$0xff] }
  0xda   :  { %1184 = vmatpush.msra.mxu0 %v261_v4  ;;  %1129 = vmatpush.msrb.mxu1 %v49_v9  ;;  %v337_v50 = vld [vmem:[%s4525_s1 + $0x9a8] sm:$0xff] }
  0xdb   :  { %1149 = vmatpush.msrb.mxu2 %v113_v10  ;;  %1169 = vmatpush.msrb.mxu3 %v177_v11  ;;  %v401_v51 = vld [vmem:[%s4525_s1 + $0xba8] sm:$0xff] }
  0xdc   :  { %1185 = vmatpush.msra.mxu0 %v257_v12  ;;  %1130 = vmatpush.msrb.mxu1 %v45_v13  ;;  %v465_v52 = vld [vmem:[%s4525_s1 + $0xda8] sm:$0xff] }
  0xdd   :  { %1150 = vmatpush.msrb.mxu2 %v109_v14  ;;  %1170 = vmatpush.msrb.mxu3 %v173_v15  ;;  %v225_v53 = vld [vmem:[%s4525_s1 + $0x628] sm:$0xff] }
  0xde   :  { %1186 = vmatpush.msra.mxu0 %v253_v16  ;;  %1131 = vmatpush.msrb.mxu1 %v41_v17  ;;  %v333_v54 = vld [vmem:[%s4525_s1 + $0x988] sm:$0xff] }
  0xdf   :  { %1151 = vmatpush.msrb.mxu2 %v105_v18  ;;  %1171 = vmatpush.msrb.mxu3 %v169_v19  ;;  %v397_v55 = vld [vmem:[%s4525_s1 + $0xb88] sm:$0xff] }
  0xe0   :  { %1187 = vmatpush.msra.mxu0 %v249_v22  ;;  %1132 = vmatpush.msrb.mxu1 %v37_v23  ;;  %v461_v56 = vld [vmem:[%s4525_s1 + $0xd88] sm:$0xff] }
  0xe1   :  { %1152 = vmatpush.msrb.mxu2 %v101_v24  ;;  %1172 = vmatpush.msrb.mxu3 %v165_v25  ;;  %v221_v57 = vld [vmem:[%s4525_s1 + $0x608] sm:$0xff] }
  0xe2   :  { %1188 = vmatpush.msra.mxu0 %v245_v28  ;;  %1133 = vmatpush.msrb.mxu1 %v33_v29  ;;  %v329_v58 = vld [vmem:[%s4525_s1 + $0x968] sm:$0xff] }
  0xe3   :  { %1153 = vmatpush.msrb.mxu2 %v97_v30  ;;  %1173 = vmatpush.msrb.mxu3 %v161_v31  ;;  %v393_v59 = vld [vmem:[%s4525_s1 + $0xb68] sm:$0xff] }
  0xe4   :  { %1189 = vmatpush.msra.mxu0 %v241_v32  ;;  %1134 = vmatpush.msrb.mxu1 %v29_v33  ;;  %v457_v60 = vld [vmem:[%s4525_s1 + $0xd68] sm:$0xff] }
  0xe5   :  { %1154 = vmatpush.msrb.mxu2 %v93_v34  ;;  %1174 = vmatpush.msrb.mxu3 %v157_v35  ;;  %v537_v61 = vld [vmem:[%s4525_s1 + $0xfe8] sm:$0xff] }
  0xe6   :  { %1190 = vmatpush.msra.mxu0 %v237_v36  ;;  %1199 = vmatpush.msra.mxu1 %v345_v37  ;;  %v325_v62 = vld [vmem:[%s4525_s1 + $0x948] sm:$0xff] }
  0xe7   :  { %1219 = vmatpush.msra.mxu2 %v409_v38  ;;  %1239 = vmatpush.msra.mxu3 %v473_v39  ;;  %v389_v63 = vld [vmem:[%s4525_s1 + $0xb48] sm:$0xff] }
  0xe8   :  { %1191 = vmatpush.msra.mxu0 %v233_v40  ;;  %1200 = vmatpush.msra.mxu1 %v341_v41  ;;  %v453_v0 = vld [vmem:[%s4525_s1 + $0xd48] sm:$0xff] }
  0xe9   :  { %1220 = vmatpush.msra.mxu2 %v405_v42  ;;  %1240 = vmatpush.msra.mxu3 %v469_v43  ;;  %v533_v1 = vld [vmem:[%s4525_s1 + $0xfc8] sm:$0xff] }
  0xea   :  { %1192 = vmatpush.msra.mxu0 %v229_v49  ;;  %1201 = vmatpush.msra.mxu1 %v337_v50  ;;  %v321_v2 = vld [vmem:[%s4525_s1 + $0x928] sm:$0xff] }
  0xeb   :  { %1221 = vmatpush.msra.mxu2 %v401_v51  ;;  %1241 = vmatpush.msra.mxu3 %v465_v52  ;;  %v385_v3 = vld [vmem:[%s4525_s1 + $0xb28] sm:$0xff] }
  0xec   :  { %1193 = vmatpush.msra.mxu0 %v225_v53  ;;  %1202 = vmatpush.msra.mxu1 %v333_v54  ;;  %v449_v4 = vld [vmem:[%s4525_s1 + $0xd28] sm:$0xff] }
  0xed   :  { %1222 = vmatpush.msra.mxu2 %v397_v55  ;;  %1242 = vmatpush.msra.mxu3 %v461_v56  ;;  %v529_v9 = vld [vmem:[%s4525_s1 + $0xfa8] sm:$0xff] }
  0xee   :  { %1194 = vmatpush.msra.mxu0 %v221_v57  ;;  %1203 = vmatpush.msra.mxu1 %v329_v58  ;;  %v317_v10 = vld [vmem:[%s4525_s1 + $0x908] sm:$0xff] }
  0xef   :  { %1223 = vmatpush.msra.mxu2 %v393_v59  ;;  %1243 = vmatpush.msra.mxu3 %v457_v60  ;;  %v381_v11 = vld [vmem:[%s4525_s1 + $0xb08] sm:$0xff] }
  0xf0   :  { %1259 = vmatpush.msrb.mxu0 %v537_v61  ;;  %1204 = vmatpush.msra.mxu1 %v325_v62  ;;  %v445_v12 = vld [vmem:[%s4525_s1 + $0xd08] sm:$0xff] }
  0xf1   :  { %1224 = vmatpush.msra.mxu2 %v389_v63  ;;  %1244 = vmatpush.msra.mxu3 %v453_v0  ;;  %v525_v13 = vld [vmem:[%s4525_s1 + $0xf88] sm:$0xff] }
  0xf2   :  { %1260 = vmatpush.msrb.mxu0 %v533_v1  ;;  %1205 = vmatpush.msra.mxu1 %v321_v2  ;;  %v313_v14 = vld [vmem:[%s4525_s1 + $0x8e8] sm:$0xff] }
  0xf3   :  { %1225 = vmatpush.msra.mxu2 %v385_v3  ;;  %1245 = vmatpush.msra.mxu3 %v449_v4  ;;  %v377_v15 = vld [vmem:[%s4525_s1 + $0xae8] sm:$0xff] }
  0xf4   :  { %1261 = vmatpush.msrb.mxu0 %v529_v9  ;;  %1206 = vmatpush.msra.mxu1 %v317_v10  ;;  %v441_v16 = vld [vmem:[%s4525_s1 + $0xce8] sm:$0xff] }
  0xf5   :  { %1226 = vmatpush.msra.mxu2 %v381_v11  ;;  %1246 = vmatpush.msra.mxu3 %v445_v12  ;;  %v521_v17 = vld [vmem:[%s4525_s1 + $0xf68] sm:$0xff] }
  0xf6   :  { %v309_v18 = vld [vmem:[%s4525_s1 + $0x8c8] sm:$0xff]  ;;  %1262 = vmatpush.msrb.mxu0 %v525_v13  ;;  %1207 = vmatpush.msra.mxu1 %v313_v14 }
  0xf7   :  { %v373_v19 = vld [vmem:[%s4525_s1 + $0xac8] sm:$0xff]  ;;  %1227 = vmatpush.msra.mxu2 %v377_v15  ;;  %1247 = vmatpush.msra.mxu3 %v441_v16 }
  0xf8   :  { %v437_v22 = vld [vmem:[%s4525_s1 + $0xcc8] sm:$0xff]  ;;  %1263 = vmatpush.msrb.mxu0 %v521_v17  ;;  %1208 = vmatpush.msra.mxu1 %v309_v18 }
  0xf9   :  { %v517_v23 = vld [vmem:[%s4525_s1 + $0xf48] sm:$0xff]  ;;  %1228 = vmatpush.msra.mxu2 %v373_v19  ;;  %1248 = vmatpush.msra.mxu3 %v437_v22 }
  0xfa   :  { %v305_v24 = vld [vmem:[%s4525_s1 + $0x8a8] sm:$0xff]  ;;  %1264 = vmatpush.msrb.mxu0 %v517_v23  ;;  %1155 = vmatmul.f32.vlgmr.msrb.gmra.mxu2 %v2370_v47 }
  0xfb   :  { %v369_v25 = vld [vmem:[%s4525_s1 + $0xaa8] sm:$0xff]  ;;  %1209 = vmatpush.msra.mxu1 %v305_v24  ;;  %1175 = vmatmul.f32.vlgmr.msrb.gmra.mxu3 %v2366_v45 }
  0xfc   :  { %v433_v28 = vld [vmem:[%s4525_s1 + $0xca8] sm:$0xff]  ;;  %1229 = vmatpush.msra.mxu2 %v369_v25  ;;  %1135 = vmatmul.f32.vlgmr.msrb.gmra.mxu1 %v2368_v46 }
  0xfd   :  { %v513_v29 = vld [vmem:[%s4525_s1 + $0xf28] sm:$0xff]  ;;  %1249 = vmatpush.msra.mxu3 %v433_v28  ;;  %1195 = vmatmul.f32.vlgmr.msra.gmra.mxu0 %v2372_v48 }
  0xfe   :  { %v301_v30 = vld [vmem:[%s4525_s1 + $0x888] sm:$0xff]  ;;  %1265 = vmatpush.msrb.mxu0 %v513_v29 }
  0xff   :  { %v365_v31 = vld [vmem:[%s4525_s1 + $0xa88] sm:$0xff]  ;;  %1210 = vmatpush.msra.mxu1 %v301_v30 }
 0x100   :  { %v429_v32 = vld [vmem:[%s4525_s1 + $0xc88] sm:$0xff]  ;;  %1230 = vmatpush.msra.mxu2 %v365_v31 }
 0x101   :  { %v509_v33 = vld [vmem:[%s4525_s1 + $0xf08] sm:$0xff]  ;;  %1250 = vmatpush.msra.mxu3 %v429_v32 }
 0x102   :  { %v297_v34 = vld [vmem:[%s4525_s1 + $0x868] sm:$0xff]  ;;  %1266 = vmatpush.msrb.mxu0 %v509_v33  ;;  %v812_v33 = vld [vmem:[%s4526_s2] sm:$0xf] }
 0x103   :  { %v361_v35 = vld [vmem:[%s4525_s1 + $0xa68] sm:$0xff]  ;;  %1211 = vmatpush.msra.mxu1 %v297_v34 }
 0x104   :  { %v425_v36 = vld [vmem:[%s4525_s1 + $0xc68] sm:$0xff]  ;;  %1231 = vmatpush.msra.mxu2 %v361_v35 }
 0x105   :  { %v505_v37 = vld [vmem:[%s4525_s1 + $0xee8] sm:$0xff]  ;;  %1251 = vmatpush.msra.mxu3 %v425_v36 }
 0x106   :  { %v293_v38 = vld [vmem:[%s4525_s1 + $0x848] sm:$0xff]  ;;  %1267 = vmatpush.msrb.mxu0 %v505_v37 }
 0x107   :  { %v357_v39 = vld [vmem:[%s4525_s1 + $0xa48] sm:$0xff]  ;;  %1212 = vmatpush.msra.mxu1 %v293_v38 }
 0x108   :  { %v421_v40 = vld [vmem:[%s4525_s1 + $0xc48] sm:$0xff]  ;;  %1232 = vmatpush.msra.mxu2 %v357_v39  ;;  %v814_v39 = vperm.slane %v812_v33, 0 }
 0x109   :  { %v501_v41 = vld [vmem:[%s4525_s1 + $0xec8] sm:$0xff]  ;;  %1252 = vmatpush.msra.mxu3 %v421_v40 }
 0x10a   :  { %v289_v42 = vld [vmem:[%s4525_s1 + $0x828] sm:$0xff]  ;;  %1268 = vmatpush.msrb.mxu0 %v501_v41 }
 0x10b   :  { %v353_v43 = vld [vmem:[%s4525_s1 + $0xa28] sm:$0xff]  ;;  %1213 = vmatpush.msra.mxu1 %v289_v42 }
 0x10c   :  { %v417_v49 = vld [vmem:[%s4525_s1 + $0xc28] sm:$0xff]  ;;  %1233 = vmatpush.msra.mxu2 %v353_v43 }
 0x10d   :  { %v497_v50 = vld [vmem:[%s4525_s1 + $0xea8] sm:$0xff]  ;;  %1253 = vmatpush.msra.mxu3 %v417_v49 }
 0x10e   :  { %v285_v51 = vld [vmem:[%s4525_s1 + $0x808] sm:$0xff]  ;;  %1269 = vmatpush.msrb.mxu0 %v497_v50 }
 0x10f   :  { %v349_v52 = vld [vmem:[%s4525_s1 + $0xa08] sm:$0xff]  ;;  %1214 = vmatpush.msra.mxu1 %v285_v51  ;;  %v876_v51 = vpop.f32.mrf.mxu0 }
 0x110   :  { %v413_v53 = vld [vmem:[%s4525_s1 + $0xc08] sm:$0xff]  ;;  %1234 = vmatpush.msra.mxu2 %v349_v52  ;;  %1215 = vmatmul.f32.vlgmr.msra.gmra.mxu1 %v2436_v6 }
 0x111   :  { %v493_v54 = vld [vmem:[%s4525_s1 + $0xe88] sm:$0xff]  ;;  %1254 = vmatpush.msra.mxu3 %v413_v53  ;;  %1235 = vmatmul.f32.vlgmr.msra.gmra.mxu2 %v2440_v8 }
 0x112   :  { %v601_v55 = vld [vmem:[%s4525_s1 + $0x11e8] sm:$0xff]  ;;  %1270 = vmatpush.msrb.mxu0 %v493_v54  ;;  %1255 = vmatmul.f32.vlgmr.msra.gmra.mxu3 %v2434_v5  ;;  %v877_v54 = vadd.f32 %v876_v51, %v814_v39  ;;  %v282_v51 = vld [vmem:[%s4525_s1 + $0x7f0] sm:$0xff] }
 0x113   :  { %v665_v56 = vld [vmem:[%s4525_s1 + $0x13e8] sm:$0xff]  ;;  %1279 = vmatpush.msrb.mxu1 %v601_v55  ;;  %v896_v55 = vpop.f32.mrf.mxu1 }
 0x114   :  { %v729_v57 = vld [vmem:[%s4525_s1 + $0x15e8] sm:$0xff]  ;;  %1299 = vmatpush.msrb.mxu2 %v665_v56 }
 0x115   :  { %v489_v58 = vld [vmem:[%s4525_s1 + $0xe68] sm:$0xff]  ;;  %1319 = vmatpush.msrb.mxu3 %v729_v57 }
 0x116   :  { %v597_v59 = vld [vmem:[%s4525_s1 + $0x11c8] sm:$0xff]  ;;  %1271 = vmatpush.msrb.mxu0 %v489_v58 }
 0x117   :  { %v661_v60 = vld [vmem:[%s4525_s1 + $0x13c8] sm:$0xff]  ;;  %1280 = vmatpush.msrb.mxu1 %v597_v59 }
 0x118   :  { %v725_v61 = vld [vmem:[%s4525_s1 + $0x15c8] sm:$0xff]  ;;  %1300 = vmatpush.msrb.mxu2 %v661_v60  ;;  %v897_v60 = vadd.f32 %v896_v55, %v877_v54  ;;  %v214_v54 = vld [vmem:[%s4525_s1 + $0x5d0] sm:$0xff] }
 0x119   :  { %v485_v62 = vld [vmem:[%s4525_s1 + $0xe48] sm:$0xff]  ;;  %1320 = vmatpush.msrb.mxu3 %v725_v61  ;;  %v66_v55 = vld [vmem:[%s4525_s1 + $0x130] sm:$0xff] }
 0x11a   :  { %v593_v63 = vld [vmem:[%s4525_s1 + $0x11a8] sm:$0xff]  ;;  %1272 = vmatpush.msrb.mxu0 %v485_v62 }
 0x11b   :  { %v657_v0 = vld [vmem:[%s4525_s1 + $0x13a8] sm:$0xff]  ;;  %1281 = vmatpush.msrb.mxu1 %v593_v63  ;;  %v916_v63 = vpop.f32.mrf.mxu2 }
 0x11c   :  { %v721_v1 = vld [vmem:[%s4525_s1 + $0x15a8] sm:$0xff]  ;;  %1301 = vmatpush.msrb.mxu2 %v657_v0 }
 0x11d   :  { %v481_v2 = vld [vmem:[%s4525_s1 + $0xe28] sm:$0xff]  ;;  %1321 = vmatpush.msrb.mxu3 %v721_v1 }
 0x11e   :  { %v589_v3 = vld [vmem:[%s4525_s1 + $0x1188] sm:$0xff]  ;;  %1273 = vmatpush.msrb.mxu0 %v481_v2  ;;  %v917_v2 = vadd.f32 %v916_v63, %v897_v60  ;;  %v206_v60 = vld [vmem:[%s4525_s1 + $0x590] sm:$0xff] }
 0x11f   :  { %v653_v4 = vld [vmem:[%s4525_s1 + $0x1388] sm:$0xff]  ;;  %1282 = vmatpush.msrb.mxu1 %v589_v3  ;;  %v202_v63 = vld [vmem:[%s4525_s1 + $0x570] sm:$0xff] }
 0x120   :  { %v717_v9 = vld [vmem:[%s4525_s1 + $0x1588] sm:$0xff]  ;;  %1302 = vmatpush.msrb.mxu2 %v653_v4 }
 0x121   :  { %v477_v10 = vld [vmem:[%s4525_s1 + $0xe08] sm:$0xff]  ;;  %1322 = vmatpush.msrb.mxu3 %v717_v9 }
 0x122   :  { %v585_v11 = vld [vmem:[%s4525_s1 + $0x1168] sm:$0xff]  ;;  %1274 = vmatpush.msrb.mxu0 %v477_v10 }
 0x123   :  { %v649_v12 = vld [vmem:[%s4525_s1 + $0x1368] sm:$0xff]  ;;  %1283 = vmatpush.msrb.mxu1 %v585_v11  ;;  %1275 = vmatmul.f32.vlgmr.msrb.gmra.mxu0 %v2438_v7  ;;  %v936_v11 = vpop.f32.mrf.mxu3 }
 0x124   :  { %v713_v13 = vld [vmem:[%s4525_s1 + $0x1568] sm:$0xff]  ;;  %1303 = vmatpush.msrb.mxu2 %v649_v12 }
 0x125   :  { %v793_v14 = vld [vmem:[%s4525_s1 + $0x17e8] sm:$0xff]  ;;  %1323 = vmatpush.msrb.mxu3 %v713_v13 }
 0x126   :  { %v581_v15 = vld [vmem:[%s4525_s1 + $0x1148] sm:$0xff]  ;;  %1339 = vmatpush.msra.mxu0 %v793_v14  ;;  %v937_v14 = vadd.f32 %v936_v11, %v917_v2  ;;  %v118_v2 = vld [vmem:[%s4525_s1 + $0x2d0] sm:$0xff] }
 0x127   :  { %v645_v16 = vld [vmem:[%s4525_s1 + $0x1348] sm:$0xff]  ;;  %1284 = vmatpush.msrb.mxu1 %v581_v15  ;;  %v194_v11 = vld [vmem:[%s4525_s1 + $0x530] sm:$0xff] }
 0x128   :  { %v709_v17 = vld [vmem:[%s4525_s1 + $0x1548] sm:$0xff]  ;;  %1304 = vmatpush.msrb.mxu2 %v645_v16 }
 0x129   :  { %v789_v18 = vld [vmem:[%s4525_s1 + $0x17c8] sm:$0xff]  ;;  %1324 = vmatpush.msrb.mxu3 %v709_v17 }
 0x12a   :  { %v577_v19 = vld [vmem:[%s4525_s1 + $0x1128] sm:$0xff]  ;;  %1340 = vmatpush.msra.mxu0 %v789_v18  ;;  %v154_v18 = vld [vmem:[%s4525_s1 + $0x3f0] sm:$0xff] }
 0x12b   :  { %v641_v22 = vld [vmem:[%s4525_s1 + $0x1328] sm:$0xff]  ;;  %1285 = vmatpush.msrb.mxu1 %v577_v19  ;;  %v90_v19 = vld [vmem:[%s4525_s1 + $0x1f0] sm:$0xff] }
 0x12c   :  { %v705_v23 = vld [vmem:[%s4525_s1 + $0x1528] sm:$0xff]  ;;  %1305 = vmatpush.msrb.mxu2 %v641_v22 }
 0x12d   :  { %v785_v24 = vld [vmem:[%s4525_s1 + $0x17a8] sm:$0xff]  ;;  %1325 = vmatpush.msrb.mxu3 %v705_v23  ;;  %v956_v23 = vpop.f32.mrf.mxu0 }
 0x12e   :  { %v573_v25 = vld [vmem:[%s4525_s1 + $0x1108] sm:$0xff]  ;;  %1341 = vmatpush.msra.mxu0 %v785_v24 }
 0x12f   :  { %v637_v28 = vld [vmem:[%s4525_s1 + $0x1308] sm:$0xff]  ;;  %1286 = vmatpush.msrb.mxu1 %v573_v25  ;;  %v957_v25 = vadd.f32 %v956_v23, %v937_v14  ;;  %v110_v14 = vld [vmem:[%s4525_s1 + $0x290] sm:$0xff] }
 0x130   :  { %v701_v29 = vld [vmem:[%s4525_s1 + $0x1508] sm:$0xff]  ;;  %1306 = vmatpush.msrb.mxu2 %v637_v28  ;;  %v86_v28 = vld [vmem:[%s4525_s1 + $0x1d0] sm:$0xff] }
 0x131   :  { %v781_v30 = vld [vmem:[%s4525_s1 + $0x1788] sm:$0xff]  ;;  %1326 = vmatpush.msrb.mxu3 %v701_v29  ;;  %v150_v29 = vld [vmem:[%s4525_s1 + $0x3d0] sm:$0xff] }
 0x132   :  { %v569_v31 = vld [vmem:[%s4525_s1 + $0x10e8] sm:$0xff]  ;;  %1342 = vmatpush.msra.mxu0 %v781_v30 }
 0x133   :  { %v633_v32 = vld [vmem:[%s4525_s1 + $0x12e8] sm:$0xff]  ;;  %1287 = vmatpush.msrb.mxu1 %v569_v31  ;;  %v82_v31 = vld [vmem:[%s4525_s1 + $0x1b0] sm:$0xff] }
 0x134   :  { %v697_v34 = vld [vmem:[%s4525_s1 + $0x14e8] sm:$0xff]  ;;  %1307 = vmatpush.msrb.mxu2 %v633_v32  ;;  %v146_v32 = vld [vmem:[%s4525_s1 + $0x3b0] sm:$0xff] }
 0x135   :  { %v777_v35 = vld [vmem:[%s4525_s1 + $0x1768] sm:$0xff]  ;;  %1327 = vmatpush.msrb.mxu3 %v697_v34  ;;  %v996_v34 = vpop.f32.mrf.mxu2 }
 0x136   :  { %v565_v36 = vld [vmem:[%s4525_s1 + $0x10c8] sm:$0xff]  ;;  %1343 = vmatpush.msra.mxu0 %v777_v35 }
 0x137   :  { %v629_v37 = vld [vmem:[%s4525_s1 + $0x12c8] sm:$0xff]  ;;  %1288 = vmatpush.msrb.mxu1 %v565_v36  ;;  %v78_v36 = vld [vmem:[%s4525_s1 + $0x190] sm:$0xff] }
 0x138   :  { %v693_v38 = vld [vmem:[%s4525_s1 + $0x14c8] sm:$0xff]  ;;  %1308 = vmatpush.msrb.mxu2 %v629_v37  ;;  %v142_v37 = vld [vmem:[%s4525_s1 + $0x390] sm:$0xff] }
 0x139   :  { %v773_v40 = vld [vmem:[%s4525_s1 + $0x1748] sm:$0xff]  ;;  %1328 = vmatpush.msrb.mxu3 %v693_v38 }
 0x13a   :  { %v561_v41 = vld [vmem:[%s4525_s1 + $0x10a8] sm:$0xff]  ;;  %1344 = vmatpush.msra.mxu0 %v773_v40 }
 0x13b   :  { %v625_v42 = vld [vmem:[%s4525_s1 + $0x12a8] sm:$0xff]  ;;  %1289 = vmatpush.msrb.mxu1 %v561_v41  ;;  %v1016_v41 = vpop.f32.mrf.mxu3 }
 0x13c   :  { %v689_v43 = vld [vmem:[%s4525_s1 + $0x14a8] sm:$0xff]  ;;  %1309 = vmatpush.msrb.mxu2 %v625_v42  ;;  %v74_v42 = vld [vmem:[%s4525_s1 + $0x170] sm:$0xff] }
 0x13d   :  { %v769_v49 = vld [vmem:[%s4525_s1 + $0x1728] sm:$0xff]  ;;  %1329 = vmatpush.msrb.mxu3 %v689_v43  ;;  %v138_v43 = vld [vmem:[%s4525_s1 + $0x370] sm:$0xff] }
 0x13e   :  { %v557_v50 = vld [vmem:[%s4525_s1 + $0x1088] sm:$0xff]  ;;  %1345 = vmatpush.msra.mxu0 %v769_v49 }
 0x13f   :  { %v621_v52 = vld [vmem:[%s4525_s1 + $0x1288] sm:$0xff]  ;;  %1290 = vmatpush.msrb.mxu1 %v557_v50  ;;  %v218_v50 = vld [vmem:[%s4525_s1 + $0x5f0] sm:$0xff] }
 0x140   :  { %v685_v53 = vld [vmem:[%s4525_s1 + $0x1488] sm:$0xff]  ;;  %1310 = vmatpush.msrb.mxu2 %v621_v52  ;;  %v70_v52 = vld [vmem:[%s4525_s1 + $0x150] sm:$0xff] }
 0x141   :  { %v765_v56 = vld [vmem:[%s4525_s1 + $0x1708] sm:$0xff]  ;;  %1330 = vmatpush.msrb.mxu3 %v685_v53  ;;  %v134_v53 = vld [vmem:[%s4525_s1 + $0x350] sm:$0xff] }
 0x142   :  { %v553_v57 = vld [vmem:[%s4525_s1 + $0x1068] sm:$0xff]  ;;  %1346 = vmatpush.msra.mxu0 %v765_v56  ;;  %v130_v56 = vld [vmem:[%s4525_s1 + $0x330] sm:$0xff] }
 0x143   :  { %v617_v58 = vld [vmem:[%s4525_s1 + $0x1268] sm:$0xff]  ;;  %1291 = vmatpush.msrb.mxu1 %v553_v57  ;;  %v210_v57 = vld [vmem:[%s4525_s1 + $0x5b0] sm:$0xff] }
 0x144   :  { %v681_v59 = vld [vmem:[%s4525_s1 + $0x1468] sm:$0xff]  ;;  %1311 = vmatpush.msrb.mxu2 %v617_v58  ;;  %v278_v58 = vld [vmem:[%s4525_s1 + $0x7d0] sm:$0xff] }
 0x145   :  { %v761_v61 = vld [vmem:[%s4525_s1 + $0x16e8] sm:$0xff]  ;;  %1331 = vmatpush.msrb.mxu3 %v681_v59  ;;  %v62_v59 = vld [vmem:[%s4525_s1 + $0x110] sm:$0xff] }
 0x146   :  { %v549_v62 = vld [vmem:[%s4525_s1 + $0x1048] sm:$0xff]  ;;  %1347 = vmatpush.msra.mxu0 %v761_v61  ;;  %v274_v61 = vld [vmem:[%s4525_s1 + $0x7b0] sm:$0xff] }
 0x147   :  { %v613_v0 = vld [vmem:[%s4525_s1 + $0x1248] sm:$0xff]  ;;  %1292 = vmatpush.msrb.mxu1 %v549_v62  ;;  %v58_v62 = vld [vmem:[%s4525_s1 + $0xf0] sm:$0xff] }
 0x148   :  { %v677_v1 = vld [vmem:[%s4525_s1 + $0x1448] sm:$0xff]  ;;  %1312 = vmatpush.msrb.mxu2 %v613_v0  ;;  %v270_v0 = vld [vmem:[%s4525_s1 + $0x790] sm:$0xff] }
 0x149   :  { %v757_v3 = vld [vmem:[%s4525_s1 + $0x16c8] sm:$0xff]  ;;  %1332 = vmatpush.msrb.mxu3 %v677_v1  ;;  %v54_v1 = vld [vmem:[%s4525_s1 + $0xd0] sm:$0xff] }
 0x14a   :  { %v545_v4 = vld [vmem:[%s4525_s1 + $0x1028] sm:$0xff]  ;;  %1348 = vmatpush.msra.mxu0 %v757_v3  ;;  %v198_v3 = vld [vmem:[%s4525_s1 + $0x550] sm:$0xff] }
 0x14b   :  { %v609_v9 = vld [vmem:[%s4525_s1 + $0x1228] sm:$0xff]  ;;  %1293 = vmatpush.msrb.mxu1 %v545_v4  ;;  %v266_v4 = vld [vmem:[%s4525_s1 + $0x770] sm:$0xff] }
 0x14c   :  { %v673_v10 = vld [vmem:[%s4525_s1 + $0x1428] sm:$0xff]  ;;  %1313 = vmatpush.msrb.mxu2 %v609_v9  ;;  %v50_v9 = vld [vmem:[%s4525_s1 + $0xb0] sm:$0xff] }
 0x14d   :  { %v753_v12 = vld [vmem:[%s4525_s1 + $0x16a8] sm:$0xff]  ;;  %1333 = vmatpush.msrb.mxu3 %v673_v10  ;;  %v114_v10 = vld [vmem:[%s4525_s1 + $0x2b0] sm:$0xff] }
 0x14e   :  { %v541_v13 = vld [vmem:[%s4525_s1 + $0x1008] sm:$0xff]  ;;  %1349 = vmatpush.msra.mxu0 %v753_v12  ;;  %v262_v12 = vld [vmem:[%s4525_s1 + $0x750] sm:$0xff] }
 0x14f   :  { %v605_v15 = vld [vmem:[%s4525_s1 + $0x1208] sm:$0xff]  ;;  %1294 = vmatpush.msrb.mxu1 %v541_v13  ;;  %v46_v13 = vld [vmem:[%s4525_s1 + $0x90] sm:$0xff] }
 0x150   :  { %v669_v16 = vld [vmem:[%s4525_s1 + $0x1408] sm:$0xff]  ;;  %1314 = vmatpush.msrb.mxu2 %v605_v15  ;;  %1295 = vmatmul.f32.vlgmr.msrb.gmra.mxu1 %v2651_v20  ;;  %v190_v15 = vld [vmem:[%s4525_s1 + $0x510] sm:$0xff] }
 0x151   :  { %v749_v17 = vld [vmem:[%s4525_s1 + $0x1688] sm:$0xff]  ;;  %1334 = vmatpush.msrb.mxu3 %v669_v16  ;;  %1315 = vmatmul.f32.vlgmr.msrb.gmra.mxu2 %v2669_v26  ;;  %v976_v26 = vpop.f32.mrf.mxu1  ;;  %v258_v16 = vld [vmem:[%s4525_s1 + $0x730] sm:$0xff] }
 0x152   :  { %v745_v22 = vld [vmem:[%s4525_s1 + $0x1668] sm:$0xff]  ;;  %1350 = vmatpush.msra.mxu0 %v749_v17  ;;  %1379 = vmatpush.msra.mxu2 %v90_v19  ;;  %v977_v33 = vadd.f32 %v976_v26, %v957_v25  ;;  %v42_v17 = vld [vmem:[%s4525_s1 + $0x70] sm:$0xff] }
 0x153   :  { %v809_v24 = vld [vmem:[%s4525_s1 + $0x1868] sm:$0xff]  ;;  %1399 = vmatpush.msra.mxu3 %v154_v18  ;;  %v1036_v18 = vpop.f32.mrf.mxu0  ;;  %v106_v19 = vld [vmem:[%s4525_s1 + $0x270] sm:$0xff] }
 0x154   :  { %1351 = vmatpush.msra.mxu0 %v745_v22  ;;  %v741_v20 = vld [vmem:[%s4525_s1 + $0x1648] sm:$0xff]  ;;  %1335 = vmatmul.f32.vlgmr.msrb.gmra.mxu3 %v2653_v21  ;;  %v997_v38 = vadd.f32 %v996_v34, %v977_v33  ;;  %v186_v22 = vld [vmem:[%s4525_s1 + $0x4f0] sm:$0xff] }
 0x155   :  { %v805_v30 = vld [vmem:[%s4525_s1 + $0x1848] sm:$0xff]  ;;  %1371 = vmatpush.msra.mxu1 %v809_v24  ;;  %1380 = vmatpush.msra.mxu2 %v86_v28  ;;  %v254_v24 = vld [vmem:[%s4525_s1 + $0x710] sm:$0xff] }
 0x156   :  { %1400 = vmatpush.msra.mxu3 %v150_v29  ;;  %v737_v35 = vld [vmem:[%s4525_s1 + $0x1628] sm:$0xff]  ;;  %1352 = vmatpush.msra.mxu0 %v741_v20  ;;  %v3311_v49 = vadd.f32 %v1016_v41, %v997_v38  ;;  %v38_v25 = vld [vmem:[%s4525_s1 + $0x50] sm:$0xff] }
 0x157   :  { %v801_v21 = vld [vmem:[%s4525_s1 + $0x1828] sm:$0xff]  ;;  %1372 = vmatpush.msra.mxu1 %v805_v30  ;;  %1381 = vmatpush.msra.mxu2 %v82_v31  ;;  %v102_v28 = vld [vmem:[%s4525_s1 + $0x250] sm:$0xff] }
 0x158   :  { %1401 = vmatpush.msra.mxu3 %v146_v32  ;;  %v733_v39 = vld [vmem:[%s4525_s1 + $0x1608] sm:$0xff]  ;;  %1353 = vmatpush.msra.mxu0 %v737_v35  ;;  %v1037_v23 = vadd.f32 %v1036_v18, %v3311_v49  ;;  %v182_v29 = vld [vmem:[%s4525_s1 + $0x4d0] sm:$0xff] }
 0x159   :  { %v797_v40 = vld [vmem:[%s4525_s1 + $0x1808] sm:$0xff]  ;;  %1373 = vmatpush.msra.mxu1 %v801_v21  ;;  %1382 = vmatpush.msra.mxu2 %v78_v36  ;;  %v1056_v20 = vpop.f32.mrf.mxu1  ;;  %v250_v30 = vld [vmem:[%s4525_s1 + $0x6f0] sm:$0xff]  ;;  %v1076_v21 = vpop.f32.mrf.mxu2 }
 0x15a   :  { %1402 = vmatpush.msra.mxu3 %v142_v37  ;;  %1354 = vmatpush.msra.mxu0 %v733_v39  ;;  %v34_v26 = vld [vmem:[%s4525_s1 + $0x30] sm:$0xff]  ;;  %v1057_v31 = vadd.f32 %v1056_v20, %v1037_v23 }
 0x15b   :  { %1374 = vmatpush.msra.mxu1 %v797_v40  ;;  %1383 = vmatpush.msra.mxu2 %v74_v42  ;;  %v98_v32 = vld [vmem:[%s4525_s1 + $0x230] sm:$0xff] }
 0x15c   :  { %1403 = vmatpush.msra.mxu3 %v138_v43  ;;  %1419 = vmatpush.msrb.mxu0 %v218_v50  ;;  %v178_v33 = vld [vmem:[%s4525_s1 + $0x4b0] sm:$0xff]  ;;  %v1077_v38 = vadd.f32 %v1076_v21, %v1057_v31  ;;  %v1096_v43 = vpop.f32.mrf.mxu3 }
 0x15d   :  { %1439 = vmatpush.msrb.mxu1 %v282_v51  ;;  %1355 = vmatmul.f32.vlgmr.msra.gmra.mxu0 %v2671_v27  ;;  %v126_v27 = vld [vmem:[%s4525_s1 + $0x310] sm:$0xff] }
 0x15e   :  { %1384 = vmatpush.msra.mxu2 %v70_v52  ;;  %1404 = vmatpush.msra.mxu3 %v134_v53  ;;  %v246_v34 = vld [vmem:[%s4525_s1 + $0x6d0] sm:$0xff]  ;;  %v1097_v51 = vadd.f32 %v1096_v43, %v1077_v38 }
 0x15f   :  { %1420 = vmatpush.msrb.mxu0 %v214_v54  ;;  %1967 = vmatmul.msk.f32.vlgmr.msra.gmra.mxu1 %vm856_vm0, %v2723_v44  ;;  %v122_v44 = vld [vmem:[%s4525_s1 + $0x2f0] sm:$0xff] }
 0x160   :  { %1385 = vmatpush.msra.mxu2 %v66_v55  ;;  %1405 = vmatpush.msra.mxu3 %v130_v56  ;;  %v30_v35 = vld [vmem:[%s4525_s1 + $0x10] sm:$0xff]  ;;  %v1116_v56 = vpop.f32.mrf.mxu0 }
 0x161   :  { %1421 = vmatpush.msrb.mxu0 %v210_v57  ;;  %1440 = vmatpush.msrb.mxu1 %v278_v58  ;;  %v94_v36 = vld [vmem:[%s4525_s1 + $0x210] sm:$0xff] }
 0x162   :  { %1386 = vmatpush.msra.mxu2 %v62_v59  ;;  %1406 = vmatpush.msra.mxu3 %v126_v27  ;;  %v174_v37 = vld [vmem:[%s4525_s1 + $0x490] sm:$0xff]  ;;  %v3485_v59 = vadd.f32 %v1116_v56, %v1097_v51 }
 0x163   :  { %1422 = vmatpush.msrb.mxu0 %v206_v60  ;;  %1441 = vmatpush.msrb.mxu1 %v274_v61  ;;  %v242_v39 = vld [vmem:[%s4525_s1 + $0x6b0] sm:$0xff] }
 0x164   :  { %1387 = vmatpush.msra.mxu2 %v58_v62  ;;  %1407 = vmatpush.msra.mxu3 %v122_v44  ;;  %v346_v40 = vld [vmem:[%s4525_s1 + $0x9f0] sm:$0xff] }
 0x165   :  { %1423 = vmatpush.msrb.mxu0 %v202_v63  ;;  %1442 = vmatpush.msrb.mxu1 %v270_v0  ;;  %v410_v41 = vld [vmem:[%s4525_s1 + $0xbf0] sm:$0xff] }
 0x166   :  { %1388 = vmatpush.msra.mxu2 %v54_v1  ;;  %1408 = vmatpush.msra.mxu3 %v118_v2  ;;  %v170_v42 = vld [vmem:[%s4525_s1 + $0x470] sm:$0xff] }
 0x167   :  { %1424 = vmatpush.msrb.mxu0 %v198_v3  ;;  %1443 = vmatpush.msrb.mxu1 %v266_v4  ;;  %v238_v49 = vld [vmem:[%s4525_s1 + $0x690] sm:$0xff] }
 0x168   :  { %1389 = vmatpush.msra.mxu2 %v50_v9  ;;  %1409 = vmatpush.msra.mxu3 %v114_v10  ;;  %v342_v50 = vld [vmem:[%s4525_s1 + $0x9d0] sm:$0xff] }
 0x169   :  { %1425 = vmatpush.msrb.mxu0 %v194_v11  ;;  %1444 = vmatpush.msrb.mxu1 %v262_v12  ;;  %v406_v52 = vld [vmem:[%s4525_s1 + $0xbd0] sm:$0xff] }
 0x16a   :  { %1390 = vmatpush.msra.mxu2 %v46_v13  ;;  %1410 = vmatpush.msra.mxu3 %v110_v14  ;;  %v166_v53 = vld [vmem:[%s4525_s1 + $0x450] sm:$0xff] }
 0x16b   :  { %1426 = vmatpush.msrb.mxu0 %v190_v15  ;;  %1445 = vmatpush.msrb.mxu1 %v258_v16  ;;  %v234_v54 = vld [vmem:[%s4525_s1 + $0x670] sm:$0xff] }
 0x16c   :  { %1391 = vmatpush.msra.mxu2 %v42_v17  ;;  %1411 = vmatpush.msra.mxu3 %v106_v19  ;;  %v338_v55 = vld [vmem:[%s4525_s1 + $0x9b0] sm:$0xff] }
 0x16d   :  { %1427 = vmatpush.msrb.mxu0 %v186_v22  ;;  %1446 = vmatpush.msrb.mxu1 %v254_v24  ;;  %v402_v57 = vld [vmem:[%s4525_s1 + $0xbb0] sm:$0xff] }
 0x16e   :  { %1392 = vmatpush.msra.mxu2 %v38_v25  ;;  %1412 = vmatpush.msra.mxu3 %v102_v28  ;;  %v162_v58 = vld [vmem:[%s4525_s1 + $0x430] sm:$0xff] }
 0x16f   :  { %1428 = vmatpush.msrb.mxu0 %v182_v29  ;;  %1447 = vmatpush.msrb.mxu1 %v250_v30  ;;  %v230_v27 = vld [vmem:[%s4525_s1 + $0x650] sm:$0xff] }
 0x170   :  { %1393 = vmatpush.msra.mxu2 %v34_v26  ;;  %1413 = vmatpush.msra.mxu3 %v98_v32  ;;  %v334_v60 = vld [vmem:[%s4525_s1 + $0x990] sm:$0xff] }
 0x171   :  { %1429 = vmatpush.msrb.mxu0 %v178_v33  ;;  %1448 = vmatpush.msrb.mxu1 %v246_v34  ;;  %v398_v61 = vld [vmem:[%s4525_s1 + $0xb90] sm:$0xff] }
 0x172   :  { %1394 = vmatpush.msra.mxu2 %v30_v35  ;;  %1414 = vmatpush.msra.mxu3 %v94_v36  ;;  %v158_v62 = vld [vmem:[%s4525_s1 + $0x410] sm:$0xff] }
 0x173   :  { %1430 = vmatpush.msrb.mxu0 %v174_v37  ;;  %1449 = vmatpush.msrb.mxu1 %v242_v39  ;;  %v226_v44 = vld [vmem:[%s4525_s1 + $0x630] sm:$0xff] }
 0x174   :  { %1459 = vmatpush.msrb.mxu2 %v346_v40  ;;  %1479 = vmatpush.msrb.mxu3 %v410_v41  ;;  %v330_v63 = vld [vmem:[%s4525_s1 + $0x970] sm:$0xff] }
 0x175   :  { %1431 = vmatpush.msrb.mxu0 %v170_v42  ;;  %1450 = vmatpush.msrb.mxu1 %v238_v49  ;;  %v394_v0 = vld [vmem:[%s4525_s1 + $0xb70] sm:$0xff] }
 0x176   :  { %1460 = vmatpush.msrb.mxu2 %v342_v50  ;;  %1480 = vmatpush.msrb.mxu3 %v406_v52  ;;  %v474_v1 = vld [vmem:[%s4525_s1 + $0xdf0] sm:$0xff] }
 0x177   :  { %1432 = vmatpush.msrb.mxu0 %v166_v53  ;;  %1451 = vmatpush.msrb.mxu1 %v234_v54  ;;  %v222_v2 = vld [vmem:[%s4525_s1 + $0x610] sm:$0xff] }
 0x178   :  { %1461 = vmatpush.msrb.mxu2 %v338_v55  ;;  %1481 = vmatpush.msrb.mxu3 %v402_v57  ;;  %v326_v3 = vld [vmem:[%s4525_s1 + $0x950] sm:$0xff] }
 0x179   :  { %1433 = vmatpush.msrb.mxu0 %v162_v58  ;;  %1452 = vmatpush.msrb.mxu1 %v230_v27  ;;  %v390_v4 = vld [vmem:[%s4525_s1 + $0xb50] sm:$0xff] }
 0x17a   :  { %1462 = vmatpush.msrb.mxu2 %v334_v60  ;;  %1482 = vmatpush.msrb.mxu3 %v398_v61  ;;  %v470_v9 = vld [vmem:[%s4525_s1 + $0xdd0] sm:$0xff] }
 0x17b   :  { %1434 = vmatpush.msrb.mxu0 %v158_v62  ;;  %1453 = vmatpush.msrb.mxu1 %v226_v44  ;;  %v538_v10 = vld [vmem:[%s4525_s1 + $0xff0] sm:$0xff] }
 0x17c   :  { %1463 = vmatpush.msrb.mxu2 %v330_v63  ;;  %1483 = vmatpush.msrb.mxu3 %v394_v0  ;;  %v322_v11 = vld [vmem:[%s4525_s1 + $0x930] sm:$0xff] }
 0x17d   :  { %1499 = vmatpush.msra.mxu0 %v474_v1  ;;  %1454 = vmatpush.msrb.mxu1 %v222_v2  ;;  %v386_v12 = vld [vmem:[%s4525_s1 + $0xb30] sm:$0xff] }
 0x17e   :  { %1464 = vmatpush.msrb.mxu2 %v326_v3  ;;  %v466_v13 = vld [vmem:[%s4525_s1 + $0xdb0] sm:$0xff]  ;;  %1484 = vmatpush.msrb.mxu3 %v390_v4 }
 0x17f   :  { %1500 = vmatpush.msra.mxu0 %v470_v9  ;;  %v534_v14 = vld [vmem:[%s4525_s1 + $0xfd0] sm:$0xff]  ;;  %1519 = vmatpush.msra.mxu1 %v538_v10 }
 0x180   :  { %v318_v15 = vld [vmem:[%s4525_s1 + $0x910] sm:$0xff]  ;;  %1465 = vmatpush.msrb.mxu2 %v322_v11  ;;  %1485 = vmatpush.msrb.mxu3 %v386_v12 }
 0x181   :  { %v382_v16 = vld [vmem:[%s4525_s1 + $0xb10] sm:$0xff]  ;;  %1501 = vmatpush.msra.mxu0 %v466_v13  ;;  %1520 = vmatpush.msra.mxu1 %v534_v14 }
 0x182   :  { %v462_v17 = vld [vmem:[%s4525_s1 + $0xd90] sm:$0xff]  ;;  %1466 = vmatpush.msrb.mxu2 %v318_v15  ;;  %1486 = vmatpush.msrb.mxu3 %v382_v16 }
 0x183   :  { %v530_v18 = vld [vmem:[%s4525_s1 + $0xfb0] sm:$0xff]  ;;  %1502 = vmatpush.msra.mxu0 %v462_v17  ;;  %1395 = vmatmul.f32.vlgmr.msra.gmra.mxu2 %v2368_v46 }
 0x184   :  { %v314_v19 = vld [vmem:[%s4525_s1 + $0x8f0] sm:$0xff]  ;;  %1521 = vmatpush.msra.mxu1 %v530_v18  ;;  %1415 = vmatmul.f32.vlgmr.msra.gmra.mxu3 %v2370_v47 }
 0x185   :  { %v378_v22 = vld [vmem:[%s4525_s1 + $0xaf0] sm:$0xff]  ;;  %1467 = vmatpush.msrb.mxu2 %v314_v19  ;;  %1435 = vmatmul.f32.vlgmr.msrb.gmra.mxu0 %v2366_v45 }
 0x186   :  { %v458_v23 = vld [vmem:[%s4525_s1 + $0xd70] sm:$0xff]  ;;  %1487 = vmatpush.msrb.mxu3 %v378_v22  ;;  %1455 = vmatmul.f32.vlgmr.msrb.gmra.mxu1 %v2372_v48 }
 0x187   :  { %v526_v24 = vld [vmem:[%s4525_s1 + $0xf90] sm:$0xff]  ;;  %1503 = vmatpush.msra.mxu0 %v458_v23 }
 0x188   :  { %v310_v25 = vld [vmem:[%s4525_s1 + $0x8d0] sm:$0xff]  ;;  %1522 = vmatpush.msra.mxu1 %v526_v24 }
 0x189   :  { %v374_v28 = vld [vmem:[%s4525_s1 + $0xad0] sm:$0xff]  ;;  %1468 = vmatpush.msrb.mxu2 %v310_v25 }
 0x18a   :  { %v454_v29 = vld [vmem:[%s4525_s1 + $0xd50] sm:$0xff]  ;;  %1488 = vmatpush.msrb.mxu3 %v374_v28 }
 0x18b   :  { %v522_v20 = vld [vmem:[%s4525_s1 + $0xf70] sm:$0xff]  ;;  %1504 = vmatpush.msra.mxu0 %v454_v29 }
 0x18c   :  { %v306_v30 = vld [vmem:[%s4525_s1 + $0x8b0] sm:$0xff]  ;;  %1523 = vmatpush.msra.mxu1 %v522_v20 }
 0x18d   :  { %v370_v26 = vld [vmem:[%s4525_s1 + $0xab0] sm:$0xff]  ;;  %1469 = vmatpush.msrb.mxu2 %v306_v30 }
 0x18e   :  { %v450_v31 = vld [vmem:[%s4525_s1 + $0xd30] sm:$0xff]  ;;  %1489 = vmatpush.msrb.mxu3 %v370_v26 }
 0x18f   :  { %v518_v32 = vld [vmem:[%s4525_s1 + $0xf50] sm:$0xff]  ;;  %1505 = vmatpush.msra.mxu0 %v450_v31 }
 0x190   :  { %v302_v33 = vld [vmem:[%s4525_s1 + $0x890] sm:$0xff]  ;;  %1524 = vmatpush.msra.mxu1 %v518_v32 }
 0x191   :  { %v366_v34 = vld [vmem:[%s4525_s1 + $0xa90] sm:$0xff]  ;;  %1470 = vmatpush.msrb.mxu2 %v302_v33 }
 0x192   :  { %v446_v35 = vld [vmem:[%s4525_s1 + $0xd10] sm:$0xff]  ;;  %1490 = vmatpush.msrb.mxu3 %v366_v34 }
 0x193   :  { %v514_v21 = vld [vmem:[%s4525_s1 + $0xf30] sm:$0xff]  ;;  %1506 = vmatpush.msra.mxu0 %v446_v35 }
 0x194   :  { %v298_v36 = vld [vmem:[%s4525_s1 + $0x870] sm:$0xff]  ;;  %1525 = vmatpush.msra.mxu1 %v514_v21 }
 0x195   :  { %v362_v37 = vld [vmem:[%s4525_s1 + $0xa70] sm:$0xff]  ;;  %1471 = vmatpush.msrb.mxu2 %v298_v36 }
 0x196   :  { %v442_v38 = vld [vmem:[%s4525_s1 + $0xcf0] sm:$0xff]  ;;  %1491 = vmatpush.msrb.mxu3 %v362_v37 }
 0x197   :  { %v510_v39 = vld [vmem:[%s4525_s1 + $0xf10] sm:$0xff]  ;;  %1507 = vmatpush.msra.mxu0 %v442_v38 }
 0x198   :  { %v294_v40 = vld [vmem:[%s4525_s1 + $0x850] sm:$0xff]  ;;  %1526 = vmatpush.msra.mxu1 %v510_v39 }
 0x199   :  { %v358_v41 = vld [vmem:[%s4525_s1 + $0xa50] sm:$0xff]  ;;  %1472 = vmatpush.msrb.mxu2 %v294_v40 }
 0x19a   :  { %v438_v42 = vld [vmem:[%s4525_s1 + $0xcd0] sm:$0xff]  ;;  %1492 = vmatpush.msrb.mxu3 %v358_v41 }
 0x19b   :  { %v506_v43 = vld [vmem:[%s4525_s1 + $0xef0] sm:$0xff]  ;;  %1508 = vmatpush.msra.mxu0 %v438_v42 }
 0x19c   :  { %v290_v49 = vld [vmem:[%s4525_s1 + $0x830] sm:$0xff]  ;;  %1527 = vmatpush.msra.mxu1 %v506_v43 }
 0x19d   :  { %v354_v50 = vld [vmem:[%s4525_s1 + $0xa30] sm:$0xff]  ;;  %1473 = vmatpush.msrb.mxu2 %v290_v49 }
 0x19e   :  { %v434_v51 = vld [vmem:[%s4525_s1 + $0xcb0] sm:$0xff]  ;;  %1493 = vmatpush.msrb.mxu3 %v354_v50 }
 0x19f   :  { %v502_v52 = vld [vmem:[%s4525_s1 + $0xed0] sm:$0xff]  ;;  %1509 = vmatpush.msra.mxu0 %v434_v51 }
 0x1a0   :  { %v286_v53 = vld [vmem:[%s4525_s1 + $0x810] sm:$0xff]  ;;  %1528 = vmatpush.msra.mxu1 %v502_v52 }
 0x1a1   :  { %v350_v54 = vld [vmem:[%s4525_s1 + $0xa10] sm:$0xff]  ;;  %1474 = vmatpush.msrb.mxu2 %v286_v53 }
 0x1a2   :  { %v430_v55 = vld [vmem:[%s4525_s1 + $0xc90] sm:$0xff]  ;;  %1494 = vmatpush.msrb.mxu3 %v350_v54  ;;  %1475 = vmatmul.f32.vlgmr.msrb.gmra.mxu2 %v2436_v6 }
 0x1a3   :  { %v498_v56 = vld [vmem:[%s4525_s1 + $0xeb0] sm:$0xff]  ;;  %1510 = vmatpush.msra.mxu0 %v430_v55  ;;  %1495 = vmatmul.f32.vlgmr.msrb.gmra.mxu3 %v2440_v8 }
 0x1a4   :  { %v602_v57 = vld [vmem:[%s4525_s1 + $0x11f0] sm:$0xff]  ;;  %1529 = vmatpush.msra.mxu1 %v498_v56 }
 0x1a5   :  { %v666_v58 = vld [vmem:[%s4525_s1 + $0x13f0] sm:$0xff]  ;;  %1539 = vmatpush.msra.mxu2 %v602_v57 }
 0x1a6   :  { %v426_v27 = vld [vmem:[%s4525_s1 + $0xc70] sm:$0xff]  ;;  %1559 = vmatpush.msra.mxu3 %v666_v58 }
 0x1a7   :  { %v494_v60 = vld [vmem:[%s4525_s1 + $0xe90] sm:$0xff]  ;;  %1511 = vmatpush.msra.mxu0 %v426_v27 }
 0x1a8   :  { %v598_v61 = vld [vmem:[%s4525_s1 + $0x11d0] sm:$0xff]  ;;  %1530 = vmatpush.msra.mxu1 %v494_v60 }
 0x1a9   :  { %v662_v62 = vld [vmem:[%s4525_s1 + $0x13d0] sm:$0xff]  ;;  %1540 = vmatpush.msra.mxu2 %v598_v61 }
 0x1aa   :  { %v422_v44 = vld [vmem:[%s4525_s1 + $0xc50] sm:$0xff]  ;;  %1560 = vmatpush.msra.mxu3 %v662_v62 }
 0x1ab   :  { %v490_v63 = vld [vmem:[%s4525_s1 + $0xe70] sm:$0xff]  ;;  %1512 = vmatpush.msra.mxu0 %v422_v44 }
 0x1ac   :  { %v594_v0 = vld [vmem:[%s4525_s1 + $0x11b0] sm:$0xff]  ;;  %1531 = vmatpush.msra.mxu1 %v490_v63 }
 0x1ad   :  { %v658_v1 = vld [vmem:[%s4525_s1 + $0x13b0] sm:$0xff]  ;;  %1541 = vmatpush.msra.mxu2 %v594_v0 }
 0x1ae   :  { %v418_v2 = vld [vmem:[%s4525_s1 + $0xc30] sm:$0xff]  ;;  %1561 = vmatpush.msra.mxu3 %v658_v1 }
 0x1af   :  { %v486_v3 = vld [vmem:[%s4525_s1 + $0xe50] sm:$0xff]  ;;  %1513 = vmatpush.msra.mxu0 %v418_v2  ;;  %v91_v2 = vld [vmem:[%s4525_s1 + $0x1f8] sm:$0xff] }
 0x1b0   :  { %v590_v4 = vld [vmem:[%s4525_s1 + $0x1190] sm:$0xff]  ;;  %1532 = vmatpush.msra.mxu1 %v486_v3 }
 0x1b1   :  { %v654_v9 = vld [vmem:[%s4525_s1 + $0x1390] sm:$0xff]  ;;  %1542 = vmatpush.msra.mxu2 %v590_v4 }
 0x1b2   :  { %v414_v10 = vld [vmem:[%s4525_s1 + $0xc10] sm:$0xff]  ;;  %1562 = vmatpush.msra.mxu3 %v654_v9  ;;  %v3858_v9 = vld.sshfl [vmem:[#allocation1] sm:$0xff pattern:$0x73625140] }
 0x1b3   :  { %v482_v11 = vld [vmem:[%s4525_s1 + $0xe30] sm:$0xff]  ;;  %1514 = vmatpush.msra.mxu0 %v414_v10 }
 0x1b4   :  { %v586_v12 = vld [vmem:[%s4525_s1 + $0x1170] sm:$0xff]  ;;  %1533 = vmatpush.msra.mxu1 %v482_v11  ;;  %1515 = vmatmul.f32.vlgmr.msra.gmra.mxu0 %v2434_v5  ;;  %v87_v11 = vld [vmem:[%s4525_s1 + $0x1d8] sm:$0xff] }
 0x1b5   :  { %v650_v13 = vld [vmem:[%s4525_s1 + $0x1370] sm:$0xff]  ;;  %1543 = vmatpush.msra.mxu2 %v586_v12 }
 0x1b6   :  { %v730_v14 = vld [vmem:[%s4525_s1 + $0x15f0] sm:$0xff]  ;;  %1563 = vmatpush.msra.mxu3 %v650_v13 }
 0x1b7   :  { %v478_v15 = vld [vmem:[%s4525_s1 + $0xe10] sm:$0xff]  ;;  %1579 = vmatpush.msrb.mxu0 %v730_v14 }
 0x1b8   :  { %v582_v16 = vld [vmem:[%s4525_s1 + $0x1150] sm:$0xff]  ;;  %1534 = vmatpush.msra.mxu1 %v478_v15  ;;  %v3876_v15 = vld.sshfl [vmem:[#allocation1 + $0x8] sm:$0xff pattern:$0x73625140] }
 0x1b9   :  { %v646_v17 = vld [vmem:[%s4525_s1 + $0x1350] sm:$0xff]  ;;  %1544 = vmatpush.msra.mxu2 %v582_v16  ;;  %1535 = vmatmul.f32.vlgmr.msra.gmra.mxu1 %v2438_v7  ;;  %v83_v16 = vld [vmem:[%s4525_s1 + $0x1b8] sm:$0xff] }
 0x1ba   :  { %v726_v18 = vld [vmem:[%s4525_s1 + $0x15d0] sm:$0xff]  ;;  %1564 = vmatpush.msra.mxu3 %v646_v17 }
 0x1bb   :  { %v794_v19 = vld [vmem:[%s4525_s1 + $0x17f0] sm:$0xff]  ;;  %1580 = vmatpush.msrb.mxu0 %v726_v18 }
 0x1bc   :  { %v578_v22 = vld [vmem:[%s4525_s1 + $0x1130] sm:$0xff]  ;;  %1599 = vmatpush.msrb.mxu1 %v794_v19 }
 0x1bd   :  { %v642_v23 = vld [vmem:[%s4525_s1 + $0x1330] sm:$0xff]  ;;  %1545 = vmatpush.msra.mxu2 %v578_v22  ;;  %v79_v22 = vld [vmem:[%s4525_s1 + $0x198] sm:$0xff] }
 0x1be   :  { %v722_v24 = vld [vmem:[%s4525_s1 + $0x15b0] sm:$0xff]  ;;  %1565 = vmatpush.msra.mxu3 %v642_v23 }
 0x1bf   :  { %v790_v25 = vld [vmem:[%s4525_s1 + $0x17d0] sm:$0xff]  ;;  %1581 = vmatpush.msrb.mxu0 %v722_v24 }
 0x1c0   :  { %v574_v28 = vld [vmem:[%s4525_s1 + $0x1110] sm:$0xff]  ;;  %1600 = vmatpush.msrb.mxu1 %v790_v25  ;;  %v283_v25 = vld [vmem:[%s4525_s1 + $0x7f8] sm:$0xff] }
 0x1c1   :  { %v638_v29 = vld [vmem:[%s4525_s1 + $0x1310] sm:$0xff]  ;;  %1546 = vmatpush.msra.mxu2 %v574_v28  ;;  %v75_v28 = vld [vmem:[%s4525_s1 + $0x178] sm:$0xff] }
 0x1c2   :  { %v718_v20 = vld [vmem:[%s4525_s1 + $0x1590] sm:$0xff]  ;;  %1566 = vmatpush.msra.mxu3 %v638_v29  ;;  %v155_v29 = vld [vmem:[%s4525_s1 + $0x3f8] sm:$0xff] }
 0x1c3   :  { %v786_v30 = vld [vmem:[%s4525_s1 + $0x17b0] sm:$0xff]  ;;  %1582 = vmatpush.msrb.mxu0 %v718_v20 }
 0x1c4   :  { %v570_v26 = vld [vmem:[%s4525_s1 + $0x10f0] sm:$0xff]  ;;  %1601 = vmatpush.msrb.mxu1 %v786_v30  ;;  %v279_v30 = vld [vmem:[%s4525_s1 + $0x7d8] sm:$0xff] }
 0x1c5   :  { %v634_v31 = vld [vmem:[%s4525_s1 + $0x12f0] sm:$0xff]  ;;  %1547 = vmatpush.msra.mxu2 %v570_v26  ;;  %v3915_v26 = vld.sshfl [vmem:[#allocation1 + $0x20] sm:$0xff pattern:$0x73625140] }
 0x1c6   :  { %v714_v32 = vld [vmem:[%s4525_s1 + $0x1570] sm:$0xff]  ;;  %1567 = vmatpush.msra.mxu3 %v634_v31  ;;  %v71_v31 = vld [vmem:[%s4525_s1 + $0x158] sm:$0xff] }
 0x1c7   :  { %v782_v33 = vld [vmem:[%s4525_s1 + $0x1790] sm:$0xff]  ;;  %1583 = vmatpush.msrb.mxu0 %v714_v32  ;;  %v151_v32 = vld [vmem:[%s4525_s1 + $0x3d8] sm:$0xff] }
 0x1c8   :  { %v566_v34 = vld [vmem:[%s4525_s1 + $0x10d0] sm:$0xff]  ;;  %1602 = vmatpush.msrb.mxu1 %v782_v33  ;;  %v219_v33 = vld [vmem:[%s4525_s1 + $0x5f8] sm:$0xff] }
 0x1c9   :  { %v630_v35 = vld [vmem:[%s4525_s1 + $0x12d0] sm:$0xff]  ;;  %1548 = vmatpush.msra.mxu2 %v566_v34  ;;  %v275_v34 = vld [vmem:[%s4525_s1 + $0x7b8] sm:$0xff] }
 0x1ca   :  { %v710_v21 = vld [vmem:[%s4525_s1 + $0x1550] sm:$0xff]  ;;  %1568 = vmatpush.msra.mxu3 %v630_v35 }
 0x1cb   :  { %v778_v36 = vld [vmem:[%s4525_s1 + $0x1770] sm:$0xff]  ;;  %1584 = vmatpush.msrb.mxu0 %v710_v21  ;;  %v67_v21 = vld [vmem:[%s4525_s1 + $0x138] sm:$0xff] }
 0x1cc   :  { %v562_v37 = vld [vmem:[%s4525_s1 + $0x10b0] sm:$0xff]  ;;  %1603 = vmatpush.msrb.mxu1 %v778_v36  ;;  %v147_v36 = vld [vmem:[%s4525_s1 + $0x3b8] sm:$0xff] }
 0x1cd   :  { %v626_v38 = vld [vmem:[%s4525_s1 + $0x12b0] sm:$0xff]  ;;  %1549 = vmatpush.msra.mxu2 %v562_v37  ;;  %v215_v37 = vld [vmem:[%s4525_s1 + $0x5d8] sm:$0xff] }
 0x1ce   :  { %v706_v39 = vld [vmem:[%s4525_s1 + $0x1530] sm:$0xff]  ;;  %1569 = vmatpush.msra.mxu3 %v626_v38  ;;  %v271_v38 = vld [vmem:[%s4525_s1 + $0x798] sm:$0xff] }
 0x1cf   :  { %v774_v40 = vld [vmem:[%s4525_s1 + $0x1750] sm:$0xff]  ;;  %1585 = vmatpush.msrb.mxu0 %v706_v39  ;;  %v63_v39 = vld [vmem:[%s4525_s1 + $0x118] sm:$0xff] }
 0x1d0   :  { %v558_v41 = vld [vmem:[%s4525_s1 + $0x1090] sm:$0xff]  ;;  %1604 = vmatpush.msrb.mxu1 %v774_v40  ;;  %v3949_v40 = vld.sshfl [vmem:[#allocation1 + $0x18] sm:$0xff pattern:$0x73625140] }
 0x1d1   :  { %v622_v42 = vld [vmem:[%s4525_s1 + $0x1290] sm:$0xff]  ;;  %1550 = vmatpush.msra.mxu2 %v558_v41  ;;  %v143_v41 = vld [vmem:[%s4525_s1 + $0x398] sm:$0xff] }
 0x1d2   :  { %v702_v43 = vld [vmem:[%s4525_s1 + $0x1510] sm:$0xff]  ;;  %1570 = vmatpush.msra.mxu3 %v622_v42  ;;  %v211_v42 = vld [vmem:[%s4525_s1 + $0x5b8] sm:$0xff] }
 0x1d3   :  { %v770_v49 = vld [vmem:[%s4525_s1 + $0x1730] sm:$0xff]  ;;  %1586 = vmatpush.msrb.mxu0 %v702_v43  ;;  %v267_v43 = vld [vmem:[%s4525_s1 + $0x778] sm:$0xff] }
 0x1d4   :  { %v554_v50 = vld [vmem:[%s4525_s1 + $0x1070] sm:$0xff]  ;;  %1605 = vmatpush.msrb.mxu1 %v770_v49  ;;  %v59_v49 = vld [vmem:[%s4525_s1 + $0xf8] sm:$0xff] }
 0x1d5   :  { %v618_v51 = vld [vmem:[%s4525_s1 + $0x1270] sm:$0xff]  ;;  %1551 = vmatpush.msra.mxu2 %v554_v50  ;;  %v139_v50 = vld [vmem:[%s4525_s1 + $0x378] sm:$0xff] }
 0x1d6   :  { %v698_v52 = vld [vmem:[%s4525_s1 + $0x14f0] sm:$0xff]  ;;  %1571 = vmatpush.msra.mxu3 %v618_v51  ;;  %v207_v51 = vld [vmem:[%s4525_s1 + $0x598] sm:$0xff] }
 0x1d7   :  { %v766_v53 = vld [vmem:[%s4525_s1 + $0x1710] sm:$0xff]  ;;  %1587 = vmatpush.msrb.mxu0 %v698_v52  ;;  %v263_v52 = vld [vmem:[%s4525_s1 + $0x758] sm:$0xff] }
 0x1d8   :  { %v550_v54 = vld [vmem:[%s4525_s1 + $0x1050] sm:$0xff]  ;;  %1606 = vmatpush.msrb.mxu1 %v766_v53  ;;  %v55_v53 = vld [vmem:[%s4525_s1 + $0xd8] sm:$0xff] }
 0x1d9   :  { %v614_v55 = vld [vmem:[%s4525_s1 + $0x1250] sm:$0xff]  ;;  %1552 = vmatpush.msra.mxu2 %v550_v54  ;;  %v135_v54 = vld [vmem:[%s4525_s1 + $0x358] sm:$0xff] }
 0x1da   :  { %v694_v56 = vld [vmem:[%s4525_s1 + $0x14d0] sm:$0xff]  ;;  %1572 = vmatpush.msra.mxu3 %v614_v55  ;;  %v203_v55 = vld [vmem:[%s4525_s1 + $0x578] sm:$0xff] }
 0x1db   :  { %v762_v57 = vld [vmem:[%s4525_s1 + $0x16f0] sm:$0xff]  ;;  %1588 = vmatpush.msrb.mxu0 %v694_v56  ;;  %v259_v56 = vld [vmem:[%s4525_s1 + $0x738] sm:$0xff] }
 0x1dc   :  { %v546_v58 = vld [vmem:[%s4525_s1 + $0x1030] sm:$0xff]  ;;  %1607 = vmatpush.msrb.mxu1 %v762_v57  ;;  %v51_v57 = vld [vmem:[%s4525_s1 + $0xb8] sm:$0xff] }
 0x1dd   :  { %v610_v27 = vld [vmem:[%s4525_s1 + $0x1230] sm:$0xff]  ;;  %1553 = vmatpush.msra.mxu2 %v546_v58  ;;  %v131_v58 = vld [vmem:[%s4525_s1 + $0x338] sm:$0xff] }
 0x1de   :  { %v690_v60 = vld [vmem:[%s4525_s1 + $0x14b0] sm:$0xff]  ;;  %1573 = vmatpush.msra.mxu3 %v610_v27  ;;  %v199_v27 = vld [vmem:[%s4525_s1 + $0x558] sm:$0xff] }
 0x1df   :  { %v758_v61 = vld [vmem:[%s4525_s1 + $0x16d0] sm:$0xff]  ;;  %1589 = vmatpush.msrb.mxu0 %v690_v60  ;;  %v255_v60 = vld [vmem:[%s4525_s1 + $0x718] sm:$0xff] }
 0x1e0   :  { %v542_v62 = vld [vmem:[%s4525_s1 + $0x1010] sm:$0xff]  ;;  %1608 = vmatpush.msrb.mxu1 %v758_v61  ;;  %v47_v61 = vld [vmem:[%s4525_s1 + $0x98] sm:$0xff] }
 0x1e1   :  { %v606_v44 = vld [vmem:[%s4525_s1 + $0x1210] sm:$0xff]  ;;  %1554 = vmatpush.msra.mxu2 %v542_v62  ;;  %v127_v62 = vld [vmem:[%s4525_s1 + $0x318] sm:$0xff] }
 0x1e2   :  { %v686_v63 = vld [vmem:[%s4525_s1 + $0x1490] sm:$0xff]  ;;  %1574 = vmatpush.msra.mxu3 %v606_v44  ;;  %1555 = vmatmul.f32.vlgmr.msra.gmra.mxu2 %v3858_v9  ;;  %v195_v44 = vld [vmem:[%s4525_s1 + $0x538] sm:$0xff] }
 0x1e3   :  { %v754_v0 = vld [vmem:[%s4525_s1 + $0x16b0] sm:$0xff]  ;;  %1590 = vmatpush.msrb.mxu0 %v686_v63  ;;  %1575 = vmatmul.f32.vlgmr.msra.gmra.mxu3 %v3876_v15  ;;  %v251_v63 = vld [vmem:[%s4525_s1 + $0x6f8] sm:$0xff] }
 0x1e4   :  { %v810_v1 = vld [vmem:[%s4525_s1 + $0x1870] sm:$0xff]  ;;  %1609 = vmatpush.msrb.mxu1 %v754_v0  ;;  %1639 = vmatpush.msrb.mxu3 %v91_v2  ;;  %v43_v0 = vld [vmem:[%s4525_s1 + $0x78] sm:$0xff] }
 0x1e5   :  { %v682_v3 = vld [vmem:[%s4525_s1 + $0x1470] sm:$0xff]  ;;  %1631 = vmatpush.msrb.mxu2 %v810_v1  ;;  %v123_v1 = vld [vmem:[%s4525_s1 + $0x2f8] sm:$0xff] }
 0x1e6   :  { %v750_v4 = vld [vmem:[%s4525_s1 + $0x1690] sm:$0xff]  ;;  %1591 = vmatpush.msrb.mxu0 %v682_v3  ;;  %1640 = vmatpush.msrb.mxu3 %v87_v11  ;;  %v191_v2 = vld [vmem:[%s4525_s1 + $0x518] sm:$0xff] }
 0x1e7   :  { %v806_v10 = vld [vmem:[%s4525_s1 + $0x1850] sm:$0xff]  ;;  %1610 = vmatpush.msrb.mxu1 %v750_v4  ;;  %v247_v3 = vld [vmem:[%s4525_s1 + $0x6d8] sm:$0xff] }
 0x1e8   :  { %v678_v12 = vld [vmem:[%s4525_s1 + $0x1450] sm:$0xff]  ;;  %1632 = vmatpush.msrb.mxu2 %v806_v10  ;;  %1641 = vmatpush.msrb.mxu3 %v83_v16  ;;  %v39_v4 = vld [vmem:[%s4525_s1 + $0x58] sm:$0xff] }
 0x1e9   :  { %v746_v13 = vld [vmem:[%s4525_s1 + $0x1670] sm:$0xff]  ;;  %1592 = vmatpush.msrb.mxu0 %v678_v12  ;;  %v119_v10 = vld [vmem:[%s4525_s1 + $0x2d8] sm:$0xff] }
 0x1ea   :  { %v802_v14 = vld [vmem:[%s4525_s1 + $0x1830] sm:$0xff]  ;;  %1611 = vmatpush.msrb.mxu1 %v746_v13  ;;  %1642 = vmatpush.msrb.mxu3 %v79_v22  ;;  %v187_v11 = vld [vmem:[%s4525_s1 + $0x4f8] sm:$0xff] }
 0x1eb   :  { %v674_v17 = vld [vmem:[%s4525_s1 + $0x1430] sm:$0xff]  ;;  %1633 = vmatpush.msrb.mxu2 %v802_v14  ;;  %v243_v12 = vld [vmem:[%s4525_s1 + $0x6b8] sm:$0xff] }
 0x1ec   :  { %v742_v18 = vld [vmem:[%s4525_s1 + $0x1650] sm:$0xff]  ;;  %1593 = vmatpush.msrb.mxu0 %v674_v17  ;;  %1643 = vmatpush.msrb.mxu3 %v75_v28  ;;  %v35_v13 = vld [vmem:[%s4525_s1 + $0x38] sm:$0xff] }
 0x1ed   :  { %v798_v19 = vld [vmem:[%s4525_s1 + $0x1810] sm:$0xff]  ;;  %1612 = vmatpush.msrb.mxu1 %v742_v18  ;;  %v115_v14 = vld [vmem:[%s4525_s1 + $0x2b8] sm:$0xff] }
 0x1ee   :  { %v670_v23 = vld [vmem:[%s4525_s1 + $0x1410] sm:$0xff]  ;;  %1634 = vmatpush.msrb.mxu2 %v798_v19  ;;  %1644 = vmatpush.msrb.mxu3 %v71_v31  ;;  %v183_v16 = vld [vmem:[%s4525_s1 + $0x4d8] sm:$0xff] }
 0x1ef   :  { %v738_v24 = vld [vmem:[%s4525_s1 + $0x1630] sm:$0xff]  ;;  %1594 = vmatpush.msrb.mxu0 %v670_v23  ;;  %1968 = vmatmul.msk.f32.vlgmr.msrb.gmra.mxu2 %vm856_vm0, %v3915_v26  ;;  %v239_v17 = vld [vmem:[%s4525_s1 + $0x698] sm:$0xff] }
 0x1f0   :  { %v734_v20 = vld [vmem:[%s4525_s1 + $0x1610] sm:$0xff]  ;;  %1613 = vmatpush.msrb.mxu1 %v738_v24  ;;  %1699 = vmatpush.msra.mxu2 %v283_v25  ;;  %v31_v18 = vld [vmem:[%s4525_s1 + $0x18] sm:$0xff] }
 0x1f1   :  { %1659 = vmatpush.msra.mxu0 %v155_v29  ;;  %v3931_v35 = vld.sshfl [vmem:[#allocation1 + $0x10] sm:$0xff pattern:$0x73625140]  ;;  %1645 = vmatpush.msrb.mxu3 %v67_v21  ;;  %v111_v19 = vld [vmem:[%s4525_s1 + $0x298] sm:$0xff] }
 0x1f2   :  { %1614 = vmatpush.msrb.mxu1 %v734_v20  ;;  %1700 = vmatpush.msra.mxu2 %v279_v30  ;;  %v179_v22 = vld [vmem:[%s4525_s1 + $0x4b8] sm:$0xff] }
 0x1f3   :  { %1595 = vmatmul.f32.vlgmr.msrb.gmra.mxu0 %v3931_v35  ;;  %1615 = vmatmul.f32.vlgmr.msrb.gmra.mxu1 %v3949_v40  ;;  %v235_v23 = vld [vmem:[%s4525_s1 + $0x678] sm:$0xff] }
 0x1f4   :  { %1660 = vmatpush.msra.mxu0 %v151_v32  ;;  %1679 = vmatpush.msra.mxu1 %v219_v33  ;;  %v347_v24 = vld [vmem:[%s4525_s1 + $0x9f8] sm:$0xff] }
 0x1f5   :  { %1701 = vmatpush.msra.mxu2 %v275_v34  ;;  %1646 = vmatpush.msrb.mxu3 %v63_v39  ;;  %v107_v25 = vld [vmem:[%s4525_s1 + $0x278] sm:$0xff] }
 0x1f6   :  { %1661 = vmatpush.msra.mxu0 %v147_v36  ;;  %1680 = vmatpush.msra.mxu1 %v215_v37  ;;  %v175_v28 = vld [vmem:[%s4525_s1 + $0x498] sm:$0xff] }
 0x1f7   :  { %1702 = vmatpush.msra.mxu2 %v271_v38  ;;  %1647 = vmatpush.msrb.mxu3 %v59_v49  ;;  %v231_v29 = vld [vmem:[%s4525_s1 + $0x658] sm:$0xff] }
 0x1f8   :  { %1662 = vmatpush.msra.mxu0 %v143_v41  ;;  %1681 = vmatpush.msra.mxu1 %v211_v42  ;;  %v343_v20 = vld [vmem:[%s4525_s1 + $0x9d8] sm:$0xff] }
 0x1f9   :  { %1703 = vmatpush.msra.mxu2 %v267_v43  ;;  %1648 = vmatpush.msrb.mxu3 %v55_v53  ;;  %v103_v30 = vld [vmem:[%s4525_s1 + $0x258] sm:$0xff] }
 0x1fa   :  { %1663 = vmatpush.msra.mxu0 %v139_v50  ;;  %1682 = vmatpush.msra.mxu1 %v207_v51  ;;  %v171_v31 = vld [vmem:[%s4525_s1 + $0x478] sm:$0xff] }
 0x1fb   :  { %1704 = vmatpush.msra.mxu2 %v263_v52  ;;  %1649 = vmatpush.msrb.mxu3 %v51_v57  ;;  %v227_v32 = vld [vmem:[%s4525_s1 + $0x638] sm:$0xff] }
 0x1fc   :  { %1664 = vmatpush.msra.mxu0 %v135_v54  ;;  %1683 = vmatpush.msra.mxu1 %v203_v55  ;;  %v339_v33 = vld [vmem:[%s4525_s1 + $0x9b8] sm:$0xff] }
 0x1fd   :  { %1705 = vmatpush.msra.mxu2 %v259_v56  ;;  %1650 = vmatpush.msrb.mxu3 %v47_v61  ;;  %v99_v34 = vld [vmem:[%s4525_s1 + $0x238] sm:$0xff] }
 0x1fe   :  { %1665 = vmatpush.msra.mxu0 %v131_v58  ;;  %1684 = vmatpush.msra.mxu1 %v199_v27  ;;  %v167_v21 = vld [vmem:[%s4525_s1 + $0x458] sm:$0xff] }
 0x1ff   :  { %1706 = vmatpush.msra.mxu2 %v255_v60  ;;  %1651 = vmatpush.msrb.mxu3 %v43_v0  ;;  %v223_v36 = vld [vmem:[%s4525_s1 + $0x618] sm:$0xff] }
 0x200   :  { %1666 = vmatpush.msra.mxu0 %v127_v62  ;;  %1685 = vmatpush.msra.mxu1 %v195_v44  ;;  %v335_v37 = vld [vmem:[%s4525_s1 + $0x998] sm:$0xff] }
 0x201   :  { %1707 = vmatpush.msra.mxu2 %v251_v63  ;;  %1652 = vmatpush.msrb.mxu3 %v39_v4  ;;  %v95_v38 = vld [vmem:[%s4525_s1 + $0x218] sm:$0xff] }
 0x202   :  { %1667 = vmatpush.msra.mxu0 %v123_v1  ;;  %1686 = vmatpush.msra.mxu1 %v191_v2  ;;  %v163_v39 = vld [vmem:[%s4525_s1 + $0x438] sm:$0xff] }
 0x203   :  { %1708 = vmatpush.msra.mxu2 %v247_v3  ;;  %1653 = vmatpush.msrb.mxu3 %v35_v13  ;;  %v539_v41 = vld [vmem:[%s4525_s1 + $0xff8] sm:$0xff] }
 0x204   :  { %1668 = vmatpush.msra.mxu0 %v119_v10  ;;  %1687 = vmatpush.msra.mxu1 %v187_v11  ;;  %v331_v42 = vld [vmem:[%s4525_s1 + $0x978] sm:$0xff] }
 0x205   :  { %1709 = vmatpush.msra.mxu2 %v243_v12  ;;  %1654 = vmatpush.msrb.mxu3 %v31_v18  ;;  %v411_v43 = vld [vmem:[%s4525_s1 + $0xbf8] sm:$0xff] }
 0x206   :  { %1669 = vmatpush.msra.mxu0 %v115_v14  ;;  %1688 = vmatpush.msra.mxu1 %v183_v16  ;;  %v159_v49 = vld [vmem:[%s4525_s1 + $0x418] sm:$0xff] }
 0x207   :  { %1710 = vmatpush.msra.mxu2 %v239_v17  ;;  %1719 = vmatpush.msra.mxu3 %v347_v24  ;;  %v535_v50 = vld [vmem:[%s4525_s1 + $0xfd8] sm:$0xff] }
 0x208   :  { %1670 = vmatpush.msra.mxu0 %v111_v19  ;;  %1689 = vmatpush.msra.mxu1 %v179_v22  ;;  %v327_v51 = vld [vmem:[%s4525_s1 + $0x958] sm:$0xff] }
 0x209   :  { %1711 = vmatpush.msra.mxu2 %v235_v23  ;;  %1720 = vmatpush.msra.mxu3 %v343_v20  ;;  %v407_v52 = vld [vmem:[%s4525_s1 + $0xbd8] sm:$0xff] }
 0x20a   :  { %1671 = vmatpush.msra.mxu0 %v107_v25  ;;  %1690 = vmatpush.msra.mxu1 %v175_v28  ;;  %v475_v53 = vld [vmem:[%s4525_s1 + $0xdf8] sm:$0xff] }
 0x20b   :  { %1712 = vmatpush.msra.mxu2 %v231_v29  ;;  %1721 = vmatpush.msra.mxu3 %v339_v33  ;;  %v531_v54 = vld [vmem:[%s4525_s1 + $0xfb8] sm:$0xff] }
 0x20c   :  { %1672 = vmatpush.msra.mxu0 %v103_v30  ;;  %1691 = vmatpush.msra.mxu1 %v171_v31  ;;  %v323_v55 = vld [vmem:[%s4525_s1 + $0x938] sm:$0xff] }
 0x20d   :  { %1713 = vmatpush.msra.mxu2 %v227_v32  ;;  %1722 = vmatpush.msra.mxu3 %v335_v37  ;;  %v403_v56 = vld [vmem:[%s4525_s1 + $0xbb8] sm:$0xff] }
 0x20e   :  { %1673 = vmatpush.msra.mxu0 %v99_v34  ;;  %1692 = vmatpush.msra.mxu1 %v167_v21  ;;  %v471_v57 = vld [vmem:[%s4525_s1 + $0xdd8] sm:$0xff] }
 0x20f   :  { %1714 = vmatpush.msra.mxu2 %v223_v36  ;;  %1723 = vmatpush.msra.mxu3 %v331_v42  ;;  %v527_v58 = vld [vmem:[%s4525_s1 + $0xf98] sm:$0xff] }
 0x210   :  { %1674 = vmatpush.msra.mxu0 %v95_v38  ;;  %1693 = vmatpush.msra.mxu1 %v163_v39  ;;  %v319_v27 = vld [vmem:[%s4525_s1 + $0x918] sm:$0xff] }
 0x211   :  { %1779 = vmatpush.msrb.mxu2 %v539_v41  ;;  %1724 = vmatpush.msra.mxu3 %v327_v51  ;;  %v399_v60 = vld [vmem:[%s4525_s1 + $0xb98] sm:$0xff] }
 0x212   :  { %1739 = vmatpush.msrb.mxu0 %v411_v43  ;;  %1694 = vmatpush.msra.mxu1 %v159_v49  ;;  %v467_v61 = vld [vmem:[%s4525_s1 + $0xdb8] sm:$0xff] }
 0x213   :  { %1780 = vmatpush.msrb.mxu2 %v535_v50  ;;  %1725 = vmatpush.msra.mxu3 %v323_v55  ;;  %v523_v62 = vld [vmem:[%s4525_s1 + $0xf78] sm:$0xff] }
 0x214   :  { %1740 = vmatpush.msrb.mxu0 %v407_v52  ;;  %1759 = vmatpush.msrb.mxu1 %v475_v53  ;;  %v315_v44 = vld [vmem:[%s4525_s1 + $0x8f8] sm:$0xff] }
 0x215   :  { %1781 = vmatpush.msrb.mxu2 %v531_v54  ;;  %1726 = vmatpush.msra.mxu3 %v319_v27  ;;  %v395_v63 = vld [vmem:[%s4525_s1 + $0xb78] sm:$0xff] }
 0x216   :  { %1741 = vmatpush.msrb.mxu0 %v403_v56  ;;  %1760 = vmatpush.msrb.mxu1 %v471_v57  ;;  %v463_v0 = vld [vmem:[%s4525_s1 + $0xd98] sm:$0xff] }
 0x217   :  { %1782 = vmatpush.msrb.mxu2 %v527_v58  ;;  %v519_v1 = vld [vmem:[%s4525_s1 + $0xf58] sm:$0xff]  ;;  %1727 = vmatpush.msra.mxu3 %v315_v44 }
 0x218   :  { %1742 = vmatpush.msrb.mxu0 %v399_v60  ;;  %1761 = vmatpush.msrb.mxu1 %v467_v61  ;;  %v311_v2 = vld [vmem:[%s4525_s1 + $0x8d8] sm:$0xff] }
 0x219   :  { %1783 = vmatpush.msrb.mxu2 %v523_v62  ;;  %v391_v3 = vld [vmem:[%s4525_s1 + $0xb58] sm:$0xff]  ;;  %1728 = vmatpush.msra.mxu3 %v311_v2 }
 0x21a   :  { %v459_v4 = vld [vmem:[%s4525_s1 + $0xd78] sm:$0xff]  ;;  %1743 = vmatpush.msrb.mxu0 %v395_v63  ;;  %1762 = vmatpush.msrb.mxu1 %v463_v0 }
 0x21b   :  { %v515_v10 = vld [vmem:[%s4525_s1 + $0xf38] sm:$0xff]  ;;  %1784 = vmatpush.msrb.mxu2 %v519_v1  ;;  %1655 = vmatmul.f32.vlgmr.msrb.gmra.mxu3 %v2368_v46 }
 0x21c   :  { %v307_v11 = vld [vmem:[%s4525_s1 + $0x8b8] sm:$0xff]  ;;  %1744 = vmatpush.msrb.mxu0 %v391_v3  ;;  %1763 = vmatpush.msrb.mxu1 %v459_v4 }
 0x21d   :  { %v387_v12 = vld [vmem:[%s4525_s1 + $0xb38] sm:$0xff]  ;;  %1785 = vmatpush.msrb.mxu2 %v515_v10  ;;  %1729 = vmatpush.msra.mxu3 %v307_v11 }
 0x21e   :  { %v455_v13 = vld [vmem:[%s4525_s1 + $0xd58] sm:$0xff]  ;;  %1745 = vmatpush.msrb.mxu0 %v387_v12  ;;  %1715 = vmatmul.f32.vlgmr.msra.gmra.mxu2 %v2372_v48 }
 0x21f   :  { %v511_v14 = vld [vmem:[%s4525_s1 + $0xf18] sm:$0xff]  ;;  %1764 = vmatpush.msrb.mxu1 %v455_v13  ;;  %1675 = vmatmul.f32.vlgmr.msra.gmra.mxu0 %v2370_v47 }
 0x220   :  { %v303_v16 = vld [vmem:[%s4525_s1 + $0x898] sm:$0xff]  ;;  %1786 = vmatpush.msrb.mxu2 %v511_v14  ;;  %1695 = vmatmul.f32.vlgmr.msra.gmra.mxu1 %v2366_v45 }
 0x221   :  { %v383_v17 = vld [vmem:[%s4525_s1 + $0xb18] sm:$0xff]  ;;  %1730 = vmatpush.msra.mxu3 %v303_v16 }
 0x222   :  { %v451_v18 = vld [vmem:[%s4525_s1 + $0xd38] sm:$0xff]  ;;  %1746 = vmatpush.msrb.mxu0 %v383_v17 }
 0x223   :  { %v507_v19 = vld [vmem:[%s4525_s1 + $0xef8] sm:$0xff]  ;;  %1765 = vmatpush.msrb.mxu1 %v451_v18 }
 0x224   :  { %v299_v22 = vld [vmem:[%s4525_s1 + $0x878] sm:$0xff]  ;;  %1787 = vmatpush.msrb.mxu2 %v507_v19 }
 0x225   :  { %v379_v23 = vld [vmem:[%s4525_s1 + $0xaf8] sm:$0xff]  ;;  %1731 = vmatpush.msra.mxu3 %v299_v22 }
 0x226   :  { %v447_v24 = vld [vmem:[%s4525_s1 + $0xd18] sm:$0xff]  ;;  %1747 = vmatpush.msrb.mxu0 %v379_v23 }
 0x227   :  { %v503_v25 = vld [vmem:[%s4525_s1 + $0xed8] sm:$0xff]  ;;  %1766 = vmatpush.msrb.mxu1 %v447_v24 }
 0x228   :  { %v295_v28 = vld [vmem:[%s4525_s1 + $0x858] sm:$0xff]  ;;  %1788 = vmatpush.msrb.mxu2 %v503_v25 }
 0x229   :  { %v375_v29 = vld [vmem:[%s4525_s1 + $0xad8] sm:$0xff]  ;;  %1732 = vmatpush.msra.mxu3 %v295_v28 }
 0x22a   :  { %v443_v20 = vld [vmem:[%s4525_s1 + $0xcf8] sm:$0xff]  ;;  %1748 = vmatpush.msrb.mxu0 %v375_v29 }
 0x22b   :  { %v499_v30 = vld [vmem:[%s4525_s1 + $0xeb8] sm:$0xff]  ;;  %1767 = vmatpush.msrb.mxu1 %v443_v20 }
 0x22c   :  { %v291_v31 = vld [vmem:[%s4525_s1 + $0x838] sm:$0xff]  ;;  %1789 = vmatpush.msrb.mxu2 %v499_v30 }
 0x22d   :  { %v371_v32 = vld [vmem:[%s4525_s1 + $0xab8] sm:$0xff]  ;;  %1733 = vmatpush.msra.mxu3 %v291_v31 }
 0x22e   :  { %v439_v33 = vld [vmem:[%s4525_s1 + $0xcd8] sm:$0xff]  ;;  %1749 = vmatpush.msrb.mxu0 %v371_v32 }
 0x22f   :  { %v495_v34 = vld [vmem:[%s4525_s1 + $0xe98] sm:$0xff]  ;;  %1768 = vmatpush.msrb.mxu1 %v439_v33 }
 0x230   :  { %v287_v21 = vld [vmem:[%s4525_s1 + $0x818] sm:$0xff]  ;;  %1790 = vmatpush.msrb.mxu2 %v495_v34 }
 0x231   :  { %v367_v36 = vld [vmem:[%s4525_s1 + $0xa98] sm:$0xff]  ;;  %1734 = vmatpush.msra.mxu3 %v287_v21 }
 0x232   :  { %v435_v37 = vld [vmem:[%s4525_s1 + $0xcb8] sm:$0xff]  ;;  %1750 = vmatpush.msrb.mxu0 %v367_v36  ;;  %1735 = vmatmul.f32.vlgmr.msra.gmra.mxu3 %v2436_v6 }
 0x233   :  { %v491_v38 = vld [vmem:[%s4525_s1 + $0xe78] sm:$0xff]  ;;  %1769 = vmatpush.msrb.mxu1 %v435_v37 }
 0x234   :  { %v603_v39 = vld [vmem:[%s4525_s1 + $0x11f8] sm:$0xff]  ;;  %1791 = vmatpush.msrb.mxu2 %v491_v38 }
 0x235   :  { %v363_v41 = vld [vmem:[%s4525_s1 + $0xa78] sm:$0xff]  ;;  %1799 = vmatpush.msrb.mxu3 %v603_v39 }
 0x236   :  { %v431_v42 = vld [vmem:[%s4525_s1 + $0xc98] sm:$0xff]  ;;  %1751 = vmatpush.msrb.mxu0 %v363_v41 }
 0x237   :  { %v487_v43 = vld [vmem:[%s4525_s1 + $0xe58] sm:$0xff]  ;;  %1770 = vmatpush.msrb.mxu1 %v431_v42 }
 0x238   :  { %v599_v49 = vld [vmem:[%s4525_s1 + $0x11d8] sm:$0xff]  ;;  %1792 = vmatpush.msrb.mxu2 %v487_v43 }
 0x239   :  { %v359_v50 = vld [vmem:[%s4525_s1 + $0xa58] sm:$0xff]  ;;  %1800 = vmatpush.msrb.mxu3 %v599_v49 }
 0x23a   :  { %v427_v51 = vld [vmem:[%s4525_s1 + $0xc78] sm:$0xff]  ;;  %1752 = vmatpush.msrb.mxu0 %v359_v50 }
 0x23b   :  { %v483_v52 = vld [vmem:[%s4525_s1 + $0xe38] sm:$0xff]  ;;  %1771 = vmatpush.msrb.mxu1 %v427_v51 }
 0x23c   :  { %v595_v46 = vld [vmem:[%s4525_s1 + $0x11b8] sm:$0xff]  ;;  %1793 = vmatpush.msrb.mxu2 %v483_v52 }
 0x23d   :  { %v355_v53 = vld [vmem:[%s4525_s1 + $0xa38] sm:$0xff]  ;;  %1801 = vmatpush.msrb.mxu3 %v595_v46 }
 0x23e   :  { %v423_v54 = vld [vmem:[%s4525_s1 + $0xc58] sm:$0xff]  ;;  %1753 = vmatpush.msrb.mxu0 %v355_v53 }
 0x23f   :  { %v479_v55 = vld [vmem:[%s4525_s1 + $0xe18] sm:$0xff]  ;;  %1772 = vmatpush.msrb.mxu1 %v423_v54 }
 0x240   :  { %v591_v56 = vld [vmem:[%s4525_s1 + $0x1198] sm:$0xff]  ;;  %1794 = vmatpush.msrb.mxu2 %v479_v55 }
 0x241   :  { %v351_v57 = vld [vmem:[%s4525_s1 + $0xa18] sm:$0xff]  ;;  %1802 = vmatpush.msrb.mxu3 %v591_v56  ;;  %1795 = vmatmul.f32.vlgmr.msrb.gmra.mxu2 %v2438_v7 }
 0x242   :  { %v419_v58 = vld [vmem:[%s4525_s1 + $0xc38] sm:$0xff]  ;;  %1754 = vmatpush.msrb.mxu0 %v351_v57 }
 0x243   :  { %v795_v27 = vld [vmem:[%s4525_s1 + $0x17f8] sm:$0xff]  ;;  %1773 = vmatpush.msrb.mxu1 %v419_v58  ;;  %1755 = vmatmul.f32.vlgmr.msrb.gmra.mxu0 %v2440_v8 }
 0x244   :  { %v587_v60 = vld [vmem:[%s4525_s1 + $0x1178] sm:$0xff]  ;;  %1859 = vmatpush.msra.mxu2 %v795_v27 }
 0x245   :  { %v667_v61 = vld [vmem:[%s4525_s1 + $0x13f8] sm:$0xff]  ;;  %1803 = vmatpush.msrb.mxu3 %v587_v60 }
 0x246   :  { %v415_v62 = vld [vmem:[%s4525_s1 + $0xc18] sm:$0xff]  ;;  %1819 = vmatpush.msra.mxu0 %v667_v61 }
 0x247   :  { %v791_v48 = vld [vmem:[%s4525_s1 + $0x17d8] sm:$0xff]  ;;  %1774 = vmatpush.msrb.mxu1 %v415_v62 }
 0x248   :  { %v583_v44 = vld [vmem:[%s4525_s1 + $0x1158] sm:$0xff]  ;;  %1860 = vmatpush.msra.mxu2 %v791_v48  ;;  %1775 = vmatmul.f32.vlgmr.msrb.gmra.mxu1 %v2434_v5 }
 0x249   :  { %v663_v63 = vld [vmem:[%s4525_s1 + $0x13d8] sm:$0xff]  ;;  %1804 = vmatpush.msrb.mxu3 %v583_v44 }
 0x24a   :  { %v731_v47 = vld [vmem:[%s4525_s1 + $0x15f8] sm:$0xff]  ;;  %1820 = vmatpush.msra.mxu0 %v663_v63  ;;  %v1136_v63 = vpop.f32.mrf.mxu1 }
 0x24b   :  { %v787_v0 = vld [vmem:[%s4525_s1 + $0x17b8] sm:$0xff]  ;;  %1839 = vmatpush.msra.mxu1 %v731_v47  ;;  %v1176_v47 = vpop.f32.mrf.mxu3 }
 0x24c   :  { %v579_v1 = vld [vmem:[%s4525_s1 + $0x1138] sm:$0xff]  ;;  %1861 = vmatpush.msra.mxu2 %v787_v0  ;;  %v1156_v0 = vpop.f32.mrf.mxu2 }
 0x24d   :  { %v659_v6 = vld [vmem:[%s4525_s1 + $0x13b8] sm:$0xff]  ;;  %1805 = vmatpush.msrb.mxu3 %v579_v1  ;;  %v1196_v1 = vpop.f32.mrf.mxu0 }
 0x24e   :  { %v727_v2 = vld [vmem:[%s4525_s1 + $0x15d8] sm:$0xff]  ;;  %1821 = vmatpush.msra.mxu0 %v659_v6 }
 0x24f   :  { %v783_v3 = vld [vmem:[%s4525_s1 + $0x1798] sm:$0xff]  ;;  %1840 = vmatpush.msra.mxu1 %v727_v2 }
 0x250   :  { %v575_v45 = vld [vmem:[%s4525_s1 + $0x1118] sm:$0xff]  ;;  %1862 = vmatpush.msra.mxu2 %v783_v3 }
 0x251   :  { %v655_v4 = vld [vmem:[%s4525_s1 + $0x1398] sm:$0xff]  ;;  %1806 = vmatpush.msrb.mxu3 %v575_v45 }
 0x252   :  { %v723_v10 = vld [vmem:[%s4525_s1 + $0x15b8] sm:$0xff]  ;;  %1822 = vmatpush.msra.mxu0 %v655_v4  ;;  %v1216_v6 = vpop.f32.mrf.mxu1 }
 0x253   :  { %v779_v11 = vld [vmem:[%s4525_s1 + $0x1778] sm:$0xff]  ;;  %1841 = vmatpush.msra.mxu1 %v723_v10  ;;  %v1256_v2 = vpop.f32.mrf.mxu3 }
 0x254   :  { %v571_v12 = vld [vmem:[%s4525_s1 + $0x10f8] sm:$0xff]  ;;  %1863 = vmatpush.msra.mxu2 %v779_v11  ;;  %v1236_v3 = vpop.f32.mrf.mxu2 }
 0x255   :  { %v651_v13 = vld [vmem:[%s4525_s1 + $0x1378] sm:$0xff]  ;;  %1807 = vmatpush.msrb.mxu3 %v571_v12  ;;  %v1276_v45 = vpop.f32.mrf.mxu0 }
 0x256   :  { %v719_v14 = vld [vmem:[%s4525_s1 + $0x1598] sm:$0xff]  ;;  %1823 = vmatpush.msra.mxu0 %v651_v13 }
 0x257   :  { %v775_v16 = vld [vmem:[%s4525_s1 + $0x1758] sm:$0xff]  ;;  %1842 = vmatpush.msra.mxu1 %v719_v14 }
 0x258   :  { %v567_v17 = vld [vmem:[%s4525_s1 + $0x10d8] sm:$0xff]  ;;  %1864 = vmatpush.msra.mxu2 %v775_v16 }
 0x259   :  { %v647_v18 = vld [vmem:[%s4525_s1 + $0x1358] sm:$0xff]  ;;  %1808 = vmatpush.msrb.mxu3 %v567_v17 }
 0x25a   :  { %v715_v7 = vld [vmem:[%s4525_s1 + $0x1578] sm:$0xff]  ;;  %1824 = vmatpush.msra.mxu0 %v647_v18  ;;  %v1296_v4 = vpop.f32.mrf.mxu1 }
 0x25b   :  { %v771_v19 = vld [vmem:[%s4525_s1 + $0x1738] sm:$0xff]  ;;  %1843 = vmatpush.msra.mxu1 %v715_v7  ;;  %v1336_v10 = vpop.f32.mrf.mxu3 }
 0x25c   :  { %v563_v22 = vld [vmem:[%s4525_s1 + $0x10b8] sm:$0xff]  ;;  %1865 = vmatpush.msra.mxu2 %v771_v19 }
 0x25d   :  { %v643_v23 = vld [vmem:[%s4525_s1 + $0x1338] sm:$0xff]  ;;  %1809 = vmatpush.msrb.mxu3 %v563_v22  ;;  %v1356_v11 = vpop.f32.mrf.mxu0 }
 0x25e   :  { %v711_v24 = vld [vmem:[%s4525_s1 + $0x1558] sm:$0xff]  ;;  %1825 = vmatpush.msra.mxu0 %v643_v23 }
 0x25f   :  { %v767_v8 = vld [vmem:[%s4525_s1 + $0x1718] sm:$0xff]  ;;  %1844 = vmatpush.msra.mxu1 %v711_v24 }
 0x260   :  { %v559_v25 = vld [vmem:[%s4525_s1 + $0x1098] sm:$0xff]  ;;  %1866 = vmatpush.msra.mxu2 %v767_v8 }
 0x261   :  { %v639_v28 = vld [vmem:[%s4525_s1 + $0x1318] sm:$0xff]  ;;  %1810 = vmatpush.msrb.mxu3 %v559_v25 }
 0x262   :  { %v707_v29 = vld [vmem:[%s4525_s1 + $0x1538] sm:$0xff]  ;;  %1826 = vmatpush.msra.mxu0 %v639_v28  ;;  %v1376_v12 = vpop.f32.mrf.mxu1 }
 0x263   :  { %v763_v20 = vld [vmem:[%s4525_s1 + $0x16f8] sm:$0xff]  ;;  %1845 = vmatpush.msra.mxu1 %v707_v29 }
 0x264   :  { %v555_v30 = vld [vmem:[%s4525_s1 + $0x1078] sm:$0xff]  ;;  %1867 = vmatpush.msra.mxu2 %v763_v20 }
 0x265   :  { %v635_v5 = vld [vmem:[%s4525_s1 + $0x12f8] sm:$0xff]  ;;  %1811 = vmatpush.msrb.mxu3 %v555_v30  ;;  %v1436_v14 = vpop.f32.mrf.mxu0 }
 0x266   :  { %v703_v31 = vld [vmem:[%s4525_s1 + $0x1518] sm:$0xff]  ;;  %1827 = vmatpush.msra.mxu0 %v635_v5 }
 0x267   :  { %v759_v32 = vld [vmem:[%s4525_s1 + $0x16d8] sm:$0xff]  ;;  %1846 = vmatpush.msra.mxu1 %v703_v31 }
 0x268   :  { %v551_v33 = vld [vmem:[%s4525_s1 + $0x1058] sm:$0xff]  ;;  %1868 = vmatpush.msra.mxu2 %v759_v32 }
 0x269   :  { %v631_v34 = vld [vmem:[%s4525_s1 + $0x12d8] sm:$0xff]  ;;  %1812 = vmatpush.msrb.mxu3 %v551_v33 }
 0x26a   :  { %v699_v21 = vld [vmem:[%s4525_s1 + $0x14f8] sm:$0xff]  ;;  %1828 = vmatpush.msra.mxu0 %v631_v34  ;;  %v1456_v16 = vpop.f32.mrf.mxu1 }
 0x26b   :  { %v755_v36 = vld [vmem:[%s4525_s1 + $0x16b8] sm:$0xff]  ;;  %1847 = vmatpush.msra.mxu1 %v699_v21 }
 0x26c   :  { %v547_v37 = vld [vmem:[%s4525_s1 + $0x1038] sm:$0xff]  ;;  %1869 = vmatpush.msra.mxu2 %v755_v36 }
 0x26d   :  { %v627_v38 = vld [vmem:[%s4525_s1 + $0x12b8] sm:$0xff]  ;;  %1813 = vmatpush.msrb.mxu3 %v547_v37  ;;  %v1516_v23 = vpop.f32.mrf.mxu0 }
 0x26e   :  { %v695_v39 = vld [vmem:[%s4525_s1 + $0x14d8] sm:$0xff]  ;;  %1829 = vmatpush.msra.mxu0 %v627_v38 }
 0x26f   :  { %v751_v41 = vld [vmem:[%s4525_s1 + $0x1698] sm:$0xff]  ;;  %1848 = vmatpush.msra.mxu1 %v695_v39 }
 0x270   :  { %v543_v42 = vld [vmem:[%s4525_s1 + $0x1018] sm:$0xff]  ;;  %1870 = vmatpush.msra.mxu2 %v751_v41 }
 0x271   :  { %v623_v43 = vld [vmem:[%s4525_s1 + $0x1298] sm:$0xff]  ;;  %1814 = vmatpush.msrb.mxu3 %v543_v42 }
 0x272   :  { %v691_v49 = vld [vmem:[%s4525_s1 + $0x14b8] sm:$0xff]  ;;  %1830 = vmatpush.msra.mxu0 %v623_v43  ;;  %1815 = vmatmul.f32.vlgmr.msrb.gmra.mxu3 %v3858_v9  ;;  %v1536_v25 = vpop.f32.mrf.mxu1 }
 0x273   :  { %v747_v50 = vld [vmem:[%s4525_s1 + $0x1678] sm:$0xff]  ;;  %1849 = vmatpush.msra.mxu1 %v691_v49 }
 0x274   :  { %v619_v51 = vld [vmem:[%s4525_s1 + $0x1278] sm:$0xff]  ;;  %1871 = vmatpush.msra.mxu2 %v747_v50 }
 0x275   :  { %v687_v52 = vld [vmem:[%s4525_s1 + $0x1498] sm:$0xff]  ;;  %1831 = vmatpush.msra.mxu0 %v619_v51  ;;  %v1596_v5 = vpop.f32.mrf.mxu0 }
 0x276   :  { %v811_v46 = vld [vmem:[%s4525_s1 + $0x1878] sm:$0xff]  ;;  %1850 = vmatpush.msra.mxu1 %v687_v52 }
 0x277   :  { %v743_v53 = vld [vmem:[%s4525_s1 + $0x1658] sm:$0xff]  ;;  %1891 = vmatpush.msra.mxu3 %v811_v46 }
 0x278   :  { %v615_v54 = vld [vmem:[%s4525_s1 + $0x1258] sm:$0xff]  ;;  %1872 = vmatpush.msra.mxu2 %v743_v53 }
 0x279   :  { %v683_v55 = vld [vmem:[%s4525_s1 + $0x1478] sm:$0xff]  ;;  %1832 = vmatpush.msra.mxu0 %v615_v54 }
 0x27a   :  { %v807_v56 = vld [vmem:[%s4525_s1 + $0x1858] sm:$0xff]  ;;  %1851 = vmatpush.msra.mxu1 %v683_v55  ;;  %v1616_v34 = vpop.f32.mrf.mxu1 }
 0x27b   :  { %v739_v57 = vld [vmem:[%s4525_s1 + $0x1638] sm:$0xff]  ;;  %1892 = vmatpush.msra.mxu3 %v807_v56 }
 0x27c   :  { %v611_v9 = vld [vmem:[%s4525_s1 + $0x1238] sm:$0xff]  ;;  %1873 = vmatpush.msra.mxu2 %v739_v57 }
 0x27d   :  { %v679_v58 = vld [vmem:[%s4525_s1 + $0x1458] sm:$0xff]  ;;  %1833 = vmatpush.msra.mxu0 %v611_v9 }
 0x27e   :  { %v803_v27 = vld [vmem:[%s4525_s1 + $0x1838] sm:$0xff]  ;;  %1852 = vmatpush.msra.mxu1 %v679_v58 }
 0x27f   :  { %v735_v60 = vld [vmem:[%s4525_s1 + $0x1618] sm:$0xff]  ;;  %1893 = vmatpush.msra.mxu3 %v803_v27 }
 0x280   :  { %v607_v61 = vld [vmem:[%s4525_s1 + $0x1218] sm:$0xff]  ;;  %1874 = vmatpush.msra.mxu2 %v735_v60 }
 0x281   :  { %v675_v62 = vld [vmem:[%s4525_s1 + $0x1438] sm:$0xff]  ;;  %1834 = vmatpush.msra.mxu0 %v607_v61  ;;  %1875 = vmatmul.f32.vlgmr.msra.gmra.mxu2 %v3949_v40  ;;  %v1316_v40 = vpop.f32.mrf.mxu2 }
 0x282   :  { %v799_v48 = vld [vmem:[%s4525_s1 + $0x1818] sm:$0xff]  ;;  %1853 = vmatpush.msra.mxu1 %v675_v62  ;;  %1835 = vmatmul.f32.vlgmr.msra.gmra.mxu0 %v3876_v15  ;;  %v1416_v15 = vpop.f32.mrf.mxu3 }
 0x283   :  { %v671_v44 = vld [vmem:[%s4525_s1 + $0x1418] sm:$0xff]  ;;  %1894 = vmatpush.msra.mxu3 %v799_v48 }
 0x284   :  { %1854 = vmatpush.msra.mxu1 %v671_v44  ;;  %1969 = vmatmul.msk.f32.vlgmr.msra.gmra.mxu3 %vm856_vm0, %v3915_v26  ;;  %v1976_v26 = vld [vmem:[%s4526_s2] sm:$0xf] }
 0x285   :  { %1855 = vmatmul.f32.vlgmr.msra.gmra.mxu1 %v3931_v35  ;;  %v815_v35 = vperm.slane %v1976_v26, 1  ;;  %v816_v17 = vperm.slane %v1976_v26, 2  ;;  %v817_v33 = vperm.slane %v1976_v26, 3 }
 0x287   :  { %v1137_v19 = vadd.f32 %v1136_v63, %v815_v35 }
 0x289   :  { %v1396_v13 = vpop.f32.mrf.mxu2  ;;  %v1157_v24 = vadd.f32 %v1156_v0, %v1137_v19 }
 0x28a   :  { %v1496_v18 = vpop.f32.mrf.mxu3  ;;  %v1397_v22 = vadd.f32 %v1396_v13, %v816_v17  ;;  %v1899_v17 = vmax.f32 %v3485_v59, 0.0 }
 0x28b   :  { %v1177_v20 = vadd.f32 %v1176_v47, %v1157_v24 }
 0x28c   :  { %v1417_v8 = vadd.f32 %v1416_v15, %v1397_v22 }
 0x28d   :  { %v1197_v31 = vadd.f32 %v1196_v1, %v1177_v20 }
 0x28e   :  { %v1437_v30 = vadd.f32 %v1436_v14, %v1417_v8 }
 0x28f   :  { %v1217_v36 = vadd.f32 %v1216_v6, %v1197_v31 }
 0x290   :  { %v1457_v32 = vadd.f32 %v1456_v16, %v1437_v30 }
 0x291   :  { %v1476_v7 = vpop.f32.mrf.mxu2  ;;  %v1237_v42 = vadd.f32 %v1236_v3, %v1217_v36 }
 0x292   :  { %v1576_v28 = vpop.f32.mrf.mxu3  ;;  %v1477_v37 = vadd.f32 %v1476_v7, %v1457_v32 }
 0x293   :  { %v1257_v51 = vadd.f32 %v1256_v2, %v1237_v42 }
 0x294   :  { %v1497_v43 = vadd.f32 %v1496_v18, %v1477_v37 }
 0x295   :  { %v1277_v54 = vadd.f32 %v1276_v45, %v1257_v51 }
 0x296   :  { %v1517_v52 = vadd.f32 %v1516_v23, %v1497_v43  ;;  %v1942_v43 = vstv %s4528_s4 }
 0x297   :  { %v1297_v9 = vadd.f32 %v1296_v4, %v1277_v54  ;;  %v1918_v4 = vld [vmem:[%s4527_s3] sm:$0xf]  ;;  %s2003_s3 = smov [#allocation3]  }
 0x298   :  { %v1537_v55 = vadd.f32 %v1536_v25, %v1517_v52  ;;  %v1921_v16 = vperm.slane %v1918_v4, 1  ;;  %v1922_v7 = vperm.slane %v1918_v4, 2  ;;  %s1951_s12 = sshll.u32 %s2003_s3, 4  ;;  %s1952_s12 = int_to_ptr.vmem [resolvable:$true] %s1951_s12 }
 0x299   :  { %v1556_v29 = vpop.f32.mrf.mxu2  ;;  %v1317_v27 = vadd.f32 %v1316_v40, %v1297_v9 }
 0x29a   :  { %v1557_v58 = vadd.f32 %v1556_v29, %v1537_v55  ;;  %v1923_v29 = vperm.slane %v1918_v4, 3 }
 0x29b   :  { %v1337_v48 = vadd.f32 %v1336_v10, %v1317_v27 }
 0x29c   :  { %v1676_v41 = vpop.f32.mrf.mxu0  ;;  %v1577_v62 = vadd.f32 %v1576_v28, %v1557_v58 }
 0x29d   :  { %v1696_v50 = vpop.f32.mrf.mxu1  ;;  %v1357_v0 = vadd.f32 %v1356_v11, %v1337_v48  ;;  %v1920_v11 = vperm.slane %v1918_v4, 0 }
 0x29e   :  { %v1656_v21 = vpop.f32.mrf.mxu3  ;;  %v1597_v47 = vadd.f32 %v1596_v5, %v1577_v62 }
 0x29f   :  { %v1657_v38 = vadd.f32 %v1656_v21, %v817_v33  ;;  %v1377_v3 = vadd.f32 %v1376_v12, %v1357_v0  ;;  %v1928_v23 = vmul.f32 %v1920_v11, %v1899_v17 }
 0x2a0   :  { %v1617_v2 = vadd.f32 %v1616_v34, %v1597_v47 }
 0x2a1   :  { %v1636_v39 = vpop.f32.mrf.mxu2  ;;  %v1677_v49 = vadd.f32 %v1676_v41, %v1657_v38  ;;  %v1900_v40 = vmax.f32 %v1377_v3, 0.0  ;;  %v1932_v31 = vsel %vm1910_vm1, %v1928_v23, 0.0 }
 0x2a2   :  { %v1637_v13 = vadd.f32 %v1636_v39, %v1617_v2 }
 0x2a3   :  { %v1697_v46 = vadd.f32 %v1696_v50, %v1677_v49  ;;  %v1929_v12 = vmul.f32 %v1921_v16, %v1900_v40  ;;  %v1907_v30 = vrot.slane %v1900_v40, 6 }
 0x2a4   :  { %v1901_v18 = vmax.f32 %v1637_v13, 0.0 }
 0x2a5   :  { %v1933_v20 = vsel %vm1910_vm1, %v1929_v12, 0.0  ;;  %v1911_v38 = vsel %vm1910_vm1, %v1899_v17, %v1907_v30 }
 0x2a6   :  { %v1930_v24 = vmul.f32 %v1922_v7, %v1901_v18  ;;  %v1934_v32 = vadd.f32 %v1933_v20, %v1932_v31  ;;  %v1908_v33 = vrot.slane %v1901_v18, 4 }
 0x2a8   :  { %v1935_v59 = vsel %vm1910_vm1, %v1930_v24, 0.0 }
 0x2a9   :  { %v1716_v53 = vpop.f32.mrf.mxu2  ;;  %v1936_v36 = vadd.f32 %v1935_v59, %v1934_v32 }
 0x2aa   :  { %v1717_v56 = vadd.f32 %v1716_v53, %v1697_v46 }
 0x2b5   :  { %v1736_v57 = vpop.f32.mrf.mxu3 }
 0x2b6   :  { %v1737_v60 = vadd.f32 %v1736_v57, %v1717_v56 }
 0x2c0   :  { %v1756_v61 = vpop.f32.mrf.mxu0 }
 0x2c1   :  { %v1757_v44 = vadd.f32 %v1756_v61, %v1737_v60 }
 0x2c4   :  { %v1796_v6 = vpop.f32.mrf.mxu2 }
 0x2c5   :  { %v1776_v63 = vpop.f32.mrf.mxu1 }
 0x2c6   :  { %v1777_v1 = vadd.f32 %v1776_v63, %v1757_v44 }
 0x2c8   :  { %v1797_v15 = vadd.f32 %v1796_v6, %v1777_v1 }
 0x2f5   :  { %v1816_v45 = vpop.f32.mrf.mxu3 }
 0x2f6   :  { %v1817_v14 = vadd.f32 %v1816_v45, %v1797_v15 }
 0x2ff   :  { %v1836_v26 = vpop.f32.mrf.mxu0 }
 0x300   :  { %v1837_v10 = vadd.f32 %v1836_v26, %v1817_v14 }
 0x302   :  { %v1856_v35 = vpop.f32.mrf.mxu1 }
 0x303   :  { %v1857_v19 = vadd.f32 %v1856_v35, %v1837_v10 }
 0x304   :  { %v1876_v22 = vpop.f32.mrf.mxu2 }
 0x305   :  { %v1877_v8 = vadd.f32 %v1876_v22, %v1857_v19 }
 0x307   :  { %v1896_v25 = vpop.f32.mrf.mxu3 }
 0x308   :  { %v1897_v28 = vadd.f32 %v1896_v25, %v1877_v8 }
 0x30a   :  { %v1902_v5 = vmax.f32 %v1897_v28, 0.0 }
 0x30c   :  { %v1909_v34 = vrot.slane %v1902_v5, 2  ;;  %v1931_v21 = vmul.f32 %v1923_v29, %v1902_v5 }
 0x30e   :  { %v1937_v37 = vsel %vm1910_vm1, %v1931_v21, 0.0  ;;  %v1913_v39 = vsel %vm1912_vm2, %v1908_v33, %v1909_v34 }
 0x30f   :  { %v1938_v41 = vadd.f32 %v1937_v37, %v1936_v36  ;;  %v1915_v42 = vsel %vm1914_vm3, %v1911_v38, %v1913_v39 }
 0x310   :  { %1917 = vst [vmem:[#allocation3] sm:$0xff] %v1915_v42 }
 0x311   :  { %1939 = vadd.xlane.f32.xlu0 %v1938_v41  ;;  %1956 = dma.vmem_to_hbm [thread:$0]  %s1952_s12, 128, %s1954_s15, [#allocation4]  }
 0x384   :  { %v1940_v49 = vpop.xlane.xlu0 %1939 }
 0x385   :  { %v1943_v50 = vadd.f32 %v1942_v43, %v1940_v49 }
 0x387   :  { %1945 = vst.msk [vmem:[%s4530_s6] sm:$0x3] %vm1944_vm4, %v1943_v50 }
 0x388   :  { %2001 = dma.done.wait [#allocation4], 128  }
 0x389   :  { %2002 = vsyncadd [#allocation4], 4294967168 }
 0x38a   :  { %1965 = vsyncpa [#allocation4], 1 }

</bundles_post_ra>
